<compile_context>
chip_gen: v7x
topology: tpu7x:2x2x1
jax: 0.10.0
libtpu: 0.0.40
codegen_flags: <defaults>
</compile_context>

<pallas_src>
import functools

import jax
import jax.numpy as jnp
from jax import lax
from jax.experimental import pallas as pl
from jax.experimental.pallas import tpu as pltpu

LANE = 128                    # channel padding granularity (lane width)
SUBLANE = 8                   # sublane granularity for layout-free reshapes
COMPUTE_DTYPE = jnp.bfloat16  # matmul input dtype (accumulation stays f32)


def _round_up(x, m):
    return (x + m - 1) // m * m


def _leaky_relu(x, slope=0.2):
    return jnp.where(x > 0, x, slope * x)


def _ffn_kernel(x_ref, w1_ref, dw_ref, w3_ref, o_ref):
    """One (batch, row-tile) grid step.

    x_ref  : (1, TH+2, Wp, C)    input window (bf16): TH image rows plus one
                                 halo row above/below; zero rows/cols supply
                                 the 3x3 conv's padding at image borders.
    w1_ref : (C, Cmp)            1x1 conv #1 weight (bf16, matmul layout)
    dw_ref : (9, Cmp)            depthwise 3x3 weights, taps row-major (f32)
    w3_ref : (Cmp, Coutp)        1x1 conv #2 weight (bf16)
    o_ref  : (1, TH, Wp, Coutp)  output tile (bf16, lane-dense padded)
    """
    TH2, Wp, C = x_ref.shape[1], x_ref.shape[2], x_ref.shape[3]
    TH = TH2 - 2
    Cmp = w1_ref.shape[1]
    Coutp = w3_ref.shape[1]

    x_ext = x_ref[0]                                        # (TH+2, Wp, C)

    # ---- 1x1 conv #1 on the MXU (bf16 x bf16 -> f32) + LeakyReLU(0.2) ----
    h1 = jnp.dot(x_ext.reshape(TH2 * Wp, C), w1_ref[...],
                 preferred_element_type=jnp.float32)
    h1 = _leaky_relu(h1).reshape(TH2, Wp, Cmp)

    # ---- depthwise 3x3 (VPU f32; horizontal taps via XLU sublane rolls) ---
    # Output (image) column w needs h1 padded-columns w, w+1, w+2, i.e. the
    # dx-th tap is h1 rolled by -dx along W (shift = Wp - dx).  Valid results
    # land in columns [0, W); the roll wrap-around only touches the padded
    # tail columns, which the wrapper slices away.
    dwv = dw_ref[...]                                       # (9, Cmp)
    acc = jnp.zeros((TH, Wp, Cmp), jnp.float32)
    for dy in range(3):
        rows = h1[dy:dy + TH]                               # (TH, Wp, Cmp)
        for dx in range(3):
            tap = rows if dx == 0 else pltpu.roll(rows, Wp - dx, axis=1)
            acc = acc + tap * dwv[dy * 3 + dx]
    h2 = _leaky_relu(acc)

    # ---- 1x1 conv #2 on the MXU -------------------------------------------
    out = jnp.dot(h2.reshape(TH * Wp, Cmp).astype(w3_ref.dtype), w3_ref[...],
                  preferred_element_type=jnp.float32)
    o_ref[0] = out.reshape(TH, Wp, Coutp).astype(o_ref.dtype)


def feedforward_nhwc(x_nhwc, w1, dw, w3, *, tile_h=16):
    """x_nhwc: (B, H, W, C) f32.  w1: (C, Cm), dw: (3, 3, Cm), w3: (Cm, Cout).

    Returns (B, H, W, Cout) bf16 (f32-in / bf16-compute / bf16-out contract).
    """
    B, H, W, C = x_nhwc.shape
    Cm = w1.shape[1]
    Cout = w3.shape[1]

    Cmp = _round_up(Cm, LANE)
    Coutp = _round_up(Cout, LANE)
    Wp = _round_up(W + 2, SUBLANE)      # >= 1 zero column on each image side

    # Static row tile (must divide H).
    # TODO(synk): pad H instead of shrinking TH when H has no good divisor.
    TH = max(1, min(tile_h, H))
    while H % TH:
        TH -= 1
    NT = H // TH

    # Zero-pad H by one row top/bottom and W to Wp (conv padding), cast bf16,
    # then build overlapping (TH+2)-row windows -> one input stream, no halos,
    # no in-kernel masks/concatenate.  Channels stay unpadded (C is small).
    x_p = jnp.pad(x_nhwc, ((0, 0), (1, 1), (1, Wp - W - 1), (0, 0))
                  ).astype(COMPUTE_DTYPE)                    # (B, H+2, Wp, C)
    x_win = jnp.stack([x_p[:, i * TH:i * TH + TH + 2] for i in range(NT)],
                      axis=1)                                # (B, NT, TH+2, Wp, C)
    x_win = x_win.reshape(B * NT, TH + 2, Wp, C)

    w1_p = jnp.pad(w1, ((0, 0), (0, Cmp - Cm))).astype(COMPUTE_DTYPE)
    dw_p = jnp.pad(dw.reshape(9, Cm), ((0, 0), (0, Cmp - Cm))).astype(jnp.float32)
    w3_p = jnp.pad(w3, ((0, Cmp - Cm), (0, Coutp - Cout))).astype(COMPUTE_DTYPE)

    out_p = pl.pallas_call(
        _ffn_kernel,
        out_shape=jax.ShapeDtypeStruct((B, H, Wp, Coutp), jnp.bfloat16),
        grid_spec=pltpu.PrefetchScalarGridSpec(
            num_scalar_prefetch=0,
            grid=(B, NT),
            in_specs=[
                pl.BlockSpec((1, TH + 2, Wp, C),
                             lambda b, i: (b * NT + i, 0, 0, 0)),
                pl.BlockSpec((C, Cmp), lambda b, i: (0, 0)),
                pl.BlockSpec((9, Cmp), lambda b, i: (0, 0)),
                pl.BlockSpec((Cmp, Coutp), lambda b, i: (0, 0)),
            ],
            out_specs=pl.BlockSpec((1, TH, Wp, Coutp),
                                   lambda b, i: (b, i, 0, 0)),
        ),
        compiler_params=pltpu.CompilerParams(
            dimension_semantics=("parallel", "parallel"),
            vmem_limit_bytes=48 * 1024 * 1024,
        ),
    )(x_win, w1_p, dw_p, w3_p)

    # Drop the padded W columns / output channels (lane-dense store inside).
    return out_p[:, :, :W, :Cout]


@functools.partial(jax.jit, static_argnames=("tile_h",))
def feedforward_nchw(x_nchw, w1, dw, w3, tile_h=16):
    """PyTorch-compatible entry: x (B, C, H, W) -> (B, Cout, H, W) f32.

    NOTE: the NCHW<->NHWC transposes are full HBM relayouts; keep the model
    NHWC end-to-end (call feedforward_nhwc directly) whenever possible.
    """
    x_nhwc = jnp.transpose(x_nchw, (0, 2, 3, 1))
    y_nhwc = feedforward_nhwc(x_nhwc, w1, dw, w3, tile_h=tile_h)
    return jnp.transpose(y_nhwc, (0, 3, 1, 2)).astype(jnp.float32)


def init_params(key, dim, out_channels, mult=2):
    """Synthetic weights in PyTorch conv layout, plus kernel (matmul) layout:
      conv1 weight (Cm, C, 1, 1)    -> (C, Cm)
      dwconv weight (Cm, 1, 3, 3)   -> (3, 3, Cm)
      conv3 weight (Cout, Cm, 1, 1) -> (Cm, Cout)
    """
    Cm = dim * mult
    k1, k2, k3 = jax.random.split(key, 3)
    w1_pt = jax.random.normal(k1, (Cm, dim, 1, 1), jnp.float32) * 0.1
    dw_pt = jax.random.normal(k2, (Cm, 1, 3, 3), jnp.float32) * 0.1
    w3_pt = jax.random.normal(k3, (out_channels, Cm, 1, 1), jnp.float32) * 0.1

    w1 = jnp.transpose(w1_pt[:, :, 0, 0], (1, 0))        # (C, Cm)
    dw = jnp.transpose(dw_pt[:, 0, :, :], (1, 2, 0))     # (3, 3, Cm)
    w3 = jnp.transpose(w3_pt[:, :, 0, 0], (1, 0))        # (Cm, Cout)
    return (w1, dw, w3), (w1_pt, dw_pt, w3_pt)


def _reference_nchw(x_nchw, pt_weights):
    """Pure-JAX f32 reference matching the PyTorch forward (NCHW convs)."""
    w1_pt, dw_pt, w3_pt = pt_weights
    Cm = w1_pt.shape[0]
    dn = lax.conv_dimension_numbers(x_nchw.shape, w1_pt.shape,
                                    ("NCHW", "OIHW", "NCHW"))
    h = lax.conv_general_dilated(x_nchw, w1_pt, (1, 1), "VALID",
                                 dimension_numbers=dn)
    h = jnp.where(h > 0, h, 0.2 * h)
    dn2 = lax.conv_dimension_numbers(h.shape, dw_pt.shape,
                                     ("NCHW", "OIHW", "NCHW"))
    h = lax.conv_general_dilated(h, dw_pt, (1, 1), ((1, 1), (1, 1)),
                                 dimension_numbers=dn2,
                                 feature_group_count=Cm)
    h = jnp.where(h > 0, h, 0.2 * h)
    dn3 = lax.conv_dimension_numbers(h.shape, w3_pt.shape,
                                     ("NCHW", "OIHW", "NCHW"))
    out = lax.conv_general_dilated(h, w3_pt, (1, 1), "VALID",
                                   dimension_numbers=dn3)
    return out


if __name__ == "__main__":
    key = jax.random.PRNGKey(0)
    kx, kp = jax.random.split(key)

    B, C, H, W = 2, 4, 16, 16
    out_channels = 4
    mult = 2

    x = jax.random.normal(kx, (B, C, H, W), jnp.float32)
    (w1, dw, w3), pt_weights = init_params(kp, C, out_channels, mult)

    y = feedforward_nchw(x, w1, dw, w3)
    y = jax.block_until_ready(y)

    y_ref = _reference_nchw(x, pt_weights)
    assert y.shape == (B, out_channels, H, W), y.shape
    # bf16 matmuls / bf16 output with f32 accumulation -> loose-but-safe tol.
    err = float(jnp.max(jnp.abs(y - y_ref)))
    assert err < 2e-2, err

    print("KERNEL_OK")
</pallas_src>

<mosaic_0001>
module attributes {stable_mosaic.version = 11 : i64} {
  func.func @_ffn_kernel(%arg0: i32, %arg1: i32, %arg2: memref<1x18x24x4xbf16, #tpu.memory_space<vmem>>, %arg3: memref<4x128xbf16, #tpu.memory_space<vmem>>, %arg4: memref<9x128xf32, #tpu.memory_space<vmem>>, %arg5: memref<128x128xbf16, #tpu.memory_space<vmem>>, %arg6: memref<1x16x24x128xbf16, #tpu.memory_space<vmem>>) attributes {dimension_semantics = [#tpu.dimension_semantics<parallel>, #tpu.dimension_semantics<parallel>], iteration_bounds = array<i64: 2, 1>, scalar_prefetch = 0 : i64, scratch_operands = 0 : i64, tpu.core_type = #tpu.core_type<tc>, window_params = [{transform_indices = @transform_0, window_bounds = array<i64: 1, 18, 24, 4>}, {pipeline_mode = #tpu.pipeline_mode<synchronous>, transform_indices = @transform_1, window_bounds = array<i64: 4, 128>}, {pipeline_mode = #tpu.pipeline_mode<synchronous>, transform_indices = @transform_2, window_bounds = array<i64: 9, 128>}, {pipeline_mode = #tpu.pipeline_mode<synchronous>, transform_indices = @transform_3, window_bounds = array<i64: 128, 128>}, {transform_indices = @transform_4, window_bounds = array<i64: 1, 16, 24, 128>}]} {
    %c0 = arith.constant 0 : index
    %c0_0 = arith.constant 0 : index
    %c0_1 = arith.constant 0 : index
    %c0_2 = arith.constant 0 : index
    %0 = vector.load %arg2[%c0, %c0_0, %c0_1, %c0_2] : memref<1x18x24x4xbf16, #tpu.memory_space<vmem>>, vector<1x18x24x4xbf16>
    %1 = vector.shape_cast %0 : vector<1x18x24x4xbf16> to vector<18x24x4xbf16>
    %2 = vector.shape_cast %1 : vector<18x24x4xbf16> to vector<432x4xbf16>
    %c0_3 = arith.constant 0 : index
    %c0_4 = arith.constant 0 : index
    %3 = vector.load %arg3[%c0_3, %c0_4] : memref<4x128xbf16, #tpu.memory_space<vmem>>, vector<4x128xbf16>
    %cst = arith.constant dense<0.000000e+00> : vector<432x128xf32>
    %4 = tpu.matmul %2, %3, %cst {dimension_numbers = #tpu.dot_dimension_numbers<[1], [0], [0], [1], [0, 0, 1, 1], [], []>} : vector<432x4xbf16>, vector<4x128xbf16>, vector<432x128xf32> -> vector<432x128xf32>
    %cst_5 = arith.constant 0.000000e+00 : f32
    %5 = vector.broadcast %cst_5 : f32 to vector<432x128xf32>
    %6 = arith.cmpf ogt, %4, %5 : vector<432x128xf32>
    %cst_6 = arith.constant 2.000000e-01 : f32
    %7 = vector.broadcast %cst_6 : f32 to vector<432x128xf32>
    %8 = arith.mulf %7, %4 : vector<432x128xf32>
    %9 = arith.select %6, %4, %8 : vector<432x128xi1>, vector<432x128xf32>
    %10 = vector.shape_cast %9 : vector<432x128xf32> to vector<18x24x128xf32>
    %c0_7 = arith.constant 0 : index
    %c0_8 = arith.constant 0 : index
    %11 = vector.load %arg4[%c0_7, %c0_8] : memref<9x128xf32, #tpu.memory_space<vmem>>, vector<9x128xf32>
    %cst_9 = arith.constant 0.000000e+00 : f32
    %12 = vector.broadcast %cst_9 : f32 to vector<16x24x128xf32>
    %13 = vector.extract_strided_slice %10 {offsets = [0, 0, 0], sizes = [16, 24, 128], strides = [1, 1, 1]} : vector<18x24x128xf32> to vector<16x24x128xf32>
    %14 = vector.extract_strided_slice %11 {offsets = [0, 0], sizes = [1, 128], strides = [1, 1]} : vector<9x128xf32> to vector<1x128xf32>
    %15 = vector.shape_cast %14 : vector<1x128xf32> to vector<128xf32>
    %16 = vector.shape_cast %15 : vector<128xf32> to vector<1x1x128xf32>
    %17 = vector.broadcast %16 : vector<1x1x128xf32> to vector<16x24x128xf32>
    %18 = arith.mulf %13, %17 : vector<16x24x128xf32>
    %19 = arith.addf %12, %18 : vector<16x24x128xf32>
    %c23_i32 = arith.constant 23 : i32
    %20 = tpu.dynamic_rotate %13 by %c23_i32 dim 1 : vector<16x24x128xf32>, i32 -> vector<16x24x128xf32>
    %21 = vector.extract_strided_slice %11 {offsets = [1, 0], sizes = [1, 128], strides = [1, 1]} : vector<9x128xf32> to vector<1x128xf32>
    %22 = vector.shape_cast %21 : vector<1x128xf32> to vector<128xf32>
    %23 = vector.shape_cast %22 : vector<128xf32> to vector<1x1x128xf32>
    %24 = vector.broadcast %23 : vector<1x1x128xf32> to vector<16x24x128xf32>
    %25 = arith.mulf %20, %24 : vector<16x24x128xf32>
    %26 = arith.addf %19, %25 : vector<16x24x128xf32>
    %c22_i32 = arith.constant 22 : i32
    %27 = tpu.dynamic_rotate %13 by %c22_i32 dim 1 : vector<16x24x128xf32>, i32 -> vector<16x24x128xf32>
    %28 = vector.extract_strided_slice %11 {offsets = [2, 0], sizes = [1, 128], strides = [1, 1]} : vector<9x128xf32> to vector<1x128xf32>
    %29 = vector.shape_cast %28 : vector<1x128xf32> to vector<128xf32>
    %30 = vector.shape_cast %29 : vector<128xf32> to vector<1x1x128xf32>
    %31 = vector.broadcast %30 : vector<1x1x128xf32> to vector<16x24x128xf32>
    %32 = arith.mulf %27, %31 : vector<16x24x128xf32>
    %33 = arith.addf %26, %32 : vector<16x24x128xf32>
    %34 = vector.extract_strided_slice %10 {offsets = [1, 0, 0], sizes = [16, 24, 128], strides = [1, 1, 1]} : vector<18x24x128xf32> to vector<16x24x128xf32>
    %35 = vector.extract_strided_slice %11 {offsets = [3, 0], sizes = [1, 128], strides = [1, 1]} : vector<9x128xf32> to vector<1x128xf32>
    %36 = vector.shape_cast %35 : vector<1x128xf32> to vector<128xf32>
    %37 = vector.shape_cast %36 : vector<128xf32> to vector<1x1x128xf32>
    %38 = vector.broadcast %37 : vector<1x1x128xf32> to vector<16x24x128xf32>
    %39 = arith.mulf %34, %38 : vector<16x24x128xf32>
    %40 = arith.addf %33, %39 : vector<16x24x128xf32>
    %c23_i32_10 = arith.constant 23 : i32
    %41 = tpu.dynamic_rotate %34 by %c23_i32_10 dim 1 : vector<16x24x128xf32>, i32 -> vector<16x24x128xf32>
    %42 = vector.extract_strided_slice %11 {offsets = [4, 0], sizes = [1, 128], strides = [1, 1]} : vector<9x128xf32> to vector<1x128xf32>
    %43 = vector.shape_cast %42 : vector<1x128xf32> to vector<128xf32>
    %44 = vector.shape_cast %43 : vector<128xf32> to vector<1x1x128xf32>
    %45 = vector.broadcast %44 : vector<1x1x128xf32> to vector<16x24x128xf32>
    %46 = arith.mulf %41, %45 : vector<16x24x128xf32>
    %47 = arith.addf %40, %46 : vector<16x24x128xf32>
    %c22_i32_11 = arith.constant 22 : i32
    %48 = tpu.dynamic_rotate %34 by %c22_i32_11 dim 1 : vector<16x24x128xf32>, i32 -> vector<16x24x128xf32>
    %49 = vector.extract_strided_slice %11 {offsets = [5, 0], sizes = [1, 128], strides = [1, 1]} : vector<9x128xf32> to vector<1x128xf32>
    %50 = vector.shape_cast %49 : vector<1x128xf32> to vector<128xf32>
    %51 = vector.shape_cast %50 : vector<128xf32> to vector<1x1x128xf32>
    %52 = vector.broadcast %51 : vector<1x1x128xf32> to vector<16x24x128xf32>
    %53 = arith.mulf %48, %52 : vector<16x24x128xf32>
    %54 = arith.addf %47, %53 : vector<16x24x128xf32>
    %55 = vector.extract_strided_slice %10 {offsets = [2, 0, 0], sizes = [16, 24, 128], strides = [1, 1, 1]} : vector<18x24x128xf32> to vector<16x24x128xf32>
    %56 = vector.extract_strided_slice %11 {offsets = [6, 0], sizes = [1, 128], strides = [1, 1]} : vector<9x128xf32> to vector<1x128xf32>
    %57 = vector.shape_cast %56 : vector<1x128xf32> to vector<128xf32>
    %58 = vector.shape_cast %57 : vector<128xf32> to vector<1x1x128xf32>
    %59 = vector.broadcast %58 : vector<1x1x128xf32> to vector<16x24x128xf32>
    %60 = arith.mulf %55, %59 : vector<16x24x128xf32>
    %61 = arith.addf %54, %60 : vector<16x24x128xf32>
    %c23_i32_12 = arith.constant 23 : i32
    %62 = tpu.dynamic_rotate %55 by %c23_i32_12 dim 1 : vector<16x24x128xf32>, i32 -> vector<16x24x128xf32>
    %63 = vector.extract_strided_slice %11 {offsets = [7, 0], sizes = [1, 128], strides = [1, 1]} : vector<9x128xf32> to vector<1x128xf32>
    %64 = vector.shape_cast %63 : vector<1x128xf32> to vector<128xf32>
    %65 = vector.shape_cast %64 : vector<128xf32> to vector<1x1x128xf32>
    %66 = vector.broadcast %65 : vector<1x1x128xf32> to vector<16x24x128xf32>
    %67 = arith.mulf %62, %66 : vector<16x24x128xf32>
    %68 = arith.addf %61, %67 : vector<16x24x128xf32>
    %c22_i32_13 = arith.constant 22 : i32
    %69 = tpu.dynamic_rotate %55 by %c22_i32_13 dim 1 : vector<16x24x128xf32>, i32 -> vector<16x24x128xf32>
    %70 = vector.extract_strided_slice %11 {offsets = [8, 0], sizes = [1, 128], strides = [1, 1]} : vector<9x128xf32> to vector<1x128xf32>
    %71 = vector.shape_cast %70 : vector<1x128xf32> to vector<128xf32>
    %72 = vector.shape_cast %71 : vector<128xf32> to vector<1x1x128xf32>
    %73 = vector.broadcast %72 : vector<1x1x128xf32> to vector<16x24x128xf32>
    %74 = arith.mulf %69, %73 : vector<16x24x128xf32>
    %75 = arith.addf %68, %74 : vector<16x24x128xf32>
    %cst_14 = arith.constant 0.000000e+00 : f32
    %76 = vector.broadcast %cst_14 : f32 to vector<16x24x128xf32>
    %77 = arith.cmpf ogt, %75, %76 : vector<16x24x128xf32>
    %cst_15 = arith.constant 2.000000e-01 : f32
    %78 = vector.broadcast %cst_15 : f32 to vector<16x24x128xf32>
    %79 = arith.mulf %78, %75 : vector<16x24x128xf32>
    %80 = arith.select %77, %75, %79 : vector<16x24x128xi1>, vector<16x24x128xf32>
    %81 = vector.shape_cast %80 : vector<16x24x128xf32> to vector<384x128xf32>
    %82 = arith.truncf %81 : vector<384x128xf32> to vector<384x128xbf16>
    %c0_16 = arith.constant 0 : index
    %c0_17 = arith.constant 0 : index
    %83 = vector.load %arg5[%c0_16, %c0_17] : memref<128x128xbf16, #tpu.memory_space<vmem>>, vector<128x128xbf16>
    %cst_18 = arith.constant dense<0.000000e+00> : vector<384x128xf32>
    %84 = tpu.matmul %82, %83, %cst_18 {dimension_numbers = #tpu.dot_dimension_numbers<[1], [0], [0], [1], [0, 0, 1, 1], [], []>} : vector<384x128xbf16>, vector<128x128xbf16>, vector<384x128xf32> -> vector<384x128xf32>
    %85 = vector.shape_cast %84 : vector<384x128xf32> to vector<16x24x128xf32>
    %86 = arith.truncf %85 : vector<16x24x128xf32> to vector<16x24x128xbf16>
    %c0_19 = arith.constant 0 : index
    %c0_20 = arith.constant 0 : index
    %c0_21 = arith.constant 0 : index
    %c0_22 = arith.constant 0 : index
    %87 = vector.load %arg6[%c0_19, %c0_20, %c0_21, %c0_22] : memref<1x16x24x128xbf16, #tpu.memory_space<vmem>>, vector<1x16x24x128xbf16>
    %88 = vector.shape_cast %87 : vector<1x16x24x128xbf16> to vector<16x24x128xbf16>
    %89 = vector.shape_cast %86 : vector<16x24x128xbf16> to vector<1x16x24x128xbf16>
    tpu.vector_store %arg6[%c0_19, %c0_20, %c0_21, %c0_22], %89 {strides = array<i32>} : memref<1x16x24x128xbf16, #tpu.memory_space<vmem>>, vector<1x16x24x128xbf16>,
    return
  }
  func.func @transform_0(%arg0: i32, %arg1: i32) -> (i32, i32, i32, i32) {
    %c1_i32 = arith.constant 1 : i32
    %0 = arith.muli %arg0, %c1_i32 : i32
    %1 = arith.addi %0, %arg1 : i32
    %c0_i32 = arith.constant 0 : i32
    %c0_i32_0 = arith.constant 0 : i32
    %c0_i32_1 = arith.constant 0 : i32
    %c0_i32_2 = arith.constant 0 : i32
    return %1, %c0_i32, %c0_i32_0, %c0_i32_1 : i32, i32, i32, i32
  }
  func.func @transform_1(%arg0: i32, %arg1: i32) -> (i32, i32) {
    %c0_i32 = arith.constant 0 : i32
    %c0_i32_0 = arith.constant 0 : i32
    %c0_i32_1 = arith.constant 0 : i32
    return %c0_i32, %c0_i32_0 : i32, i32
  }
  func.func @transform_2(%arg0: i32, %arg1: i32) -> (i32, i32) {
    %c0_i32 = arith.constant 0 : i32
    %c0_i32_0 = arith.constant 0 : i32
    %c0_i32_1 = arith.constant 0 : i32
    return %c0_i32, %c0_i32_0 : i32, i32
  }
  func.func @transform_3(%arg0: i32, %arg1: i32) -> (i32, i32) {
    %c0_i32 = arith.constant 0 : i32
    %c0_i32_0 = arith.constant 0 : i32
    %c0_i32_1 = arith.constant 0 : i32
    return %c0_i32, %c0_i32_0 : i32, i32
  }
  func.func @transform_4(%arg0: i32, %arg1: i32) -> (i32, i32, i32, i32) {
    %c0_i32 = arith.constant 0 : i32
    %c0_i32_0 = arith.constant 0 : i32
    %c0_i32_1 = arith.constant 0 : i32
    return %arg0, %arg1, %c0_i32, %c0_i32_0 : i32, i32, i32, i32
  }
}

</mosaic_0001>

<bundles_post_ra>
// kernel: feedforward_nchw.1
= control target key start
LH: loop header
LB: loop body
LE: loop exit
PB: predicated region body
PF: predicated region fallthrough
CT: control target
= control target key end

     0   :  { %s3503_s15 = smov 0   ;;  %s3505_s16 = smov 0   ;;  %s5799_s0 = inlined_call_operand.vmem [shape: bf16[2,18,24,4], index: 0, kind: input, shape index: {}]   ;;  %s5800_s1 = inlined_call_operand.vmem [shape: bf16[4,128], index: 1, kind: input, shape index: {}]   ;;  %s5801_s2 = inlined_call_operand.vmem [shape: f32[9,128], index: 2, kind: input, shape index: {}]   ;;  %s5802_s3 = inlined_call_operand.vmem [shape: bf16[128,128], index: 3, kind: input, shape index: {}]   ;;  %s5803_s4 = inlined_call_operand.vmem [shape: bf16[2,16,24,128], index: 4, kind: output, shape index: {}]  }
   0x1   :  { %s3507_s17 = smov 0  }
   0x2 LB: > { %s26_s18 = sadd.s32 1, %s3470_s16  ;;  %p2844_p0 = scmp.ge.s32.totalorder %s3474_s17, 1  ;;  %s3474_s17 = sphi %s3507_s17, %s14_s17   ;;  %s3470_s16 = sphi %s3505_s16, %s6043_s16   ;;  %s3466_s15 = sphi %s3503_s15, %s6042_s15  }
   0x3   : > { %p28_p1 = scmp.ge.s32.totalorder %s26_s18, 2  ;;  %p180_p2 = scmp.lt.s32.totalorder %s3474_s17, 3 }
   0x5   : > { %s6045_s18 = smov (%p28_p1, %s26_s18), 0  ;;  %p181_p3 = pnand %p2844_p0, %p180_p2 }
   0x7   : > { %184 = sbr.rel (%p181_p3) target bundleno = 816 (0x330), region = 36 }
   0xe   : > { %v285_v0 = vld [vmem:[%s5800_s1] sm:$0x3]  ;;  %vm503_vm0 = vcmask 1041408   ;;  %p213_p4 = scmp.lt.s32.totalorder %s3466_s15, 1  ;;  %v3476_v1 = vmov 0.0   ;;  %vm3477_vm1 = vmmov 0   ;;  %v920_v38 = vlaneseq }
   0xf   : > { %3211 = vmatprep.subr.bf16.mxu0 %v3476_v1  ;;  %v505_v2 = vsel %vm503_vm0, %v285_v0, 0  ;;  %3213 = vmatprep.mubr.msk.bf16.mxu0 %vm3477_vm1, %v3476_v1  ;;  %vm421_vm2 = vcmask 31744   ;;  %v3442_v25 = vld [vmem:[%s5802_s3] sm:$0xff]   ;;  %v3443_v27 = vld [vmem:[%s5802_s3 + $0x8] sm:$0xff]   ;;  %v3444_v29 = vld [vmem:[%s5802_s3 + $0x10] sm:$0xff]  }
  0x10   : > { %3212 = vmatpush3.bf16.msra.mxu0 %v505_v2  ;;  %s6047_s15 = smov (!%p213_p4, %s3466_s15), 1  ;;  %3385 = vmatprep.subr.bf16.mxu1 %v3476_v1  ;;  %v3445_v31 = vld [vmem:[%s5802_s3 + $0x18] sm:$0xff]   ;;  %v3446_v33 = vld [vmem:[%s5802_s3 + $0x20] sm:$0xff]   ;;  %v3447_v34 = vld [vmem:[%s5802_s3 + $0x28] sm:$0xff]   ;;  %v3666_v39 = vshrl.u32 %v920_v38, 7 }
  0x11   : > { %3386 = vmatpush3.bf16.msra.mxu1 %v505_v2  ;;  %3293 = vmatprep.mubr.msk.bf16.mxu1 %vm3477_vm1, %v3476_v1  ;;  %s3387_s21 = smul.u32 216, %s6047_s15  ;;  %v3448_v36 = vld [vmem:[%s5802_s3 + $0x30] sm:$0xff]   ;;  %v3449_v37 = vld [vmem:[%s5802_s3 + $0x38] sm:$0xff]   ;;  %v3671_v41 = vld [vmem:[%s5801_s2] sm:$0xff] }
  0x12   : > { %3321 = vmatprep.subr.bf16.mxu1 %v3442_v25  ;;  %v922_v42 = vsub.s32 0, %v3666_v39  ;;  %v1121_v45 = vsub.s32 1, %v3666_v39  ;;  %v1318_v46 = vsub.s32 2, %v3666_v39  ;;  %vm1070_vm5 = vcmp.lt.s32.totalorder %v3666_v39, 7  ;;  %s3388_s27 = smul.u32 192, %s6047_s15 }
  0x13   : > { %s3536_s24 = scalar_lea.vmem %s5799_s0, %s3387_s21  ;;  %vm1267_vm6 = vcmp.lt.s32.totalorder %v3666_v39, 6  ;;  %v1418_v62 = vsub.s32 3, %v3666_v39 }
  0x14   : > { %v3415_v3 = vld [vmem:[%s3536_s24] sm:$0xff]   ;;  %v3416_v4 = vld [vmem:[%s3536_s24 + $0x8] sm:$0xff]   ;;  %v3417_v6 = vld [vmem:[%s3536_s24 + $0x10] sm:$0xff]   ;;  %v3677_v51 = vrot.slane %v3671_v41, %v922_v42  ;;  %v3681_v53 = vrot.slane %v3671_v41, %v1121_v45  ;;  %v3685_v54 = vrot.slane %v3671_v41, %v1318_v46  ;;  %s5751_s29 = scalar_lea.vmem %s5803_s4, %s3388_s27 }
  0x15   : > { %3214 = vmatmul.mubr.msk.bf16.vlgmr.msra.gmra.mrb[0].mxu0 %vm421_vm2, %v3415_v3  ;;  %v3428_v5 = vld [vmem:[%s3536_s24 + $0xa0] sm:$0xff]   ;;  %v3430_v7 = vld [vmem:[%s3536_s24 + $0xa8] sm:$0xff]   ;;  %v3418_v8 = vld [vmem:[%s3536_s24 + $0x18] sm:$0xff]  }
  0x16   : > { %3217 = vmatprep.mubr.msk.bf16.mxu0 %vm3477_vm1, %v3476_v1  ;;  %3294 = vmatmul.mubr.msk.bf16.vlgmr.msra.gmra.mrb[0].mxu1 %vm421_vm2, %v3428_v5  ;;  %v3432_v9 = vld [vmem:[%s3536_s24 + $0xb0] sm:$0xff]   ;;  %v3419_v10 = vld [vmem:[%s3536_s24 + $0x20] sm:$0xff]   ;;  %v3434_v11 = vld [vmem:[%s3536_s24 + $0xb8] sm:$0xff]  }
  0x17   : > { %3297 = vmatprep.mubr.msk.bf16.mxu1 %vm3477_vm1, %v3476_v1  ;;  %v3420_v12 = vld [vmem:[%s3536_s24 + $0x28] sm:$0xff]   ;;  %v3436_v13 = vld [vmem:[%s3536_s24 + $0xc0] sm:$0xff]   ;;  %v3421_v14 = vld [vmem:[%s3536_s24 + $0x30] sm:$0xff]   ;;  %3322 = vmatpush3.bf16.msra.mxu1 %v3442_v25 }
  0x18   : > { %v3438_v15 = vld [vmem:[%s3536_s24 + $0xc8] sm:$0xff]   ;;  %v3422_v16 = vld [vmem:[%s3536_s24 + $0x38] sm:$0xff]   ;;  %v3440_v17 = vld [vmem:[%s3536_s24 + $0xd0] sm:$0xff]   ;;  %3323 = vmatprep.subr.bf16.mxu1 %v3443_v27 }
  0x19   : > { %v3423_v18 = vld [vmem:[%s3536_s24 + $0x40] sm:$0xff]   ;;  %v3424_v19 = vld [vmem:[%s3536_s24 + $0x48] sm:$0xff]   ;;  %v3425_v20 = vld [vmem:[%s3536_s24 + $0x50] sm:$0xff]  }
  0x1a   : > { %v3426_v21 = vld [vmem:[%s3536_s24 + $0x58] sm:$0xff]   ;;  %v3427_v22 = vld [vmem:[%s3536_s24 + $0x60] sm:$0xff]   ;;  %v3429_v23 = vld [vmem:[%s3536_s24 + $0x68] sm:$0xff]  }
  0x1b   : > { %v3431_v24 = vld [vmem:[%s3536_s24 + $0x70] sm:$0xff]   ;;  %v3433_v26 = vld [vmem:[%s3536_s24 + $0x78] sm:$0xff]   ;;  %3324 = vmatpush3.bf16.msra.mxu1 %v3443_v27  ;;  %v3435_v28 = vld [vmem:[%s3536_s24 + $0x80] sm:$0xff]  }
  0x1c   : > { %3325 = vmatprep.subr.bf16.mxu1 %v3444_v29  ;;  %v3437_v30 = vld [vmem:[%s3536_s24 + $0x88] sm:$0xff]   ;;  %v3439_v32 = vld [vmem:[%s3536_s24 + $0x90] sm:$0xff]   ;;  %v3441_v35 = vld [vmem:[%s3536_s24 + $0x98] sm:$0xff]  }
  0x1d   : > { %3218 = vmatmul.mubr.msk.bf16.gmra.mrb[4].mxu0 %vm421_vm2, %v3416_v4 }
  0x1e   : > { %3221 = vmatprep.mubr.msk.bf16.mxu0 %vm3477_vm1, %v3476_v1  ;;  %3298 = vmatmul.mubr.msk.bf16.gmra.mrb[4].mxu1 %vm421_vm2, %v3430_v7 }
  0x1f   : > { %3301 = vmatprep.mubr.msk.bf16.mxu1 %vm3477_vm1, %v3476_v1  ;;  %3326 = vmatpush3.bf16.msra.mxu1 %v3444_v29 }
  0x20   : > { %3327 = vmatprep.subr.bf16.mxu1 %v3445_v31 }
  0x23   : > { %3328 = vmatpush3.bf16.msra.mxu1 %v3445_v31 }
  0x24   : > { %3329 = vmatprep.subr.bf16.mxu1 %v3446_v33 }
  0x25   : > { %3222 = vmatmul.mubr.msk.bf16.gmra.mrb[8].mxu0 %vm421_vm2, %v3417_v6 }
  0x26   : > { %3225 = vmatprep.mubr.msk.bf16.mxu0 %vm3477_vm1, %v3476_v1  ;;  %3302 = vmatmul.mubr.msk.bf16.gmra.mrb[8].mxu1 %vm421_vm2, %v3432_v9 }
  0x27   : > { %3305 = vmatprep.mubr.msk.bf16.mxu1 %vm3477_vm1, %v3476_v1  ;;  %3330 = vmatpush3.bf16.msra.mxu1 %v3446_v33 }
  0x28   : > { %3331 = vmatprep.subr.bf16.mxu1 %v3447_v34 }
  0x2b   : > { %3332 = vmatpush3.bf16.msra.mxu1 %v3447_v34 }
  0x2c   : > { %3333 = vmatprep.subr.bf16.mxu1 %v3448_v36 }
  0x2d   : > { %3226 = vmatmul.mubr.msk.bf16.gmra.mrb[12].mxu0 %vm421_vm2, %v3418_v8 }
  0x2e   : > { %3229 = vmatprep.mubr.msk.bf16.mxu0 %vm3477_vm1, %v3476_v1  ;;  %3306 = vmatmul.mubr.msk.bf16.gmra.mrb[12].mxu1 %vm421_vm2, %v3434_v11  ;;  %v3696_v11 = vrot.slane %v3671_v41, %v1418_v62 }
  0x2f   : > { %3309 = vmatprep.mubr.msk.bf16.mxu1 %vm3477_vm1, %v3476_v1  ;;  %3334 = vmatpush3.bf16.msra.mxu1 %v3448_v36  ;;  %v1730_v36 = vsub.s32 6, %v3666_v39 }
  0x30   : > { %3335 = vmatprep.subr.bf16.mxu1 %v3449_v37 }
  0x33   : > { %3336 = vmatpush3.bf16.msra.mxu1 %v3449_v37  ;;  %v1836_v37 = vsub.s32 7, %v3666_v39 }
  0x35   : > { %3230 = vmatmul.mubr.msk.bf16.gmra.mrb[16].mxu0 %vm421_vm2, %v3419_v10 }
  0x36   : > { %3233 = vmatprep.mubr.msk.bf16.mxu0 %vm3477_vm1, %v3476_v1  ;;  %3310 = vmatmul.mubr.msk.bf16.gmra.mrb[16].mxu1 %vm421_vm2, %v3436_v13 }
  0x37   : > { %3313 = vmatprep.mubr.msk.bf16.mxu1 %vm3477_vm1, %v3476_v1 }
  0x3d   : > { %3234 = vmatmul.mubr.msk.bf16.gmra.mrb[20].mxu0 %vm421_vm2, %v3420_v12  ;;  %v1524_v12 = vsub.s32 4, %v3666_v39 }
  0x3e   : > { %3237 = vmatprep.mubr.msk.bf16.mxu0 %vm3477_vm1, %v3476_v1  ;;  %3314 = vmatmul.mubr.msk.bf16.gmra.mrb[20].mxu1 %vm421_vm2, %v3438_v15  ;;  %v1630_v15 = vsub.s32 5, %v3666_v39 }
  0x3f   : > { %3317 = vmatprep.mubr.msk.bf16.mxu1 %vm3477_vm1, %v3476_v1 }
  0x40   : > { %v3722_v34 = vrot.slane %v3671_v41, %v1630_v15 }
  0x45   : > { %3238 = vmatmul.mubr.msk.bf16.gmra.mrb[24].mxu0 %vm421_vm2, %v3421_v14 }
  0x46   : > { %3241 = vmatprep.mubr.msk.bf16.mxu0 %vm3477_vm1, %v3476_v1  ;;  %3318 = vmatmul.mubr.msk.bf16.gmra.mrb[24].mxu1 %vm421_vm2, %v3440_v17 }
  0x4d   : > { %3242 = vmatmul.mubr.msk.bf16.gmra.mrb[28].mxu0 %vm421_vm2, %v3422_v16 }
  0x4e   : > { %3245 = vmatprep.mubr.msk.bf16.mxu0 %vm3477_vm1, %v3476_v1 }
  0x55   : > { %3246 = vmatmul.mubr.msk.bf16.gmra.mrb[32].mxu0 %vm421_vm2, %v3423_v18 }
  0x56   : > { %3249 = vmatprep.mubr.msk.bf16.mxu0 %vm3477_vm1, %v3476_v1 }
  0x5d   : > { %3250 = vmatmul.mubr.msk.bf16.gmra.mrb[36].mxu0 %vm421_vm2, %v3424_v19 }
  0x5e   : > { %3253 = vmatprep.mubr.msk.bf16.mxu0 %vm3477_vm1, %v3476_v1 }
  0x65   : > { %3254 = vmatmul.mubr.msk.bf16.gmra.mrb[40].mxu0 %vm421_vm2, %v3425_v20 }
  0x66   : > { %3257 = vmatprep.mubr.msk.bf16.mxu0 %vm3477_vm1, %v3476_v1 }
  0x6d   : > { %3258 = vmatmul.mubr.msk.bf16.gmra.mrb[44].mxu0 %vm421_vm2, %v3426_v21 }
  0x6e   : > { %3261 = vmatprep.mubr.msk.bf16.mxu0 %vm3477_vm1, %v3476_v1 }
  0x75   : > { %3262 = vmatmul.mubr.msk.bf16.gmra.mrb[48].mxu0 %vm421_vm2, %v3427_v22 }
  0x76   : > { %3265 = vmatprep.mubr.msk.bf16.mxu0 %vm3477_vm1, %v3476_v1 }
  0x7d   : > { %3266 = vmatmul.mubr.msk.bf16.gmra.mrb[52].mxu0 %vm421_vm2, %v3429_v23 }
  0x7e   : > { %3269 = vmatprep.mubr.msk.bf16.mxu0 %vm3477_vm1, %v3476_v1 }
  0x85   : > { %3270 = vmatmul.mubr.msk.bf16.gmra.mrb[56].mxu0 %vm421_vm2, %v3431_v24 }
  0x86   : > { %3273 = vmatprep.mubr.msk.bf16.mxu0 %vm3477_vm1, %v3476_v1 }
  0x8d   : > { %3274 = vmatmul.mubr.msk.bf16.gmra.mrb[60].mxu0 %vm421_vm2, %v3433_v26 }
  0x8e   : > { %3277 = vmatprep.mubr.msk.bf16.mxu0 %vm3477_vm1, %v3476_v1 }
  0x95   : > { %3278 = vmatmul.mubr.msk.bf16.gmra.mrb[64].mxu0 %vm421_vm2, %v3435_v28  ;;  %v3719_v28 = vrot.slane %v3671_v41, %v1524_v12 }
  0x96   : > { %3281 = vmatprep.mubr.msk.bf16.mxu0 %vm3477_vm1, %v3476_v1 }
  0x9d   : > { %3282 = vmatmul.mubr.msk.bf16.gmra.mrb[68].mxu0 %vm421_vm2, %v3437_v30 }
  0x9e   : > { %3285 = vmatprep.mubr.msk.bf16.mxu0 %vm3477_vm1, %v3476_v1 }
  0xa5   : > { %3286 = vmatmul.mubr.msk.bf16.gmra.mrb[72].mxu0 %vm421_vm2, %v3439_v32 }
  0xa6   : > { %3289 = vmatprep.mubr.msk.bf16.mxu0 %vm3477_vm1, %v3476_v1 }
  0xad   : > { %3290 = vmatmul.mubr.msk.bf16.gmra.mrb[76].mxu0 %vm421_vm2, %v3441_v35 }
  0xe8   : > { %v541_v40 = vpop.f32.mrb[0].mxu0 }
  0xe9   : > { %vm756_vm3 = vcmp.gt.f32.partialorder %v541_v40, 0.0  ;;  %v810_v43 = vmul.f32 0.2, %v541_v40  ;;  %v3215_v44 = vpop.f32.mrb[1].mxu0 }
  0xea   : > { %v544_v47 = vpop.f32.mrb[2].mxu0 }
  0xeb   : > { %v864_v48 = vsel %vm756_vm3, %v541_v40, %v810_v43  ;;  %vm757_vm4 = vcmp.gt.f32.partialorder %v544_v47, 0.0  ;;  %v811_v49 = vmul.f32 0.2, %v544_v47  ;;  %v3216_v50 = vpop.f32.mrb[3].mxu0 }
  0xec   : > { %v1020_v55 = vrot.slane %v864_v48, 1  ;;  %v1219_v56 = vrot.slane %v864_v48, 2  ;;  %v924_v63 = vmul.f32 %v3677_v51, %v864_v48 }
  0xed   : > { %v865_v52 = vsel %vm757_vm4, %v544_v47, %v811_v49 }
  0xee   : > { %v1036_v57 = vrot.slane %v865_v52, 1  ;;  %v1235_v58 = vrot.slane %v865_v52, 2  ;;  %v925_v20 = vmul.f32 %v3677_v51, %v865_v52 }
  0xf0   : > { %v1087_v59 = vsel %vm1070_vm5, %v1020_v55, %v1036_v57  ;;  %v1284_v60 = vsel %vm1267_vm6, %v1219_v56, %v1235_v58  ;;  %v549_v61 = vpop.f32.mrb[4].mxu0 }
  0xf1   : > { %v1123_v0 = vmul.f32 %v3681_v53, %v1087_v59  ;;  %vm758_vm7 = vcmp.gt.f32.partialorder %v549_v61, 0.0  ;;  %v812_v1 = vmul.f32 0.2, %v549_v61  ;;  %v3219_v2 = vpop.f32.mrb[5].mxu0  ;;  %v1320_v3 = vmul.f32 %v3685_v54, %v1284_v60 }
  0xf2   : > { %v552_v4 = vpop.f32.mrb[6].mxu0  ;;  %v3741_v60 = vrot.slane %v3671_v41, %v1836_v37 }
  0xf3   : > { %v1171_v5 = vadd.f32 %v1123_v0, %v924_v63  ;;  %v866_v6 = vsel %vm758_vm7, %v549_v61, %v812_v1  ;;  %vm759_vm8 = vcmp.gt.f32.partialorder %v552_v4, 0.0  ;;  %v813_v7 = vmul.f32 0.2, %v552_v4  ;;  %v3220_v8 = vpop.f32.mrb[7].mxu0 }
  0xf4   : > { %v1052_v9 = vrot.slane %v866_v6, 1  ;;  %v1251_v10 = vrot.slane %v866_v6, 2  ;;  %v926_v21 = vmul.f32 %v3677_v51, %v866_v6 }
  0xf5   : > { %v3699_v13 = vsel %vm759_vm8, %v552_v4, %v813_v7  ;;  %v1368_v14 = vadd.f32 %v1320_v3, %v1171_v5 }
  0xf6   : > { %v1071_v16 = vsel %vm1070_vm5, %v1036_v57, %v1052_v9  ;;  %v1103_v17 = vsel %vm1070_vm5, %v1052_v9, %v1020_v55  ;;  %v1268_v18 = vsel %vm1267_vm6, %v1235_v58, %v1251_v10  ;;  %v1300_v19 = vsel %vm1267_vm6, %v1251_v10, %v1219_v56 }
  0xf7   : > { %v1124_v22 = vmul.f32 %v3681_v53, %v1071_v16  ;;  %v1125_v23 = vmul.f32 %v3681_v53, %v1103_v17  ;;  %v1321_v24 = vmul.f32 %v3685_v54, %v1268_v18  ;;  %v1322_v25 = vmul.f32 %v3685_v54, %v1300_v19 }
  0xf8   : > { %v1420_v26 = vmul.f32 %v3696_v11, %v3699_v13  ;;  %v557_v27 = vpop.f32.mrb[8].mxu0  ;;  %v1021_v40 = vrot.slane %v3699_v13, 1  ;;  %v1220_v45 = vrot.slane %v3699_v13, 2  ;;  %v3734_v56 = vrot.slane %v3671_v41, %v1730_v36 }
  0xf9   : > { %v1172_v29 = vadd.f32 %v1124_v22, %v925_v20  ;;  %v1173_v30 = vadd.f32 %v1125_v23, %v926_v21  ;;  %vm760_vm9 = vcmp.gt.f32.partialorder %v557_v27, 0.0  ;;  %v814_v31 = vmul.f32 0.2, %v557_v27  ;;  %v3223_v32 = vpop.f32.mrb[9].mxu0 }
  0xfa   : > { %v1468_v33 = vadd.f32 %v1420_v26, %v1368_v14  ;;  %v560_v35 = vpop.f32.mrb[10].mxu0  ;;  %v927_v57 = vmul.f32 %v3677_v51, %v3699_v13 }
  0xfb   : > { %v1370_v38 = vadd.f32 %v1322_v25, %v1173_v30  ;;  %v868_v42 = vsel %vm760_vm9, %v557_v27, %v814_v31  ;;  %v1369_v43 = vadd.f32 %v1321_v24, %v1172_v29  ;;  %v3224_v44 = vpop.f32.mrb[11].mxu0  ;;  %vm761_vm10 = vcmp.gt.f32.partialorder %v560_v35, 0.0 }
  0xfc   : > { %v1037_v46 = vrot.slane %v868_v42, 1  ;;  %v1236_v47 = vrot.slane %v868_v42, 2  ;;  %v1421_v48 = vmul.f32 %v3696_v11, %v868_v42  ;;  %v815_v49 = vmul.f32 0.2, %v560_v35 }
  0xfd   : > { %v928_v61 = vmul.f32 %v3677_v51, %v868_v42 }
  0xfe   : > { %v1088_v50 = vsel %vm1070_vm5, %v1021_v40, %v1037_v46  ;;  %v1285_v52 = vsel %vm1267_vm6, %v1220_v45, %v1236_v47  ;;  %v1469_v55 = vadd.f32 %v1421_v48, %v1369_v43  ;;  %v869_v0 = vsel %vm761_vm10, %v560_v35, %v815_v49 }
  0xff   : > { %v1126_v58 = vmul.f32 %v3681_v53, %v1088_v50  ;;  %v1526_v59 = vmul.f32 %v3719_v28, %v1088_v50  ;;  %v1323_v62 = vmul.f32 %v3685_v54, %v1285_v52  ;;  %v1632_v63 = vmul.f32 %v3722_v34, %v1285_v52 }
 0x100   : > { %v565_v1 = vpop.f32.mrb[12].mxu0  ;;  %v929_v4 = vmul.f32 %v3677_v51, %v869_v0  ;;  %v1053_v5 = vrot.slane %v869_v0, 1  ;;  %v1252_v7 = vrot.slane %v869_v0, 2  ;;  %v1422_v8 = vmul.f32 %v3696_v11, %v869_v0 }
 0x101   : > { %v1174_v2 = vadd.f32 %v1126_v58, %v927_v57  ;;  %v1574_v3 = vadd.f32 %v1526_v59, %v1468_v33  ;;  %v3227_v6 = vpop.f32.mrb[13].mxu0  ;;  %vm762_vm11 = vcmp.gt.f32.partialorder %v565_v1, 0.0  ;;  %v816_v41 = vmul.f32 0.2, %v565_v1 }
 0x102   : > { %v568_v9 = vpop.f32.mrb[14].mxu0  ;;  %v1072_v10 = vsel %vm1070_vm5, %v1037_v46, %v1053_v5  ;;  %v1104_v12 = vsel %vm1070_vm5, %v1053_v5, %v1021_v40  ;;  %v1269_v18 = vsel %vm1267_vm6, %v1236_v47, %v1252_v7  ;;  %v1301_v19 = vsel %vm1267_vm6, %v1252_v7, %v1220_v45 }
 0x103   : > { %v1371_v13 = vadd.f32 %v1323_v62, %v1174_v2  ;;  %v1680_v14 = vadd.f32 %v1632_v63, %v1574_v3  ;;  %v3228_v15 = vpop.f32.mrb[15].mxu0  ;;  %v1127_v16 = vmul.f32 %v3681_v53, %v1072_v10  ;;  %v1128_v17 = vmul.f32 %v3681_v53, %v1104_v12 }
 0x104   : > { %v1324_v20 = vmul.f32 %v3685_v54, %v1269_v18  ;;  %v1325_v21 = vmul.f32 %v3685_v54, %v1301_v19  ;;  %v1470_v22 = vadd.f32 %v1422_v8, %v1370_v38  ;;  %v1527_v23 = vmul.f32 %v3719_v28, %v1072_v10 }
 0x105   : > { %v1175_v24 = vadd.f32 %v1127_v16, %v928_v61  ;;  %v1176_v25 = vadd.f32 %v1128_v17, %v929_v4  ;;  %v1528_v26 = vmul.f32 %v3719_v28, %v1104_v12  ;;  %v1633_v27 = vmul.f32 %v3722_v34, %v1269_v18 }
 0x106   : > { %v1575_v29 = vadd.f32 %v1527_v23, %v1469_v55  ;;  %v1634_v30 = vmul.f32 %v3722_v34, %v1301_v19  ;;  %v870_v31 = vsel %vm762_vm11, %v565_v1, %v816_v41  ;;  %vm763_vm12 = vcmp.gt.f32.partialorder %v568_v9, 0.0 }
 0x107   : > { %v1373_v32 = vadd.f32 %v1325_v21, %v1176_v25  ;;  %v1576_v33 = vadd.f32 %v1528_v26, %v1470_v22  ;;  %v930_v35 = vmul.f32 %v3677_v51, %v870_v31  ;;  %v1022_v36 = vrot.slane %v870_v31, 1  ;;  %v3816_v25 = vld [vmem:[%s5801_s2 + $0x8] ss:$0 sm:$0xff] }
 0x108   : > { %v573_v37 = vpop.f32.mrb[16].mxu0  ;;  %v1221_v38 = vrot.slane %v870_v31, 2  ;;  %v1423_v40 = vmul.f32 %v3696_v11, %v870_v31  ;;  %v1732_v42 = vmul.f32 %v3734_v56, %v870_v31  ;;  %v817_v43 = vmul.f32 0.2, %v568_v9 }
 0x109   : > { %v3231_v44 = vpop.f32.mrb[17].mxu0  ;;  %v1682_v45 = vadd.f32 %v1634_v30, %v1576_v33  ;;  %v1372_v46 = vadd.f32 %v1324_v20, %v1175_v24  ;;  %v1681_v47 = vadd.f32 %v1633_v27, %v1575_v29  ;;  %vm764_vm13 = vcmp.gt.f32.partialorder %v573_v37, 0.0 }
 0x10a   : > { %v576_v48 = vpop.f32.mrb[18].mxu0  ;;  %v1471_v49 = vadd.f32 %v1423_v40, %v1371_v13  ;;  %v3768_v50 = vadd.f32 %v1732_v42, %v1680_v14  ;;  %v871_v52 = vsel %vm763_vm12, %v568_v9, %v817_v43  ;;  %v818_v55 = vmul.f32 0.2, %v573_v37 }
 0x10b   : > { %v3232_v57 = vpop.f32.mrb[19].mxu0  ;;  %v931_v58 = vmul.f32 %v3677_v51, %v871_v52  ;;  %v1038_v59 = vrot.slane %v871_v52, 1  ;;  %v1237_v61 = vrot.slane %v871_v52, 2  ;;  %v1424_v62 = vmul.f32 %v3696_v11, %v871_v52 }
 0x10c   : > { %v1733_v63 = vmul.f32 %v3734_v56, %v871_v52  ;;  %v872_v0 = vsel %vm764_vm13, %v573_v37, %v818_v55  ;;  %vm765_vm14 = vcmp.gt.f32.partialorder %v576_v48, 0.0  ;;  %v819_v1 = vmul.f32 0.2, %v576_v48 }
 0x10d   : > { %v3776_v2 = vsel %vm1070_vm5, %v1022_v36, %v1038_v59  ;;  %v3780_v3 = vsel %vm1267_vm6, %v1221_v38, %v1237_v61  ;;  %v1472_v4 = vadd.f32 %v1424_v62, %v1372_v46  ;;  %v932_v5 = vmul.f32 %v3677_v51, %v872_v0 }
 0x10e   : > { %v1129_v6 = vmul.f32 %v3681_v53, %v3776_v2  ;;  %v1529_v7 = vmul.f32 %v3719_v28, %v3776_v2  ;;  %v3787_v8 = vadd.f32 %v1733_v63, %v1681_v47  ;;  %v1054_v41 = vrot.slane %v872_v0, 1 }
 0x10f   : > { %v1253_v9 = vrot.slane %v872_v0, 2  ;;  %v1425_v10 = vmul.f32 %v3696_v11, %v872_v0  ;;  %v1734_v12 = vmul.f32 %v3734_v56, %v872_v0  ;;  %v3791_v13 = vsel %vm765_vm14, %v576_v48, %v819_v1 }
 0x110   : > { %v581_v14 = vpop.f32.mrb[20].mxu0  ;;  %v3795_v15 = vsel %vm1070_vm5, %v1038_v59, %v1054_v41  ;;  %v1105_v16 = vsel %vm1070_vm5, %v1054_v41, %v1022_v36  ;;  %v3801_v17 = vmul.f32 %v3677_v51, %v3791_v13  ;;  %v1023_v18 = vrot.slane %v3791_v13, 1 }
 0x111   : > { %v3235_v19 = vpop.f32.mrb[21].mxu0  ;;  %v1130_v20 = vmul.f32 %v3681_v53, %v3795_v15  ;;  %v1131_v21 = vmul.f32 %v3681_v53, %v1105_v16  ;;  %v3809_v22 = vsel %vm1267_vm6, %v1237_v61, %v1253_v9  ;;  %v1302_v23 = vsel %vm1267_vm6, %v1253_v9, %v1221_v38 }
 0x112   : > { %v584_v24 = vpop.f32.mrb[22].mxu0  ;;  %v1473_v26 = vadd.f32 %v1425_v10, %v1373_v32  ;;  %v1530_v27 = vmul.f32 %v3719_v28, %v3795_v15  ;;  %v1531_v29 = vmul.f32 %v3719_v28, %v1105_v16  ;;  %v1782_v30 = vadd.f32 %v1734_v12, %v1682_v45 }
 0x113   : > { %v3236_v31 = vpop.f32.mrb[23].mxu0  ;;  %v1179_v33 = vadd.f32 %v1131_v21, %v932_v5  ;;  %v1840_v36 = vmul.f32 %v3741_v60, %v1105_v16  ;;  %v1946_v37 = vmul.f32 %v3816_v25, %v1302_v23  ;;  %v1177_v38 = vadd.f32 %v1129_v6, %v930_v35 }
 0x114   : > { %v3823_v40 = vadd.f32 %v1531_v29, %v1473_v26  ;;  %v1222_v42 = vrot.slane %v3791_v13, 2  ;;  %v1326_v32 = vmul.f32 %v3685_v54, %v3780_v3  ;;  %v1426_v43 = vmul.f32 %v3696_v11, %v3791_v13 }
 0x115   : > { %v1888_v44 = vadd.f32 %v1840_v36, %v1782_v30  ;;  %v1577_v46 = vadd.f32 %v1529_v7, %v1471_v49  ;;  %v1635_v45 = vmul.f32 %v3722_v34, %v3780_v3  ;;  %v1735_v47 = vmul.f32 %v3734_v56, %v3791_v13 }
 0x116   : > { %v1374_v48 = vadd.f32 %v1326_v32, %v1177_v38  ;;  %vm766_vm15 = vcmp.gt.f32.partialorder %v581_v14, 0.0  ;;  %v820_v35 = vmul.f32 0.2, %v581_v14  ;;  %v1178_v52 = vadd.f32 %v1130_v20, %v931_v58 }
 0x117   : > { %v3834_v55 = vadd.f32 %v1946_v37, %v1888_v44  ;;  %v1683_v57 = vadd.f32 %v1635_v45, %v1577_v46  ;;  %v1327_v59 = vmul.f32 %v3685_v54, %v3809_v22  ;;  %v1578_v61 = vadd.f32 %v1530_v27, %v1472_v4 }
 0x118   : > { %v589_v62 = vpop.f32.mrb[24].mxu0  ;;  %v1474_v63 = vadd.f32 %v1426_v43, %v1374_v48  ;;  %v874_v49 = vsel %vm766_vm15, %v581_v14, %v820_v35  ;;  %v1636_v0 = vmul.f32 %v3722_v34, %v3809_v22  ;;  %vm767_vm0 = vcmp.gt.f32.partialorder %v584_v24, 0.0 }
 0x119   : > { %v3239_v1 = vpop.f32.mrb[25].mxu0  ;;  %v1783_v5 = vadd.f32 %v1735_v47, %v1683_v57  ;;  %v934_v6 = vmul.f32 %v3677_v51, %v874_v49  ;;  %v1039_v7 = vrot.slane %v874_v49, 1  ;;  %v1238_v58 = vrot.slane %v874_v49, 2 }
 0x11a   : > { %v3841_v41 = vpop.f32.mrb[26].mxu0  ;;  %v1375_v9 = vadd.f32 %v1327_v59, %v1178_v52  ;;  %v1427_v10 = vmul.f32 %v3696_v11, %v874_v49  ;;  %v1684_v12 = vadd.f32 %v1636_v0, %v1578_v61  ;;  %v1736_v4 = vmul.f32 %v3734_v56, %v874_v49 }
 0x11b   : > { %v3240_v16 = vpop.f32.mrb[27].mxu0  ;;  %v1090_v14 = vsel %vm1070_vm5, %v1023_v18, %v1039_v7  ;;  %v1287_v19 = vsel %vm1267_vm6, %v1222_v42, %v1238_v58  ;;  %v821_v20 = vmul.f32 0.2, %v584_v24  ;;  %v1328_v21 = vmul.f32 %v3685_v54, %v1302_v23 }
 0x11c   : > { %v1132_v26 = vmul.f32 %v3681_v53, %v1090_v14  ;;  %v1475_v27 = vadd.f32 %v1427_v10, %v1375_v9  ;;  %v1532_v29 = vmul.f32 %v3719_v28, %v1090_v14  ;;  %v3854_v30 = vadd.f32 %v1736_v4, %v1684_v12 }
 0x11d   : > { %v1841_v31 = vmul.f32 %v3741_v60, %v1090_v14  ;;  %v3858_v36 = vmul.f32 %v3816_v25, %v1287_v19  ;;  %v875_v37 = vsel %vm767_vm0, %v584_v24, %v821_v20  ;;  %v1376_v38 = vadd.f32 %v1328_v21, %v1179_v33 }
 0x11e   : > { %v935_v32 = vmul.f32 %v3677_v51, %v875_v37  ;;  %v1055_v43 = vrot.slane %v875_v37, 1  ;;  %v1254_v44 = vrot.slane %v875_v37, 2  ;;  %v1428_v46 = vmul.f32 %v3696_v11, %v875_v37 }
 0x11f   : > { %v3863_v45 = vadd.f32 %v1841_v31, %v1783_v5  ;;  %v1637_v47 = vmul.f32 %v3722_v34, %v1302_v23  ;;  %v1737_v48 = vmul.f32 %v3734_v56, %v875_v37  ;;  %vm768_vm1 = vcmp.gt.f32.partialorder %v589_v62, 0.0 }
 0x120   : > { %v3867_v35 = vpop.f32.mrb[28].mxu0  ;;  %v3871_v52 = vsel %vm1070_vm5, %v1039_v7, %v1055_v43  ;;  %v3877_v24 = vsel %vm1070_vm5, %v1055_v43, %v1023_v18  ;;  %v3881_v33 = vsel %vm1267_vm6, %v1238_v58, %v1254_v44  ;;  %v3885_v23 = vsel %vm1267_vm6, %v1254_v44, %v1222_v42 }
 0x121   : > { %v3243_v57 = vpop.f32.mrb[29].mxu0  ;;  %v1133_v59 = vmul.f32 %v3681_v53, %v3871_v52  ;;  %v1134_v61 = vmul.f32 %v3681_v53, %v3877_v24  ;;  %v1476_v13 = vadd.f32 %v1428_v46, %v1376_v38  ;;  %v1533_v18 = vmul.f32 %v3719_v28, %v3871_v52 }
 0x122   : > { %v3893_v49 = vpop.f32.mrb[30].mxu0  ;;  %v1534_v0 = vmul.f32 %v3719_v28, %v3877_v24  ;;  %v1685_v1 = vadd.f32 %v1637_v47, %v3823_v40  ;;  %v822_v42 = vmul.f32 0.2, %v589_v62  ;;  %v1180_v5 = vadd.f32 %v1132_v26, %v3801_v17 }
 0x123   : > { %v3244_v7 = vpop.f32.mrb[31].mxu0  ;;  %v1182_v58 = vadd.f32 %v1134_v61, %v935_v32  ;;  %v1329_v9 = vmul.f32 %v3685_v54, %v1287_v19  ;;  %v1580_v10 = vadd.f32 %v1532_v29, %v1474_v63  ;;  %v1638_v12 = vmul.f32 %v3722_v34, %v1287_v19 }
 0x124   : > { %v1582_v4 = vadd.f32 %v1534_v0, %v1476_v13  ;;  %v3901_v16 = vadd.f32 %v1737_v48, %v1685_v1  ;;  %v3904_v14 = vsel %vm768_vm1, %v589_v62, %v822_v42  ;;  %vm769_vm2 = vcmp.gt.f32.partialorder %v3841_v41, 0.0 }
 0x125   : > { %v936_v40 = vmul.f32 %v3677_v51, %v3904_v14  ;;  %v1024_v17 = vrot.slane %v3904_v14, 1  ;;  %v1223_v20 = vrot.slane %v3904_v14, 2  ;;  %v1377_v21 = vadd.f32 %v1329_v9, %v1180_v5 }
 0x126   : > { %v1429_v63 = vmul.f32 %v3696_v11, %v3904_v14  ;;  %v1686_v19 = vadd.f32 %v1638_v12, %v1580_v10  ;;  %v1738_v26 = vmul.f32 %v3734_v56, %v3904_v14  ;;  %v823_v62 = vmul.f32 0.2, %v3841_v41 }
 0x127   : > { %v1181_v29 = vadd.f32 %v1133_v59, %v934_v6  ;;  %v1330_v31 = vmul.f32 %v3685_v54, %v3881_v33  ;;  %v1581_v37 = vadd.f32 %v1533_v18, %v1475_v27  ;;  %v1639_v38 = vmul.f32 %v3722_v34, %v3881_v33 }
 0x128   : > { %v3920_v32 = vpop.f32.mrb[32].mxu0  ;;  %v1477_v43 = vadd.f32 %v1429_v63, %v1377_v21  ;;  %v3922_v44 = vadd.f32 %v1738_v26, %v1686_v19  ;;  %v877_v46 = vsel %vm769_vm2, %v3841_v41, %v823_v62  ;;  %v1838_v47 = vmul.f32 %v3741_v60, %v3776_v2 }
 0x129   : > { %v3247_v6 = vpop.f32.mrb[33].mxu0  ;;  %v3930_v48 = vmul.f32 %v3677_v51, %v877_v46  ;;  %v1040_v27 = vrot.slane %v877_v46, 1  ;;  %v1239_v57 = vrot.slane %v877_v46, 2  ;;  %v1378_v59 = vadd.f32 %v1330_v31, %v1181_v29 }
 0x12a   : > { %v3932_v61 = vpop.f32.mrb[34].mxu0  ;;  %v1430_v13 = vmul.f32 %v3696_v11, %v877_v46  ;;  %v1687_v18 = vadd.f32 %v1639_v38, %v1581_v37  ;;  %v1739_v0 = vmul.f32 %v3734_v56, %v877_v46  ;;  %v1839_v41 = vmul.f32 %v3741_v60, %v3795_v15  ;;  %v3975_v6 = vpop.f32.mrb[0].mxu1 }
 0x12b   : > { %v3248_v1 = vpop.f32.mrb[35].mxu0  ;;  %v3942_v2 = vsel %vm1070_vm5, %v1024_v17, %v1040_v27  ;;  %v3948_v42 = vsel %vm1267_vm6, %v1223_v20, %v1239_v57  ;;  %v1886_v5 = vadd.f32 %v1838_v47, %v3768_v50  ;;  %v1944_v7 = vmul.f32 %v3816_v25, %v3780_v3  ;;  %5853 = vst [vmem:[#allocation2_spill] sm:$0xff] %v3975_v6 }
 0x12c   : > { %v1135_v15 = vmul.f32 %v3681_v53, %v3942_v2  ;;  %v3955_v9 = vadd.f32 %v1430_v13, %v1378_v59  ;;  %v1535_v10 = vmul.f32 %v3719_v28, %v3942_v2  ;;  %v3959_v12 = vadd.f32 %v1739_v0, %v1687_v18 }
 0x12d   : > { %v1887_v21 = vadd.f32 %v1839_v41, %v3787_v8  ;;  %v1945_v63 = vmul.f32 %v3816_v25, %v3809_v22  ;;  %v1992_v19 = vadd.f32 %v1944_v7, %v1886_v5  ;;  %vm770_vm3 = vcmp.gt.f32.partialorder %v3867_v35, 0.0  ;;  %v3295_v41 = vpop.f32.mrb[1].mxu1 }
 0x12e   : > { %v824_v50 = vmul.f32 0.2, %v3867_v35  ;;  %v1331_v3 = vmul.f32 %v3685_v54, %v3885_v23  ;;  %v1640_v26 = vmul.f32 %v3722_v34, %v3885_v23  ;;  %vm771_vm4 = vcmp.gt.f32.partialorder %v3893_v49, 0.0 }
 0x12f   : > { %v1993_v62 = vadd.f32 %v1945_v63, %v1887_v21  ;;  %vm2040_vm7 = vcmp.gt.f32.partialorder %v1992_v19, 0.0  ;;  %v2088_v29 = vmul.f32 0.2, %v1992_v19  ;;  %v825_v8 = vmul.f32 0.2, %v3893_v49 }
 0x130   : > { %v3972_v31 = vpop.f32.mrb[36].mxu0  ;;  %v878_v22 = vsel %vm770_vm3, %v3867_v35, %v824_v50  ;;  %v1379_v37 = vadd.f32 %v1331_v3, %v1182_v58  ;;  %v1688_v38 = vadd.f32 %v1640_v26, %v1582_v4  ;;  %v1183_v46 = vadd.f32 %v1135_v15, %v936_v40  ;;  %v3982_v4 = vpop.f32.mrb[2].mxu1 }
 0x131   : > { %v3251_v47 = vpop.f32.mrb[37].mxu0  ;;  %vm2041_vm8 = vcmp.gt.f32.partialorder %v1993_v62, 0.0  ;;  %v2089_v59 = vmul.f32 0.2, %v1993_v62  ;;  %v2136_v13 = vsel %vm2040_vm7, %v1992_v19, %v2088_v29  ;;  %v938_v18 = vmul.f32 %v3677_v51, %v878_v22  ;;  %5854 = vst [vmem:[#allocation3_spill] sm:$0xff] %v3982_v4  ;;  %v3296_v19 = vpop.f32.mrb[3].mxu1 }
 0x132   : > { %v3978_v0 = vpop.f32.mrb[38].mxu0  ;;  %v1056_v1 = vrot.slane %v878_v22, 1  ;;  %v1255_v5 = vrot.slane %v878_v22, 2  ;;  %v1431_v7 = vmul.f32 %v3696_v11, %v878_v22  ;;  %v1740_v35 = vmul.f32 %v3734_v56, %v878_v22 }
 0x133   : > { %v3252_v58 = vpop.f32.mrb[39].mxu0  ;;  %v2137_v40 = vsel %vm2041_vm8, %v1993_v62, %v2089_v59  ;;  %v3987_v15 = vsel %vm771_vm4, %v3893_v49, %v825_v8  ;;  %v1332_v21 = vmul.f32 %v3685_v54, %v3948_v42  ;;  %v1583_v63 = vadd.f32 %v1535_v10, %v1477_v43  ;;  %v4031_v59 = vpop.f32.mrb[4].mxu1 }
 0x134   : > { %v2184_v50 = vpack.c.bf16 %v2137_v40, %v2136_v13  ;;  %v3993_v3 = vsel %vm1070_vm5, %v1040_v27, %v1056_v1  ;;  %v3999_v26 = vsel %vm1070_vm5, %v1056_v1, %v1024_v17  ;;  %v4003_v49 = vsel %vm1267_vm6, %v1239_v57, %v1255_v5  ;;  %5855 = vst [vmem:[#allocation4_spill] sm:$0xff] %v4031_v59 }
 0x135   : > { %v1136_v62 = vmul.f32 %v3681_v53, %v3993_v3  ;;  %v1137_v43 = vmul.f32 %v3681_v53, %v3999_v26  ;;  %v4013_v27 = vsel %vm1267_vm6, %v1255_v5, %v1223_v20  ;;  %v1479_v10 = vadd.f32 %v1431_v7, %v1379_v37  ;;  %v3299_v5 = vpop.f32.mrb[5].mxu1 }
 0x136   : > { %3337 = vmatprep.mubr.bf16.mxu1 %v2184_v50  ;;  %v1536_v17 = vmul.f32 %v3719_v28, %v3993_v3  ;;  %v1537_v57 = vmul.f32 %v3719_v28, %v3999_v26  ;;  %v4019_v29 = vadd.f32 %v1740_v35, %v1688_v38  ;;  %v4023_v8 = vmul.f32 %v3677_v51, %v3987_v15 }
 0x137   : > { %v4025_v22 = vadd.f32 %v1137_v43, %v938_v18  ;;  %v1025_v14 = vrot.slane %v3987_v15, 1  ;;  %v1224_v20 = vrot.slane %v3987_v15, 2  ;;  %v1380_v37 = vadd.f32 %v1332_v21, %v1183_v46 }
 0x138   : > { %v4029_v47 = vpop.f32.mrb[40].mxu0  ;;  %v4033_v13 = vadd.f32 %v1537_v57, %v1479_v10  ;;  %v1432_v38 = vmul.f32 %v3696_v11, %v3987_v15  ;;  %v1641_v41 = vmul.f32 %v3722_v34, %v3948_v42  ;;  %v1741_v18 = vmul.f32 %v3734_v56, %v3987_v15 }
 0x139   : > { %v3255_v1 = vpop.f32.mrb[41].mxu0  ;;  %v1995_v46 = vadd.f32 %v3858_v36, %v3863_v45  ;;  %vm2042_vm9 = vcmp.gt.f32.partialorder %v3834_v55, 0.0  ;;  %v2090_v7 = vmul.f32 0.2, %v3834_v55  ;;  %v1842_v35 = vmul.f32 %v3741_v60, %v3871_v52 }
 0x13a   : > { %v4047_v58 = vpop.f32.mrb[42].mxu0  ;;  %v1480_v40 = vadd.f32 %v1432_v38, %v1380_v37  ;;  %v1689_v21 = vadd.f32 %v1641_v41, %v1583_v63  ;;  %v1843_v19 = vmul.f32 %v3741_v60, %v3877_v24  ;;  %v1948_v50 = vmul.f32 %v3816_v25, %v3881_v33  ;;  %v4061_v24 = vpop.f32.mrb[6].mxu1 }
 0x13b   : > { %v3256_v43 = vpop.f32.mrb[43].mxu0  ;;  %vm2043_vm10 = vcmp.gt.f32.partialorder %v1995_v46, 0.0  ;;  %v2091_v36 = vmul.f32 0.2, %v1995_v46  ;;  %v2138_v45 = vsel %vm2042_vm9, %v3834_v55, %v2090_v7  ;;  %v1890_v10 = vadd.f32 %v1842_v35, %v3854_v30  ;;  %5856 = vst [vmem:[#allocation5_spill] sm:$0xff] %v4061_v24  ;;  %v3300_v55 = vpop.f32.mrb[7].mxu1 }
 0x13c   : > { %v4055_v57 = vadd.f32 %v1741_v18, %v1689_v21  ;;  %v1891_v52 = vadd.f32 %v1843_v19, %v3901_v16  ;;  %v1949_v63 = vmul.f32 %v3816_v25, %v3885_v23  ;;  %vm772_vm11 = vcmp.gt.f32.partialorder %v3920_v32, 0.0 }
 0x13d   : > { %v2139_v37 = vsel %vm2043_vm10, %v1995_v46, %v2091_v36  ;;  %v1996_v33 = vadd.f32 %v1948_v50, %v1890_v10  ;;  %v826_v38 = vmul.f32 0.2, %v3920_v32  ;;  %v1184_v41 = vadd.f32 %v1136_v62, %v3930_v48 }
 0x13e   : > { %v2185_v1 = vpack.c.bf16 %v2139_v37, %v2138_v45  ;;  %v1997_v30 = vadd.f32 %v1949_v63, %v1891_v52  ;;  %v1333_v18 = vmul.f32 %v3685_v54, %v4003_v49  ;;  %v1584_v16 = vadd.f32 %v1536_v17, %v3955_v9 }
 0x13f   : > { %vm2044_vm12 = vcmp.gt.f32.partialorder %v1996_v33, 0.0  ;;  %v2092_v23 = vmul.f32 0.2, %v1996_v33  ;;  %v880_v5 = vsel %vm772_vm11, %v3920_v32, %v826_v38  ;;  %v1642_v46 = vmul.f32 %v3722_v34, %v4003_v49 }
 0x140   : > { %v4071_v7 = vpop.f32.mrb[44].mxu0  ;;  %3338 = vmatmul.mubr.bf16.vlgmr.msra.gmra.mrb[28].mxu1 %v2185_v1  ;;  %vm2045_vm13 = vcmp.gt.f32.partialorder %v1997_v30, 0.0  ;;  %v2093_v48 = vmul.f32 0.2, %v1997_v30  ;;  %v4074_v62 = vmul.f32 %v3677_v51, %v880_v5  ;;  %v1041_v35 = vrot.slane %v880_v5, 1 }
 0x141   : > { %v3259_v21 = vpop.f32.mrb[45].mxu0  ;;  %v2140_v19 = vsel %vm2044_vm12, %v1996_v33, %v2092_v23  ;;  %v1240_v50 = vrot.slane %v880_v5, 2  ;;  %v1381_v9 = vadd.f32 %v1333_v18, %v1184_v41  ;;  %v1433_v17 = vmul.f32 %v3696_v11, %v880_v5 }
 0x142   : > { %v4077_v43 = vpop.f32.mrb[46].mxu0  ;;  %v2141_v32 = vsel %vm2045_vm13, %v1997_v30, %v2093_v48  ;;  %v4083_v36 = vsel %vm1070_vm5, %v1025_v14, %v1041_v35  ;;  %v1690_v45 = vadd.f32 %v1642_v46, %v1584_v16  ;;  %v1742_v10 = vmul.f32 %v3734_v56, %v880_v5 }
 0x143   : > { %v3260_v52 = vpop.f32.mrb[47].mxu0  ;;  %v2186_v63 = vpack.c.bf16 %v2141_v32, %v2140_v19  ;;  %v1138_v37 = vmul.f32 %v3681_v53, %v4083_v36  ;;  %v4092_v33 = vsel %vm1267_vm6, %v1224_v20, %v1240_v50  ;;  %v1481_v38 = vadd.f32 %v1433_v17, %v1381_v9 }
 0x144   : > { %v1538_v41 = vmul.f32 %v3719_v28, %v4083_v36  ;;  %v4096_v55 = vadd.f32 %v1742_v10, %v1690_v45  ;;  %vm773_vm14 = vcmp.gt.f32.partialorder %v3932_v61, 0.0  ;;  %v827_v1 = vmul.f32 0.2, %v3932_v61 }
 0x145   : > { %3341 = vmatprep.mubr.bf16.mxu1 %v2186_v63  ;;  %v1334_v30 = vmul.f32 %v3685_v54, %v4013_v27  ;;  %v1643_v18 = vmul.f32 %v3722_v34, %v4013_v27  ;;  %vm774_vm15 = vcmp.gt.f32.partialorder %v3972_v31, 0.0  ;;  %v828_v16 = vmul.f32 0.2, %v3972_v31  ;;  %v4120_v63 = vpop.f32.mrb[8].mxu1 }
 0x146   : > { %v881_v23 = vsel %vm773_vm14, %v3932_v61, %v827_v1  ;;  %v1186_v5 = vadd.f32 %v1138_v37, %v4023_v8  ;;  %v1335_v46 = vmul.f32 %v3685_v54, %v4092_v33  ;;  %v1586_v48 = vadd.f32 %v1538_v41, %v1480_v40  ;;  %5857 = vst [vmem:[#allocation6_spill] sm:$0xff] %v4120_v63 }
 0x147   : > { %v941_v21 = vmul.f32 %v3677_v51, %v881_v23  ;;  %v1057_v19 = vrot.slane %v881_v23, 1  ;;  %v1256_v9 = vrot.slane %v881_v23, 2  ;;  %v1382_v17 = vadd.f32 %v1334_v30, %v4025_v22 }
 0x148   : > { %v4112_v32 = vpop.f32.mrb[48].mxu0  ;;  %v1434_v45 = vmul.f32 %v3696_v11, %v881_v23  ;;  %v1691_v10 = vadd.f32 %v1643_v18, %v4033_v13  ;;  %v1743_v61 = vmul.f32 %v3734_v56, %v881_v23  ;;  %v4118_v8 = vsel %vm774_vm15, %v3972_v31, %v828_v16 }
 0x149   : > { %v3263_v52 = vpop.f32.mrb[49].mxu0  ;;  %v4124_v40 = vsel %vm1070_vm5, %v1041_v35, %v1057_v19  ;;  %v4130_v22 = vsel %vm1070_vm5, %v1057_v19, %v1025_v14  ;;  %v4134_v13 = vsel %vm1267_vm6, %v1240_v50, %v1256_v9  ;;  %v4140_v31 = vsel %vm1267_vm6, %v1256_v9, %v1224_v20  ;;  %v3303_v35 = vpop.f32.mrb[9].mxu1 }
 0x14a   : > { %v4142_v37 = vpop.f32.mrb[50].mxu0  ;;  %v1139_v41 = vmul.f32 %v3681_v53, %v4124_v40  ;;  %v1140_v14 = vmul.f32 %v3681_v53, %v4130_v22  ;;  %v1482_v1 = vadd.f32 %v1434_v45, %v1382_v17  ;;  %v1539_v50 = vmul.f32 %v3719_v28, %v4124_v40  ;;  %v4179_v19 = vpop.f32.mrb[10].mxu1 }
 0x14b   : > { %v3264_v30 = vpop.f32.mrb[51].mxu0  ;;  %v1540_v15 = vmul.f32 %v3719_v28, %v4130_v22  ;;  %v4152_v18 = vadd.f32 %v1743_v61, %v1691_v10  ;;  %v4156_v20 = vmul.f32 %v3677_v51, %v4118_v8  ;;  %v5804_v16 = vrot.slane %v4118_v8, 1  ;;  %5859 = vst [vmem:[#allocation8_spill] sm:$0xff] %v4179_v19 }
 0x14c   : > { %v1188_v23 = vadd.f32 %v1140_v14, %v941_v21  ;;  %v1383_v9 = vadd.f32 %v1335_v46, %v1186_v5  ;;  %v1435_v17 = vmul.f32 %v3696_v11, %v4118_v8  ;;  %v1644_v52 = vmul.f32 %v3722_v34, %v4092_v33 }
 0x14d   : > { %v1588_v45 = vadd.f32 %v1540_v15, %v1482_v1  ;;  %v1744_v10 = vmul.f32 %v3734_v56, %v4118_v8  ;;  %vm775_vm0 = vcmp.gt.f32.partialorder %v3978_v0, 0.0  ;;  %v829_v35 = vmul.f32 0.2, %v3978_v0 }
 0x14e   : > { %v4167_v61 = vadd.f32 %v1435_v17, %v1383_v9  ;;  %v1187_v21 = vadd.f32 %v1139_v41, %v4074_v62  ;;  %v1336_v5 = vmul.f32 %v3685_v54, %v4134_v13  ;;  %v1692_v46 = vadd.f32 %v1644_v52, %v1586_v48  ;;  %v3304_v41 = vpop.f32.mrb[11].mxu1 }
 0x14f   : > { %v1587_v14 = vadd.f32 %v1539_v50, %v1481_v38  ;;  %v1645_v1 = vmul.f32 %v3722_v34, %v4134_v13  ;;  %v1844_v30 = vmul.f32 %v3741_v60, %v3942_v2  ;;  %v4182_v9 = vsel %vm775_vm0, %v3978_v0, %v829_v35 }
 0x150   : > { %v4177_v15 = vpop.f32.mrb[52].mxu0  ;;  %v1384_v17 = vadd.f32 %v1336_v5, %v1187_v21  ;;  %v1845_v62 = vmul.f32 %v3741_v60, %v3993_v3  ;;  %v1950_v38 = vmul.f32 %v3816_v25, %v3948_v42  ;;  %v4188_v50 = vadd.f32 %v1744_v10, %v1692_v46 }
 0x151   : > { %5858 = vst [vmem:[#allocation7_spill] sm:$0xff] %v4177_v15  ;;  %v3267_v48 = vpop.f32.mrb[53].mxu0  ;;  %v4192_v2 = vmul.f32 %v3677_v51, %v4182_v9  ;;  %v1042_v52 = vrot.slane %v4182_v9, 1  ;;  %v1241_v0 = vrot.slane %v4182_v9, 2  ;;  %v1436_v3 = vmul.f32 %v3696_v11, %v4182_v9 }
 0x152   : > { %v4196_v35 = vpop.f32.mrb[54].mxu0  ;;  %v1693_v21 = vadd.f32 %v1645_v1, %v1587_v14  ;;  %v1745_v42 = vmul.f32 %v3734_v56, %v4182_v9  ;;  %v1892_v10 = vadd.f32 %v1844_v30, %v3922_v44  ;;  %v5861_v48 = vrot.slane %v4118_v8, 2 }
 0x153   : > { %5860 = vst [vmem:[#allocation9_spill] sm:$0xff] %v4196_v35  ;;  %v3268_v5 = vpop.f32.mrb[55].mxu0  ;;  %v4207_v46 = vsel %vm1070_vm5, %v5804_v16, %v1042_v52  ;;  %v1893_v14 = vadd.f32 %v1845_v62, %v3959_v12  ;;  %v1951_v1 = vmul.f32 %v3816_v25, %v4003_v49  ;;  %v4220_v30 = vadd.f32 %v1436_v3, %v1384_v17  ;;  %v4226_v16 = vpop.f32.mrb[12].mxu1 }
 0x154   : > { %v4213_v41 = vsel %vm1267_vm6, %v5861_v48, %v1241_v0  ;;  %v1141_v44 = vmul.f32 %v3681_v53, %v4207_v46  ;;  %v1541_v9 = vmul.f32 %v3719_v28, %v4207_v46  ;;  %v4224_v5 = vadd.f32 %v1745_v42, %v1693_v21  ;;  %5863 = vst [vmem:[#allocation11_spill] sm:$0xff] %v4226_v16  ;;  %v3307_v62 = vpop.f32.mrb[13].mxu1 }
 0x155   : > { %v1998_v19 = vadd.f32 %v1950_v38, %v1892_v10  ;;  %v1999_v48 = vadd.f32 %v1951_v1, %v1893_v14  ;;  %vm776_vm1 = vcmp.gt.f32.partialorder %v4029_v47, 0.0  ;;  %v830_v12 = vmul.f32 0.2, %v4029_v47 }
 0x156   : > { %5862 = vst [vmem:[#allocation10_spill] sm:$0xff] %v4224_v5  ;;  %v1337_v49 = vmul.f32 %v3685_v54, %v4140_v31  ;;  %v1646_v17 = vmul.f32 %v3722_v34, %v4140_v31  ;;  %vm777_vm2 = vcmp.gt.f32.partialorder %v4047_v58, 0.0  ;;  %v831_v3 = vmul.f32 0.2, %v4047_v58 }
 0x157   : > { %vm2046_vm3 = vcmp.gt.f32.partialorder %v1998_v19, 0.0  ;;  %vm2047_vm4 = vcmp.gt.f32.partialorder %v1999_v48, 0.0  ;;  %v2094_v21 = vmul.f32 0.2, %v1998_v19  ;;  %v2095_v38 = vmul.f32 0.2, %v1999_v48 }
 0x158   : > { %v884_v42 = vsel %vm776_vm1, %v4029_v47, %v830_v12  ;;  %v1385_v10 = vadd.f32 %v1337_v49, %v1188_v23  ;;  %v1694_v14 = vadd.f32 %v1646_v17, %v1588_v45  ;;  %v4238_v1 = vsel %vm777_vm2, %v4047_v58, %v831_v3  ;;  %v4240_v62 = vpop.f32.mrb[56].mxu0  ;;  %v4262_v45 = vpop.f32.mrb[14].mxu1 }
 0x159   : > { %v2142_v16 = vsel %vm2046_vm3, %v1998_v19, %v2094_v21  ;;  %v2143_v63 = vsel %vm2047_vm4, %v1999_v48, %v2095_v38  ;;  %v944_v24 = vmul.f32 %v3677_v51, %v884_v42  ;;  %v1058_v59 = vrot.slane %v884_v42, 1  ;;  %v3271_v4 = vpop.f32.mrb[57].mxu0  ;;  %5865 = vst [vmem:[#allocation12_spill] sm:$0xff] %v4262_v45  ;;  %v3308_v17 = vpop.f32.mrb[15].mxu1 }
 0x15a   : > { %v2187_v6 = vpack.c.bf16 %v2143_v63, %v2142_v16  ;;  %v1257_v35 = vrot.slane %v884_v42, 2  ;;  %v1437_v15 = vmul.f32 %v3696_v11, %v884_v42  ;;  %v1746_v5 = vmul.f32 %v3734_v56, %v884_v42  ;;  %v4245_v47 = vpop.f32.mrb[58].mxu0  ;;  %v4286_v42 = vpop.f32.mrb[16].mxu1 }
 0x15b   : > { %v4249_v58 = vsel %vm1070_vm5, %v1042_v52, %v1058_v59  ;;  %v5864_v23 = vrot.slane %v4118_v8, 1  ;;  %v4259_v4 = vmul.f32 %v3677_v51, %v4238_v1  ;;  %v1027_v63 = vrot.slane %v4238_v1, 1  ;;  %v3272_v16 = vpop.f32.mrb[59].mxu0  ;;  %5867 = vst [vmem:[#allocation13_spill] sm:$0xff] %v4286_v42 }
 0x15c   : > { %3342 = vmatmul.mubr.bf16.gmra.mrb[32].mxu1 %v2187_v6  ;;  %v1142_v52 = vmul.f32 %v3681_v53, %v4249_v58  ;;  %v5866_v12 = vrot.slane %v4118_v8, 2  ;;  %v1485_v3 = vadd.f32 %v1437_v15, %v1385_v10  ;;  %v4280_v6 = vmul.f32 %v3719_v28, %v4249_v58  ;;  %v3311_v10 = vpop.f32.mrb[17].mxu1 }
 0x15d   : > { %v4255_v19 = vsel %vm1070_vm5, %v1058_v59, %v5864_v23  ;;  %v4270_v59 = vsel %vm1267_vm6, %v1241_v0, %v1257_v35  ;;  %v4284_v38 = vadd.f32 %v1746_v5, %v1694_v14  ;;  %v1189_v8 = vadd.f32 %v1141_v44, %v4156_v20 }
 0x15e   : > { %v1143_v48 = vmul.f32 %v3681_v53, %v4255_v19  ;;  %v4276_v49 = vsel %vm1267_vm6, %v1257_v35, %v5866_v12  ;;  %v1543_v21 = vmul.f32 %v3719_v28, %v4255_v19  ;;  %v1338_v15 = vmul.f32 %v3685_v54, %v4213_v41 }
 0x15f   : > { %v1438_v16 = vmul.f32 %v3696_v11, %v4238_v1  ;;  %v1589_v5 = vadd.f32 %v1541_v9, %v4167_v61  ;;  %v1647_v14 = vmul.f32 %v3722_v34, %v4213_v41  ;;  %v1747_v20 = vmul.f32 %v3734_v56, %v4238_v1 }
 0x160   : > { %v4288_v0 = vadd.f32 %v1143_v48, %v944_v24  ;;  %v4294_v23 = vadd.f32 %v1543_v21, %v1485_v3  ;;  %v4301_v24 = vpop.f32.mrb[60].mxu0  ;;  %v1386_v48 = vadd.f32 %v1338_v15, %v1189_v8  ;;  %v1846_v44 = vmul.f32 %v3741_v60, %v3999_v26  ;;  %v4317_v15 = vpop.f32.mrb[18].mxu1 }
 0x161   : > { %v1847_v12 = vmul.f32 %v3741_v60, %v4083_v36  ;;  %v3275_v17 = vpop.f32.mrb[61].mxu0  ;;  %v1695_v3 = vadd.f32 %v1647_v14, %v1589_v5  ;;  %v1952_v61 = vmul.f32 %v3816_v25, %v4013_v27  ;;  %v1953_v9 = vmul.f32 %v3816_v25, %v4092_v33  ;;  %5868 = vst [vmem:[#allocation14_spill] sm:$0xff] %v4317_v15  ;;  %v3312_v14 = vpop.f32.mrb[19].mxu1 }
 0x162   : > { %v1848_v21 = vmul.f32 %v3741_v60, %v4124_v40  ;;  %v4315_v8 = vpop.f32.mrb[62].mxu0  ;;  %v4319_v10 = vadd.f32 %v1438_v16, %v1386_v48  ;;  %v1894_v26 = vadd.f32 %v1846_v44, %v4019_v29  ;;  %v1849_v5 = vmul.f32 %v3741_v60, %v4130_v22 }
 0x163   : > { %v1895_v36 = vadd.f32 %v1847_v12, %v4055_v57  ;;  %v3276_v27 = vpop.f32.mrb[63].mxu0  ;;  %v4325_v17 = vadd.f32 %v1747_v20, %v1695_v3  ;;  %v1954_v40 = vmul.f32 %v3816_v25, %v4134_v13  ;;  %v1955_v16 = vmul.f32 %v3816_v25, %v4140_v31 }
 0x164   : > { %v1896_v33 = vadd.f32 %v1848_v21, %v4096_v55  ;;  %v2000_v48 = vadd.f32 %v1952_v61, %v1894_v26  ;;  %v1897_v29 = vadd.f32 %v1849_v5, %v4152_v18  ;;  %vm778_vm7 = vcmp.gt.f32.partialorder %v4071_v7, 0.0 }
 0x165   : > { %v2001_v35 = vadd.f32 %v1953_v9, %v1895_v36  ;;  %v832_v22 = vmul.f32 0.2, %v4071_v7  ;;  %v1190_v20 = vadd.f32 %v1142_v52, %v4192_v2  ;;  %v1339_v55 = vmul.f32 %v3685_v54, %v4270_v59 }
 0x166   : > { %v2002_v57 = vadd.f32 %v1954_v40, %v1896_v33  ;;  %vm2048_vm8 = vcmp.gt.f32.partialorder %v2000_v48, 0.0  ;;  %v2096_v13 = vmul.f32 0.2, %v2000_v48  ;;  %v2003_v12 = vadd.f32 %v1955_v16, %v1897_v29 }
 0x167   : > { %vm2049_vm9 = vcmp.gt.f32.partialorder %v2001_v35, 0.0  ;;  %v2097_v44 = vmul.f32 0.2, %v2001_v35  ;;  %v886_v3 = vsel %vm778_vm7, %v4071_v7, %v832_v22  ;;  %v1387_v33 = vadd.f32 %v1339_v55, %v1190_v20 }
 0x168   : > { %vm2050_vm10 = vcmp.gt.f32.partialorder %v2002_v57, 0.0  ;;  %v2098_v31 = vmul.f32 0.2, %v2002_v57  ;;  %v4339_v18 = vpop.f32.mrb[64].mxu0  ;;  %v2144_v61 = vsel %vm2048_vm8, %v2000_v48, %v2096_v13  ;;  %v4342_v21 = vmul.f32 %v3677_v51, %v886_v3 }
 0x169   : > { %v2145_v9 = vsel %vm2049_vm9, %v2001_v35, %v2097_v44  ;;  %v1043_v2 = vrot.slane %v886_v3, 1  ;;  %v3279_v52 = vpop.f32.mrb[65].mxu0  ;;  %vm2051_vm11 = vcmp.gt.f32.partialorder %v2003_v12, 0.0  ;;  %v2099_v36 = vmul.f32 0.2, %v2003_v12 }
 0x16a   : > { %v2188_v26 = vpack.c.bf16 %v2145_v9, %v2144_v61  ;;  %v2146_v5 = vsel %vm2050_vm10, %v2002_v57, %v2098_v31  ;;  %v4344_v27 = vpop.f32.mrb[66].mxu0  ;;  %v1242_v14 = vrot.slane %v886_v3, 2  ;;  %v1439_v35 = vmul.f32 %v3696_v11, %v886_v3 }
 0x16b   : > { %v4350_v7 = vsel %vm1070_vm5, %v1027_v63, %v1043_v2  ;;  %v3280_v40 = vpop.f32.mrb[67].mxu0  ;;  %v2147_v16 = vsel %vm2051_vm11, %v2003_v12, %v2099_v36  ;;  %v1590_v57 = vadd.f32 %v4280_v6, %v4220_v30  ;;  %v5869_v13 = vrot.slane %v4238_v1, 2  ;;  %v4372_v6 = vpop.f32.mrb[20].mxu1 }
 0x16c   : > { %3345 = vmatprep.mubr.bf16.mxu1 %v2188_v26  ;;  %v1144_v48 = vmul.f32 %v3681_v53, %v4350_v7  ;;  %v1544_v29 = vmul.f32 %v3719_v28, %v4350_v7  ;;  %v2189_v22 = vpack.c.bf16 %v2147_v16, %v2146_v5  ;;  %v1487_v55 = vadd.f32 %v1439_v35, %v1387_v33  ;;  %v3315_v26 = vpop.f32.mrb[21].mxu1 }
 0x16d   : > { %v4363_v20 = vsel %vm1267_vm6, %v5869_v13, %v1242_v14  ;;  %v1648_v44 = vmul.f32 %v3722_v34, %v4270_v59  ;;  %v1748_v12 = vmul.f32 %v3734_v56, %v886_v3  ;;  %vm779_vm12 = vcmp.gt.f32.partialorder %v4077_v43, 0.0  ;;  %5870 = vst [vmem:[#allocation15_spill] sm:$0xff] %v4372_v6 }
 0x16e   : > { %v833_v31 = vmul.f32 0.2, %v4077_v43  ;;  %v1340_v30 = vmul.f32 %v3685_v54, %v4276_v49  ;;  %3346 = vmatmul.mubr.bf16.gmra.mrb[36].mxu1 %v2189_v22  ;;  %v1649_v9 = vmul.f32 %v3722_v34, %v4276_v49  ;;  %vm780_vm13 = vcmp.gt.f32.partialorder %v4112_v32, 0.0 }
 0x16f   : > { %v1696_v61 = vadd.f32 %v1648_v44, %v1590_v57  ;;  %v834_v52 = vmul.f32 0.2, %v4112_v32  ;;  %v1192_v5 = vadd.f32 %v1144_v48, %v4259_v4  ;;  %v1341_v33 = vmul.f32 %v3685_v54, %v4363_v20 }
 0x170   : > { %v887_v3 = vsel %vm779_vm12, %v4077_v43, %v833_v31  ;;  %v1388_v36 = vadd.f32 %v1340_v30, %v4288_v0  ;;  %v4383_v35 = vpop.f32.mrb[68].mxu0  ;;  %v1697_v43 = vadd.f32 %v1649_v9, %v4294_v23  ;;  %v5872_v30 = vrot.slane %v4238_v1, 2 }
 0x171   : > { %v4385_v40 = vadd.f32 %v1748_v12, %v1696_v61  ;;  %v947_v16 = vmul.f32 %v3677_v51, %v887_v3  ;;  %v1059_v57 = vrot.slane %v887_v3, 1  ;;  %v1258_v22 = vrot.slane %v887_v3, 2  ;;  %v3283_v13 = vpop.f32.mrb[69].mxu0 }
 0x172   : > { %v1440_v44 = vmul.f32 %v3696_v11, %v887_v3  ;;  %v1749_v0 = vmul.f32 %v3734_v56, %v887_v3  ;;  %v4394_v4 = vsel %vm780_vm13, %v4112_v32, %v834_v52  ;;  %v4396_v48 = vpop.f32.mrb[70].mxu0  ;;  %v1389_v13 = vadd.f32 %v1341_v33, %v1192_v5 }
 0x173   : > { %5871 = vst [vmem:[#allocation16_spill] sm:$0xff] %v4396_v48  ;;  %v4400_v12 = vsel %vm1070_vm5, %v1043_v2, %v1059_v57  ;;  %v4406_v31 = vsel %vm1070_vm5, %v1059_v57, %v1027_v63  ;;  %v4410_v23 = vsel %vm1267_vm6, %v1242_v14, %v1258_v22  ;;  %v4416_v32 = vsel %vm1267_vm6, %v1258_v22, %v5872_v30  ;;  %v3284_v61 = vpop.f32.mrb[71].mxu0 }
 0x174   : > { %v1145_v2 = vmul.f32 %v3681_v53, %v4400_v12  ;;  %v1146_v9 = vmul.f32 %v3681_v53, %v4406_v31  ;;  %v1488_v52 = vadd.f32 %v1440_v44, %v1388_v36  ;;  %v1545_v63 = vmul.f32 %v3719_v28, %v4400_v12 }
 0x175   : > { %v1546_v14 = vmul.f32 %v3719_v28, %v4406_v31  ;;  %v4426_v26 = vadd.f32 %v1749_v0, %v1697_v43  ;;  %v4430_v1 = vmul.f32 %v3677_v51, %v4394_v4  ;;  %v1441_v36 = vmul.f32 %v3696_v11, %v4394_v4 }
 0x176   : > { %v1194_v57 = vadd.f32 %v1146_v9, %v947_v16  ;;  %v1592_v30 = vadd.f32 %v1544_v29, %v4319_v10  ;;  %v1650_v43 = vmul.f32 %v3722_v34, %v4363_v20  ;;  %v1750_v0 = vmul.f32 %v3734_v56, %v4394_v4  ;;  %v4450_v9 = vpop.f32.mrb[22].mxu1 }
 0x177   : > { %v4436_v44 = vadd.f32 %v1546_v14, %v1488_v52  ;;  %v4443_v61 = vadd.f32 %v1441_v36, %v1389_v13  ;;  %vm781_vm14 = vcmp.gt.f32.partialorder %v4142_v37, 0.0  ;;  %v835_v16 = vmul.f32 0.2, %v4142_v37  ;;  %5874 = vst [vmem:[#allocation18_spill] sm:$0xff] %v4450_v9  ;;  %v3316_v36 = vpop.f32.mrb[23].mxu1 }
 0x178   : > { %v1193_v5 = vadd.f32 %v1145_v2, %v4342_v21  ;;  %v4448_v33 = vpop.f32.mrb[72].mxu0  ;;  %v1698_v52 = vadd.f32 %v1650_v43, %v1592_v30  ;;  %v1342_v10 = vmul.f32 %v3685_v54, %v4410_v23  ;;  %v1593_v29 = vadd.f32 %v1545_v63, %v1487_v55 }
 0x179   : > { %5873 = vst [vmem:[#allocation17_spill] sm:$0xff] %v4448_v33  ;;  %v1651_v14 = vmul.f32 %v3722_v34, %v4410_v23  ;;  %v3287_v13 = vpop.f32.mrb[73].mxu0  ;;  %v889_v22 = vsel %vm781_vm14, %v4142_v37, %v835_v16  ;;  %v1850_v3 = vmul.f32 %v3741_v60, %v4207_v46  ;;  %v1851_v21 = vmul.f32 %v3741_v60, %v4249_v58 }
 0x17a   : > { %v1956_v2 = vmul.f32 %v3816_v25, %v4213_v41  ;;  %v4463_v30 = vpop.f32.mrb[74].mxu0  ;;  %v4465_v43 = vadd.f32 %v1750_v0, %v1698_v52  ;;  %v4468_v55 = vmul.f32 %v3677_v51, %v889_v22  ;;  %v1044_v63 = vrot.slane %v889_v22, 1 }
 0x17b   : > { %5875 = vst [vmem:[#allocation19_spill] sm:$0xff] %v4463_v30  ;;  %v1243_v13 = vrot.slane %v889_v22, 2  ;;  %v3288_v36 = vpop.f32.mrb[75].mxu0  ;;  %v1390_v37 = vadd.f32 %v1342_v10, %v1193_v5  ;;  %v1442_v16 = vmul.f32 %v3696_v11, %v889_v22  ;;  %v1699_v46 = vadd.f32 %v1651_v14, %v1593_v29  ;;  %v5878_v5 = vld [vmem:[#allocation10_spill] sm:$0xff] }
 0x17c   : > { %v1751_v9 = vmul.f32 %v3734_v56, %v889_v22  ;;  %v5876_v58 = vrot.slane %v4394_v4, 1  ;;  %v5877_v41 = vrot.slane %v4394_v4, 2  ;;  %v1898_v52 = vadd.f32 %v1850_v3, %v4188_v50 }
 0x17d   : > { %v1899_v10 = vadd.f32 %v1851_v21, %v5878_v5  ;;  %v4488_v22 = vadd.f32 %v1442_v16, %v1390_v37  ;;  %v5879_v21 = vld [vmem:[#allocation7_spill] sm:$0xff]  ;;  %v1343_v37 = vmul.f32 %v3685_v54, %v4416_v32  ;;  %v5880_v16 = vld [vmem:[#allocation9_spill] sm:$0xff]  ;;  %vm784_vm3 = vcmp.gt.f32.partialorder %v4240_v62, 0.0 }
 0x17e   : > { %v4476_v25 = vsel %vm1070_vm5, %v5876_v58, %v1044_v63  ;;  %v4482_v0 = vsel %vm1267_vm6, %v5877_v41, %v1243_v13  ;;  %v4492_v36 = vadd.f32 %v1751_v9, %v1699_v46  ;;  %v4497_v58 = vld [vmem:[%s5801_s2 + $0x8] ss:$0 sm:$0xff]  ;;  %v2004_v3 = vadd.f32 %v1956_v2, %v1898_v52 }
 0x17f   : > { %v1147_v29 = vmul.f32 %v3681_v53, %v4476_v25  ;;  %v1547_v14 = vmul.f32 %v3719_v28, %v4476_v25  ;;  %v1957_v50 = vmul.f32 %v4497_v58, %v4270_v59  ;;  %vm782_vm15 = vcmp.gt.f32.partialorder %v5879_v21, 0.0 }
 0x180   : > { %v836_v41 = vmul.f32 0.2, %v5879_v21  ;;  %v1652_v9 = vmul.f32 %v3722_v34, %v4416_v32  ;;  %vm783_vm0 = vcmp.gt.f32.partialorder %v5880_v16, 0.0  ;;  %v837_v46 = vmul.f32 0.2, %v5880_v16 }
 0x181   : > { %v2005_v5 = vadd.f32 %v1957_v50, %v1899_v10  ;;  %vm2052_vm1 = vcmp.gt.f32.partialorder %v2004_v3, 0.0  ;;  %v2100_v30 = vmul.f32 0.2, %v2004_v3  ;;  %v1391_v33 = vadd.f32 %v1343_v37, %v1194_v57 }
 0x182   : > { %v890_v59 = vsel %vm782_vm15, %v5879_v21, %v836_v41  ;;  %v5881_v10 = vrot.slane %v4394_v4, 1  ;;  %v5882_v57 = vrot.slane %v4394_v4, 2  ;;  %vm785_vm10 = vcmp.gt.f32.partialorder %v4245_v47, 0.0 }
 0x183   : > { %v950_v2 = vmul.f32 %v3677_v51, %v890_v59  ;;  %v1060_v52 = vrot.slane %v890_v59, 1  ;;  %v1259_v6 = vrot.slane %v890_v59, 2  ;;  %vm2053_vm2 = vcmp.gt.f32.partialorder %v2005_v5, 0.0 }
 0x184   : > { %v2101_v15 = vmul.f32 0.2, %v2005_v5  ;;  %v2148_v42 = vsel %vm2052_vm1, %v2004_v3, %v2100_v30  ;;  %v1443_v45 = vmul.f32 %v3696_v11, %v890_v59  ;;  %vm786_vm11 = vcmp.gt.f32.partialorder %v4301_v24, 0.0 }
 0x185   : > { %v4514_v48 = vsel %vm1070_vm5, %v1044_v63, %v1060_v52  ;;  %v4520_v50 = vsel %vm1070_vm5, %v1060_v52, %v5881_v10  ;;  %v4524_v21 = vsel %vm1267_vm6, %v1243_v13, %v1259_v6  ;;  %v4530_v30 = vsel %vm1267_vm6, %v1259_v6, %v5882_v57 }
 0x186   : > { %v2149_v3 = vsel %vm2053_vm2, %v2005_v5, %v2101_v15  ;;  %v1148_v63 = vmul.f32 %v3681_v53, %v4514_v48  ;;  %v1149_v41 = vmul.f32 %v3681_v53, %v4520_v50  ;;  %v1491_v37 = vadd.f32 %v1443_v45, %v1391_v33 }
 0x187   : > { %v2190_v52 = vpack.c.bf16 %v2149_v3, %v2148_v42  ;;  %v4538_v10 = vmul.f32 %v3719_v28, %v4514_v48  ;;  %v1549_v4 = vmul.f32 %v3719_v28, %v4520_v50  ;;  %v1700_v13 = vadd.f32 %v1652_v9, %v4436_v44 }
 0x188   : > { %v4543_v6 = vadd.f32 %v1149_v41, %v950_v2  ;;  %v1752_v15 = vmul.f32 %v3734_v56, %v890_v59  ;;  %v4549_v5 = vsel %vm783_vm0, %v5880_v16, %v837_v46  ;;  %v1195_v45 = vadd.f32 %v1147_v29, %v4430_v1  ;;  %v4567_v29 = vpop.f32.mrb[24].mxu1  ;;  %v4569_v46 = vpop.f32.mrb[76].mxu0 }
 0x189   : > { %3349 = vmatprep.mubr.bf16.mxu1 %v2190_v52  ;;  %v4552_v42 = vadd.f32 %v1549_v4, %v1491_v37  ;;  %v4556_v33 = vmul.f32 %v3677_v51, %v4549_v5  ;;  %v1344_v59 = vmul.f32 %v3685_v54, %v4482_v0  ;;  %v1444_v16 = vmul.f32 %v3696_v11, %v4549_v5  ;;  %v3291_v52 = vpop.f32.mrb[77].mxu0  ;;  %v3319_v4 = vpop.f32.mrb[25].mxu1 }
 0x18a   : > { %v4560_v2 = vadd.f32 %v1752_v15, %v1700_v13  ;;  %v1595_v1 = vadd.f32 %v1547_v14, %v4443_v61  ;;  %v1653_v57 = vmul.f32 %v3722_v34, %v4482_v0  ;;  %v1753_v3 = vmul.f32 %v3734_v56, %v4549_v5 }
 0x18b   : > { %v1852_v41 = vmul.f32 %v3741_v60, %v4255_v19  ;;  %v1853_v37 = vmul.f32 %v3741_v60, %v4350_v7  ;;  %v1392_v13 = vadd.f32 %v1344_v59, %v1195_v45  ;;  %v1958_v61 = vmul.f32 %v4497_v58, %v4276_v49 }
 0x18c   : > { %v1959_v14 = vmul.f32 %v4497_v58, %v4363_v20  ;;  %v1854_v15 = vmul.f32 %v3741_v60, %v4400_v12  ;;  %v1701_v9 = vadd.f32 %v1653_v57, %v1595_v1  ;;  %v1855_v7 = vmul.f32 %v3741_v60, %v4406_v31 }
 0x18d   : > { %v1900_v44 = vadd.f32 %v1852_v41, %v4284_v38  ;;  %v1901_v19 = vadd.f32 %v1853_v37, %v4325_v17  ;;  %v4589_v52 = vadd.f32 %v1444_v16, %v1392_v13  ;;  %v1960_v49 = vmul.f32 %v4497_v58, %v4410_v23 }
 0x18e   : > { %v1902_v45 = vadd.f32 %v1854_v15, %v4385_v40  ;;  %v1961_v20 = vmul.f32 %v4497_v58, %v4416_v32  ;;  %v4596_v59 = vadd.f32 %v1753_v3, %v1701_v9  ;;  %v1903_v38 = vadd.f32 %v1855_v7, %v4426_v26  ;;  %v4602_v40 = vpop.f32.mrb[78].mxu0 }
 0x18f   : > { %v2006_v12 = vadd.f32 %v1958_v61, %v1900_v44  ;;  %v2007_v1 = vadd.f32 %v1959_v14, %v1901_v19  ;;  %v838_v31 = vmul.f32 0.2, %v4240_v62  ;;  %v1196_v16 = vadd.f32 %v1148_v63, %v4468_v55  ;;  %v3292_v3 = vpop.f32.mrb[79].mxu0 }
 0x190   : > { %v2008_v17 = vadd.f32 %v1960_v49, %v1902_v45  ;;  %v2009_v32 = vadd.f32 %v1961_v20, %v1903_v38  ;;  %v5883_v61 = vrot.slane %v4549_v5, 1  ;;  %v1596_v20 = vadd.f32 %v4538_v10, %v4488_v22 }
 0x191   : > { %vm2054_vm4 = vcmp.gt.f32.partialorder %v2006_v12, 0.0  ;;  %vm2055_vm7 = vcmp.gt.f32.partialorder %v2007_v1, 0.0  ;;  %v2102_v23 = vmul.f32 0.2, %v2006_v12  ;;  %v2103_v57 = vmul.f32 0.2, %v2007_v1 }
 0x192   : > { %vm2056_vm8 = vcmp.gt.f32.partialorder %v2008_v17, 0.0  ;;  %v2104_v9 = vmul.f32 0.2, %v2008_v17  ;;  %v892_v44 = vsel %vm784_vm3, %v4240_v62, %v838_v31  ;;  %vm2057_vm9 = vcmp.gt.f32.partialorder %v2009_v32, 0.0 }
 0x193   : > { %v2150_v26 = vsel %vm2054_vm4, %v2006_v12, %v2102_v23  ;;  %v2151_v41 = vsel %vm2055_vm7, %v2007_v1, %v2103_v57  ;;  %v4606_v37 = vmul.f32 %v3677_v51, %v892_v44  ;;  %v1045_v4 = vrot.slane %v892_v44, 1 }
 0x194   : > { %v2191_v13 = vpack.c.bf16 %v2151_v41, %v2150_v26  ;;  %v2105_v55 = vmul.f32 0.2, %v2009_v32  ;;  %v2152_v63 = vsel %vm2056_vm8, %v2008_v17, %v2104_v9  ;;  %v1244_v15 = vrot.slane %v892_v44, 2 }
 0x195   : > { %v4612_v14 = vsel %vm1070_vm5, %v5883_v61, %v1045_v4  ;;  %v1345_v62 = vmul.f32 %v3685_v54, %v4524_v21  ;;  %v1445_v19 = vmul.f32 %v3696_v11, %v892_v44  ;;  %v5884_v1 = vrot.slane %v4549_v5, 2 }
 0x196   : > { %3350 = vmatmul.mubr.bf16.gmra.mrb[40].mxu1 %v2191_v13  ;;  %v2153_v7 = vsel %vm2057_vm9, %v2009_v32, %v2105_v55  ;;  %v1150_v45 = vmul.f32 %v3681_v53, %v4612_v14  ;;  %v1550_v49 = vmul.f32 %v3719_v28, %v4612_v14  ;;  %v1654_v31 = vmul.f32 %v3722_v34, %v4524_v21 }
 0x197   : > { %v2192_v12 = vpack.c.bf16 %v2153_v7, %v2152_v63  ;;  %v4627_v38 = vsel %vm1267_vm6, %v5884_v1, %v1244_v15  ;;  %v1393_v17 = vadd.f32 %v1345_v62, %v1196_v16  ;;  %v1754_v23 = vmul.f32 %v3734_v56, %v892_v44 }
 0x198   : > { %v839_v57 = vmul.f32 0.2, %v4245_v47  ;;  %v1346_v22 = vmul.f32 %v3685_v54, %v4530_v30  ;;  %v1702_v32 = vadd.f32 %v1654_v31, %v1596_v20  ;;  %v1655_v9 = vmul.f32 %v3722_v34, %v4530_v30 }
 0x199   : > { %3353 = vmatprep.mubr.bf16.mxu1 %v2192_v12  ;;  %v1493_v10 = vadd.f32 %v1445_v19, %v1393_v17  ;;  %v840_v44 = vmul.f32 0.2, %v4301_v24  ;;  %v1198_v26 = vadd.f32 %v1150_v45, %v4556_v33  ;;  %v5885_v33 = vrot.slane %v4549_v5, 1  ;;  %v4678_v17 = vpop.f32.mrb[26].mxu1 }
 0x19a   : > { %v893_v16 = vsel %vm785_vm10, %v4245_v47, %v839_v57  ;;  %v1394_v3 = vadd.f32 %v1346_v22, %v4543_v6  ;;  %v4643_v41 = vadd.f32 %v1754_v23, %v1702_v32  ;;  %v1703_v62 = vadd.f32 %v1655_v9, %v4552_v42  ;;  %5887 = vst [vmem:[#allocation10_spill] sm:$0xff] %v4678_v17  ;;  %v3320_v57 = vpop.f32.mrb[27].mxu1 }
 0x19b   : > { %v953_v13 = vmul.f32 %v3677_v51, %v893_v16  ;;  %v1061_v55 = vrot.slane %v893_v16, 1  ;;  %v1260_v63 = vrot.slane %v893_v16, 2  ;;  %v1446_v61 = vmul.f32 %v3696_v11, %v893_v16 }
 0x19c   : > { %v1755_v19 = vmul.f32 %v3734_v56, %v893_v16  ;;  %v4650_v47 = vsel %vm786_vm11, %v4301_v24, %v840_v44  ;;  %v5886_v42 = vmov %v5884_v1  ;;  %v1347_v9 = vmul.f32 %v3685_v54, %v4627_v38 }
 0x19d   : > { %v4654_v6 = vsel %vm1070_vm5, %v1045_v4, %v1061_v55  ;;  %v4660_v7 = vsel %vm1070_vm5, %v1061_v55, %v5885_v33  ;;  %v4664_v45 = vsel %vm1267_vm6, %v1244_v15, %v1260_v63  ;;  %v4670_v24 = vsel %vm1267_vm6, %v1260_v63, %v5886_v42 }
 0x19e   : > { %v1151_v4 = vmul.f32 %v3681_v53, %v4654_v6  ;;  %v1152_v20 = vmul.f32 %v3681_v53, %v4660_v7  ;;  %v1494_v12 = vadd.f32 %v1446_v61, %v1394_v3  ;;  %v1551_v1 = vmul.f32 %v3719_v28, %v4654_v6 }
 0x19f   : > { %v1552_v15 = vmul.f32 %v3719_v28, %v4660_v7  ;;  %v4682_v5 = vadd.f32 %v1755_v19, %v1703_v62  ;;  %v4686_v31 = vmul.f32 %v3677_v51, %v4650_v47  ;;  %v5823_v23 = vrot.slane %v4650_v47, 1 }
 0x1a0   : > { %v1200_v22 = vadd.f32 %v1152_v20, %v953_v13  ;;  %v5822_v32 = vrot.slane %v4650_v47, 2  ;;  %v1447_v16 = vmul.f32 %v3696_v11, %v4650_v47  ;;  %v1598_v44 = vadd.f32 %v1550_v49, %v4589_v52 }
 0x1a1   : > { %v4694_v3 = vadd.f32 %v1552_v15, %v1494_v12  ;;  %v1656_v55 = vmul.f32 %v3722_v34, %v4627_v38  ;;  %v1756_v63 = vmul.f32 %v3734_v56, %v4650_v47  ;;  %v1395_v61 = vadd.f32 %v1347_v9, %v1198_v26 }
 0x1a2   : > { %vm787_vm12 = vcmp.gt.f32.partialorder %v4315_v8, 0.0  ;;  %v841_v13 = vmul.f32 0.2, %v4315_v8  ;;  %v1199_v62 = vadd.f32 %v1151_v4, %v4606_v37  ;;  %v1348_v33 = vmul.f32 %v3685_v54, %v4664_v45 }
 0x1a3   : > { %v1704_v19 = vadd.f32 %v1656_v55, %v1598_v44  ;;  %v1599_v42 = vadd.f32 %v1551_v1, %v1493_v10  ;;  %v1657_v52 = vmul.f32 %v3722_v34, %v4664_v45  ;;  %v4708_v49 = vadd.f32 %v1447_v16, %v1395_v61 }
 0x1a4   : > { %v4711_v20 = vsel %vm787_vm12, %v4315_v8, %v841_v13  ;;  %v1856_v26 = vmul.f32 %v3741_v60, %v4476_v25  ;;  %v1857_v12 = vmul.f32 %v3741_v60, %v4514_v48  ;;  %v1396_v15 = vadd.f32 %v1348_v33, %v1199_v62  ;;  %v5889_v33 = vld [vmem:[#allocation3_spill] sm:$0xff] }
 0x1a5   : > { %v4717_v37 = vadd.f32 %v1756_v63, %v1704_v19  ;;  %v4721_v4 = vmul.f32 %v3677_v51, %v4711_v20  ;;  %v1046_v10 = vrot.slane %v4711_v20, 1  ;;  %v1245_v1 = vrot.slane %v4711_v20, 2  ;;  %v5888_v19 = vld [vmem:[#allocation2_spill] sm:$0xff] }
 0x1a6   : > { %v1448_v8 = vmul.f32 %v3696_v11, %v4711_v20  ;;  %v1705_v57 = vadd.f32 %v1657_v52, %v1599_v42  ;;  %v1757_v25 = vmul.f32 %v3734_v56, %v4711_v20  ;;  %v1904_v16 = vadd.f32 %v1856_v26, %v4465_v43 }
 0x1a7   : > { %v4733_v48 = vsel %vm1070_vm5, %v5823_v23, %v1046_v10  ;;  %v4739_v9 = vsel %vm1267_vm6, %v5822_v32, %v1245_v1  ;;  %v1905_v44 = vadd.f32 %v1857_v12, %v4492_v36  ;;  %v1962_v62 = vmul.f32 %v4497_v58, %v4482_v0 }
 0x1a8   : > { %v4745_v55 = vmul.f32 %v3681_v53, %v4733_v48  ;;  %v4747_v63 = vadd.f32 %v1448_v8, %v1396_v15  ;;  %v4751_v61 = vmul.f32 %v3719_v28, %v4733_v48  ;;  %v4753_v13 = vadd.f32 %v1757_v25, %v1705_v57 }
 0x1a9   : > { %v1963_v43 = vmul.f32 %v4497_v58, %v4524_v21  ;;  %vm796_vm13 = vcmp.gt.f32.partialorder %v5888_v19, 0.0  ;;  %v850_v36 = vmul.f32 0.2, %v5888_v19  ;;  %vm797_vm14 = vcmp.gt.f32.partialorder %v5889_v33, 0.0 }
 0x1aa   : > { %v851_v42 = vmul.f32 0.2, %v5889_v33  ;;  %vm788_vm15 = vcmp.gt.f32.partialorder %v4339_v18, 0.0  ;;  %v842_v52 = vmul.f32 0.2, %v4339_v18  ;;  %v2010_v20 = vadd.f32 %v1962_v62, %v1904_v16 }
 0x1ab   : > { %v2011_v26 = vadd.f32 %v1963_v43, %v1905_v44  ;;  %v4766_v12 = vsel %vm796_vm13, %v5888_v19, %v850_v36  ;;  %v1349_v0 = vmul.f32 %v3685_v54, %v4670_v24  ;;  %vm789_vm3 = vcmp.gt.f32.partialorder %v4344_v27, 0.0 }
 0x1ac   : > { %5890 = vst [vmem:[#allocation7_spill] sm:$0xff] %v4766_v12  ;;  %v4772_v21 = vmul.f32 %v3677_v51, %v4766_v12  ;;  %v4778_v57 = vmul.f32 %v3696_v11, %v4766_v12  ;;  %vm2058_vm0 = vcmp.gt.f32.partialorder %v2010_v20, 0.0  ;;  %v2106_v25 = vmul.f32 0.2, %v2010_v20 }
 0x1ad   : > { %vm2059_vm1 = vcmp.gt.f32.partialorder %v2011_v26, 0.0  ;;  %v2107_v16 = vmul.f32 0.2, %v2011_v26  ;;  %v4782_v44 = vmul.f32 %v3734_v56, %v4766_v12  ;;  %v4787_v62 = vsel %vm797_vm14, %v5889_v33, %v851_v42 }
 0x1ae   : > { %5891 = vst [vmem:[#allocation9_spill] sm:$0xff] %v4778_v57  ;;  %5893 = vst [vmem:[#allocation3_spill] sm:$0xff] %v4787_v62  ;;  %v896_v43 = vsel %vm788_vm15, %v4339_v18, %v842_v52  ;;  %v1397_v19 = vadd.f32 %v1349_v0, %v1200_v22  ;;  %v2154_v36 = vsel %vm2058_vm0, %v2010_v20, %v2106_v25  ;;  %v5824_v8 = vrot.slane %v4787_v62, 1 }
 0x1af   : > { %5892 = vst [vmem:[#allocation2_spill] sm:$0xff] %v4782_v44  ;;  %v2155_v32 = vsel %vm2059_vm1, %v2011_v26, %v2107_v16  ;;  %v4794_v23 = vmul.f32 %v3677_v51, %v4787_v62  ;;  %v5825_v57 = vrot.slane %v4787_v62, 2  ;;  %v4800_v33 = vmul.f32 %v3696_v11, %v4787_v62 }
 0x1b0   : > { %v2193_v15 = vpack.c.bf16 %v2155_v32, %v2154_v36  ;;  %v4804_v42 = vmul.f32 %v3734_v56, %v4787_v62  ;;  %v5896_v18 = vrot.slane %v4766_v12, 1  ;;  %v956_v32 = vmul.f32 %v3677_v51, %v896_v43 }
 0x1b1   : > { %5894 = vst [vmem:[#allocation20_spill] sm:$0xff] %v4794_v23  ;;  %v1062_v52 = vrot.slane %v896_v43, 1  ;;  %v1261_v20 = vrot.slane %v896_v43, 2  ;;  %v5898_v0 = vrot.slane %v4766_v12, 2  ;;  %v1449_v36 = vmul.f32 %v3696_v11, %v896_v43 }
 0x1b2   : > { %5895 = vst [vmem:[#allocation21_spill] sm:$0xff] %v4804_v42  ;;  %v4812_v22 = vsel %vm1070_vm5, %v5896_v18, %v5824_v8  ;;  %3354 = vmatmul.mubr.bf16.gmra.mrb[44].mxu1 %v2193_v15  ;;  %v5902_v8 = vrot.slane %v4650_v47, 1  ;;  %v1758_v44 = vmul.f32 %v3734_v56, %v896_v43  ;;  %v1201_v23 = vadd.f32 %v4745_v55, %v4686_v31 }
 0x1b3   : > { %5897 = vst [vmem:[#allocation22_spill] sm:$0xff] %v4812_v22  ;;  %v1163_v26 = vmul.f32 %v3681_v53, %v4812_v22  ;;  %v4823_v25 = vsel %vm1267_vm6, %v5898_v0, %v5825_v57  ;;  %v4827_v16 = vmul.f32 %v3719_v28, %v4812_v22  ;;  %v4836_v18 = vsel %vm1070_vm5, %v1046_v10, %v1062_v52 }
 0x1b4   : > { %5899 = vst [vmem:[#allocation23_spill] sm:$0xff] %v4823_v25  ;;  %v4832_v15 = vmul.f32 %v3722_v34, %v4823_v25  ;;  %v4842_v0 = vsel %vm1070_vm5, %v1062_v52, %v5902_v8  ;;  %v4846_v57 = vsel %vm1267_vm6, %v1245_v1, %v1261_v20  ;;  %v5903_v10 = vrot.slane %v4650_v47, 2  ;;  %v5905_v47 = vld [vmem:[#allocation4_spill] sm:$0xff] }
 0x1b5   : > { %5900 = vst [vmem:[#allocation24_spill] sm:$0xff] %v4827_v16  ;;  %v4850_v16 = vmul.f32 %v3681_v53, %v4836_v18  ;;  %v1497_v22 = vadd.f32 %v1449_v36, %v1397_v19  ;;  %v4862_v8 = vmul.f32 %v3719_v28, %v4836_v18  ;;  %v1555_v1 = vmul.f32 %v3719_v28, %v4842_v0 }
 0x1b6   : > { %5901 = vst [vmem:[#allocation25_spill] sm:$0xff] %v4832_v15  ;;  %v1155_v15 = vmul.f32 %v3681_v53, %v4842_v0  ;;  %v4858_v42 = vsel %vm1267_vm6, %v1261_v20, %v5903_v10  ;;  %v1658_v52 = vmul.f32 %v3722_v34, %v4670_v24  ;;  %vm798_vm2 = vcmp.gt.f32.partialorder %v5905_v47, 0.0 }
 0x1b7   : > { %5904 = vst [vmem:[#allocation26_spill] sm:$0xff] %v4858_v42  ;;  %v852_v20 = vmul.f32 0.2, %v5905_v47  ;;  %v4874_v19 = vadd.f32 %v1555_v1, %v1497_v22  ;;  %v843_v10 = vmul.f32 0.2, %v4344_v27  ;;  %v1350_v43 = vmul.f32 %v3685_v54, %v4739_v9 }
 0x1b8   : > { %v4869_v17 = vadd.f32 %v1155_v15, %v956_v32  ;;  %v1706_v36 = vadd.f32 %v1658_v52, %v4694_v3  ;;  %v1601_v32 = vadd.f32 %v4751_v61, %v4708_v49  ;;  %v1659_v22 = vmul.f32 %v3722_v34, %v4739_v9 }
 0x1b9   : > { %v4881_v62 = vsel %vm798_vm2, %v5905_v47, %v852_v20  ;;  %v4906_v61 = vsel %vm789_vm3, %v4344_v27, %v843_v10  ;;  %v1211_v10 = vadd.f32 %v1163_v26, %v4772_v21  ;;  %v1858_v20 = vmul.f32 %v3741_v60, %v4520_v50 }
 0x1ba   : > { %v4889_v15 = vadd.f32 %v1758_v44, %v1706_v36  ;;  %v4893_v3 = vmul.f32 %v3677_v51, %v4881_v62  ;;  %v4899_v1 = vmul.f32 %v3696_v11, %v4881_v62  ;;  %v4903_v49 = vmul.f32 %v3734_v56, %v4881_v62 }
 0x1bb   : > { %v1398_v44 = vadd.f32 %v1350_v43, %v1201_v23  ;;  %v4910_v52 = vmul.f32 %v3677_v51, %v4906_v61  ;;  %v1450_v36 = vmul.f32 %v3696_v11, %v4906_v61  ;;  %v1707_v55 = vadd.f32 %v1659_v22, %v1601_v32 }
 0x1bc   : > { %5906 = vst [vmem:[#allocation4_spill] sm:$0xff] %v4889_v15  ;;  %5907 = vst [vmem:[#allocation27_spill] sm:$0xff] %v4899_v1  ;;  %v1759_v31 = vmul.f32 %v3734_v56, %v4906_v61  ;;  %v1360_v43 = vmul.f32 %v3685_v54, %v4823_v25  ;;  %v1859_v22 = vmul.f32 %v3741_v60, %v4612_v14  ;;  %v5912_v14 = vrot.slane %v4881_v62, 1 }
 0x1bd   : > { %5908 = vst [vmem:[#allocation28_spill] sm:$0xff] %v4903_v49  ;;  %v5909_v49 = vld [vmem:[#allocation5_spill] sm:$0xff]  ;;  %v4920_v23 = vadd.f32 %v1450_v36, %v1398_v44  ;;  %v1964_v1 = vmul.f32 %v4497_v58, %v4530_v30  ;;  %vm790_vm13 = vcmp.gt.f32.partialorder %v4383_v35, 0.0 }
 0x1be   : > { %vm799_vm4 = vcmp.gt.f32.partialorder %v5909_v49, 0.0  ;;  %v853_v27 = vmul.f32 0.2, %v5909_v49  ;;  %v4927_v47 = vadd.f32 %v1759_v31, %v1707_v55  ;;  %v1408_v36 = vadd.f32 %v1360_v43, %v1211_v10  ;;  %v5916_v43 = vld [vmem:[#allocation6_spill] sm:$0xff] }
 0x1bf   : > { %v1906_v31 = vadd.f32 %v1858_v20, %v4560_v2  ;;  %v1907_v55 = vadd.f32 %v1859_v22, %v4596_v59  ;;  %v1965_v10 = vmul.f32 %v4497_v58, %v4627_v38  ;;  %vm800_vm7 = vcmp.gt.f32.partialorder %v5916_v43, 0.0 }
 0x1c0   : > { %5910 = vst [vmem:[#allocation5_spill] sm:$0xff] %v4927_v47  ;;  %v907_v32 = vsel %vm799_vm4, %v5909_v49, %v853_v27  ;;  %v5914_v49 = vrot.slane %v4881_v62, 2  ;;  %v1860_v38 = vmul.f32 %v3741_v60, %v4654_v6 }
 0x1c1   : > { %v4935_v44 = vmul.f32 %v3677_v51, %v907_v32  ;;  %v1050_v21 = vrot.slane %v907_v32, 1  ;;  %v1249_v26 = vrot.slane %v907_v32, 2  ;;  %v1460_v25 = vmul.f32 %v3696_v11, %v907_v32 }
 0x1c2   : > { %v4939_v50 = vmul.f32 %v3734_v56, %v907_v32  ;;  %v2012_v22 = vadd.f32 %v1964_v1, %v1906_v31  ;;  %v1908_v6 = vadd.f32 %v1860_v38, %v4643_v41 }
 0x1c3   : > { %v4947_v30 = vsel %vm1070_vm5, %v5912_v14, %v1050_v21  ;;  %v4953_v27 = vsel %vm1267_vm6, %v5914_v49, %v1249_v26  ;;  %v4960_v59 = vadd.f32 %v1460_v25, %v1408_v36  ;;  %v2013_v14 = vadd.f32 %v1965_v10, %v1907_v55 }
 0x1c4   : > { %5911 = vst [vmem:[#allocation29_spill] sm:$0xff] %v4939_v50  ;;  %5913 = vst [vmem:[#allocation30_spill] sm:$0xff] %v4947_v30  ;;  %v1165_v2 = vmul.f32 %v3681_v53, %v4947_v30  ;;  %v4964_v20 = vmul.f32 %v3719_v28, %v4947_v30  ;;  %v4968_v32 = vmul.f32 %v3722_v34, %v4953_v27  ;;  %v854_v49 = vmul.f32 0.2, %v5916_v43 }
 0x1c5   : > { %5915 = vst [vmem:[#allocation31_spill] sm:$0xff] %v4953_v27  ;;  %v1861_v50 = vmul.f32 %v3741_v60, %v4660_v7  ;;  %v1966_v25 = vmul.f32 %v4497_v58, %v4664_v45  ;;  %v1967_v36 = vmul.f32 %v4497_v58, %v4670_v24  ;;  %vm2060_vm9 = vcmp.gt.f32.partialorder %v2012_v22, 0.0 }
 0x1c6   : > { %5917 = vst [vmem:[#allocation6_spill] sm:$0xff] %v4964_v20  ;;  %5918 = vst [vmem:[#allocation32_spill] sm:$0xff] %v4968_v32  ;;  %v5919_v20 = vld [vmem:[#allocation8_spill] sm:$0xff]  ;;  %vm2061_vm10 = vcmp.gt.f32.partialorder %v2013_v14, 0.0  ;;  %v2108_v1 = vmul.f32 0.2, %v2012_v22  ;;  %v908_v55 = vsel %vm800_vm7, %v5916_v43, %v854_v49 }
 0x1c7   : > { %vm801_vm8 = vcmp.gt.f32.partialorder %v5919_v20, 0.0  ;;  %v2109_v31 = vmul.f32 0.2, %v2013_v14  ;;  %v1909_v7 = vadd.f32 %v1861_v50, %v4682_v5  ;;  %v855_v10 = vmul.f32 0.2, %v5919_v20 }
 0x1c8   : > { %v2156_v45 = vsel %vm2060_vm9, %v2012_v22, %v2108_v1  ;;  %v968_v58 = vmul.f32 %v3677_v51, %v908_v55  ;;  %v1066_v24 = vrot.slane %v908_v55, 1  ;;  %v1265_v47 = vrot.slane %v908_v55, 2 }
 0x1c9   : > { %v2157_v32 = vsel %vm2061_vm10, %v2013_v14, %v2109_v31  ;;  %v4988_v15 = vmul.f32 %v3696_v11, %v908_v55  ;;  %v4991_v12 = vmul.f32 %v3734_v56, %v908_v55  ;;  %v5923_v5 = vrot.slane %v4881_v62, 1 }
 0x1ca   : > { %v2194_v30 = vpack.c.bf16 %v2157_v32, %v2156_v45  ;;  %v4995_v41 = vsel %vm1070_vm5, %v1050_v21, %v1066_v24  ;;  %v2014_v43 = vadd.f32 %v1966_v25, %v1908_v6  ;;  %v2015_v22 = vadd.f32 %v1967_v36, %v1909_v7 }
 0x1cb   : > { %5920 = vst [vmem:[#allocation8_spill] sm:$0xff] %v4988_v15  ;;  %5921 = vst [vmem:[#allocation33_spill] sm:$0xff] %v4991_v12  ;;  %v5001_v50 = vsel %vm1070_vm5, %v1066_v24, %v5923_v5  ;;  %v1166_v32 = vmul.f32 %v3681_v53, %v4995_v41  ;;  %v5009_v49 = vsel %vm1267_vm6, %v1249_v26, %v1265_v47  ;;  %v5926_v21 = vrot.slane %v4881_v62, 2 }
 0x1cc   : > { %5922 = vst [vmem:[#allocation34_spill] sm:$0xff] %v4995_v41  ;;  %5924 = vst [vmem:[#allocation35_spill] sm:$0xff] %v5001_v50  ;;  %3357 = vmatprep.mubr.bf16.mxu1 %v2194_v30  ;;  %v1167_v14 = vmul.f32 %v3681_v53, %v5001_v50  ;;  %v1566_v25 = vmul.f32 %v3719_v28, %v4995_v41  ;;  %v5021_v30 = vmul.f32 %v3719_v28, %v5001_v50 }
 0x1cd   : > { %5925 = vst [vmem:[#allocation36_spill] sm:$0xff] %v5009_v49  ;;  %v5015_v38 = vsel %vm1267_vm6, %v1265_v47, %v5926_v21  ;;  %vm2062_vm11 = vcmp.gt.f32.partialorder %v2014_v43, 0.0  ;;  %vm2063_vm12 = vcmp.gt.f32.partialorder %v2015_v22, 0.0  ;;  %v2110_v62 = vmul.f32 0.2, %v2014_v43 }
 0x1ce   : > { %5927 = vst [vmem:[#allocation37_spill] sm:$0xff] %v5015_v38  ;;  %5928 = vst [vmem:[#allocation38_spill] sm:$0xff] %v5021_v30  ;;  %v5025_v36 = vmul.f32 %v3722_v34, %v5015_v38  ;;  %v5027_v26 = vadd.f32 %v1167_v14, %v968_v58  ;;  %v2111_v1 = vmul.f32 0.2, %v2015_v22  ;;  %v5032_v47 = vsel %vm801_vm8, %v5919_v20, %v855_v10 }
 0x1cf   : > { %v1213_v31 = vadd.f32 %v1165_v2, %v4893_v3  ;;  %v1362_v55 = vmul.f32 %v3685_v54, %v4953_v27  ;;  %v2158_v6 = vsel %vm2062_vm11, %v2014_v43, %v2110_v62  ;;  %v5040_v45 = vmul.f32 %v3677_v51, %v5032_v47 }
 0x1d0   : > { %5929 = vst [vmem:[#allocation39_spill] sm:$0xff] %v5025_v36  ;;  %v2159_v7 = vsel %vm2063_vm12, %v2015_v22, %v2111_v1  ;;  %v5834_v58 = vrot.slane %v5032_v47, 1  ;;  %v1462_v3 = vmul.f32 %v3696_v11, %v5032_v47  ;;  %v5048_v2 = vmul.f32 %v3734_v56, %v5032_v47  ;;  %v5931_v1 = vld [vmem:[#allocation11_spill] sm:$0xff] }
 0x1d1   : > { %v2195_v24 = vpack.c.bf16 %v2159_v7, %v2158_v6  ;;  %v1410_v20 = vadd.f32 %v1362_v55, %v1213_v31  ;;  %v844_v10 = vmul.f32 0.2, %v4383_v35  ;;  %v1202_v43 = vadd.f32 %v4850_v16, %v4721_v4 }
 0x1d2   : > { %5930 = vst [vmem:[#allocation40_spill] sm:$0xff] %v5048_v2  ;;  %v1351_v22 = vmul.f32 %v3685_v54, %v4846_v57  ;;  %v1602_v21 = vadd.f32 %v4862_v8, %v4747_v63  ;;  %v1660_v62 = vmul.f32 %v3722_v34, %v4846_v57  ;;  %vm802_vm14 = vcmp.gt.f32.partialorder %v5931_v1, 0.0 }
 0x1d3   : > { %3358 = vmatmul.mubr.bf16.gmra.mrb[48].mxu1 %v2195_v24  ;;  %v5055_v14 = vadd.f32 %v1462_v3, %v1410_v20  ;;  %v898_v31 = vsel %vm790_vm13, %v4383_v35, %v844_v10  ;;  %v856_v4 = vmul.f32 0.2, %v5931_v1  ;;  %v1214_v16 = vadd.f32 %v1166_v32, %v4935_v44 }
 0x1d4   : > { %v1399_v55 = vadd.f32 %v1351_v22, %v1202_v43  ;;  %v5068_v6 = vmul.f32 %v3677_v51, %v898_v31  ;;  %v1047_v7 = vrot.slane %v898_v31, 1  ;;  %v1246_v24 = vrot.slane %v898_v31, 2 }
 0x1d5   : > { %v1451_v63 = vmul.f32 %v3696_v11, %v898_v31  ;;  %v1708_v8 = vadd.f32 %v1660_v62, %v1602_v21  ;;  %v1760_v20 = vmul.f32 %v3734_v56, %v898_v31  ;;  %v910_v3 = vsel %vm802_vm14, %v5931_v1, %v856_v4 }
 0x1d6   : > { %v1363_v35 = vmul.f32 %v3685_v54, %v5009_v49  ;;  %v5932_v10 = vrot.slane %v4906_v61, 1  ;;  %v5933_v32 = vrot.slane %v4906_v61, 2  ;;  %v5090_v21 = vmul.f32 %v3677_v51, %v910_v3 }
 0x1d7   : > { %v5087_v22 = vadd.f32 %v1451_v63, %v1399_v55  ;;  %v5100_v31 = vadd.f32 %v1760_v20, %v1708_v8  ;;  %v1051_v4 = vrot.slane %v910_v3, 1  ;;  %v1614_v55 = vadd.f32 %v1566_v25, %v4960_v59  ;;  %v5936_v8 = vld [vmem:[#allocation16_spill] sm:$0xff] }
 0x1d8   : > { %v5079_v44 = vsel %vm1070_vm5, %v5932_v10, %v1047_v7  ;;  %v5085_v43 = vsel %vm1267_vm6, %v5933_v32, %v1246_v24  ;;  %v1250_v10 = vrot.slane %v910_v3, 2  ;;  %v1411_v5 = vadd.f32 %v1363_v35, %v1214_v16 }
 0x1d9   : > { %v5094_v62 = vmul.f32 %v3681_v53, %v5079_v44  ;;  %v5098_v1 = vmul.f32 %v3719_v28, %v5079_v44  ;;  %5934 = vst [vmem:[#allocation11_spill] sm:$0xff] %v5100_v31  ;;  %v1463_v32 = vmul.f32 %v3696_v11, %v910_v3  ;;  %v5108_v63 = vsel %vm1070_vm5, %v5834_v58, %v1051_v4 }
 0x1da   : > { %5935 = vst [vmem:[#allocation41_spill] sm:$0xff] %v5108_v63  ;;  %v1672_v36 = vmul.f32 %v3722_v34, %v5009_v49  ;;  %v1772_v30 = vmul.f32 %v3734_v56, %v910_v3  ;;  %vm791_vm15 = vcmp.gt.f32.partialorder %v5936_v8, 0.0  ;;  %v5937_v20 = vrot.slane %v5032_v47, 2  ;;  %v5939_v3 = vld [vmem:[#allocation12_spill] sm:$0xff] }
 0x1db   : > { %v5120_v59 = vadd.f32 %v1463_v32, %v1411_v5  ;;  %v845_v25 = vmul.f32 0.2, %v5936_v8  ;;  %v1352_v35 = vmul.f32 %v3685_v54, %v4858_v42  ;;  %v1661_v15 = vmul.f32 %v3722_v34, %v4858_v42  ;;  %v5940_v32 = vld [vmem:[#allocation13_spill] sm:$0xff] }
 0x1dc   : > { %v5118_v16 = vsel %vm1267_vm6, %v5937_v20, %v1250_v10  ;;  %v1720_v58 = vadd.f32 %v1672_v36, %v1614_v55  ;;  %vm803_vm0 = vcmp.gt.f32.partialorder %v5939_v3, 0.0  ;;  %v857_v2 = vmul.f32 0.2, %v5939_v3 }
 0x1dd   : > { %5938 = vst [vmem:[#allocation16_spill] sm:$0xff] %v5118_v16  ;;  %v899_v12 = vsel %vm791_vm15, %v5936_v8, %v845_v25  ;;  %v1400_v20 = vadd.f32 %v1352_v35, %v4869_v17  ;;  %v1364_v5 = vmul.f32 %v3685_v54, %v5015_v38  ;;  %vm804_vm1 = vcmp.gt.f32.partialorder %v5940_v32, 0.0 }
 0x1de   : > { %v5134_v50 = vadd.f32 %v1772_v30, %v1720_v58  ;;  %v959_v36 = vmul.f32 %v3677_v51, %v899_v12  ;;  %v1063_v55 = vrot.slane %v899_v12, 1  ;;  %v1262_v49 = vrot.slane %v899_v12, 2 }
 0x1df   : > { %v1452_v27 = vmul.f32 %v3696_v11, %v899_v12  ;;  %v1709_v41 = vadd.f32 %v1661_v15, %v4874_v19  ;;  %v1761_v31 = vmul.f32 %v3734_v56, %v899_v12  ;;  %v911_v8 = vsel %vm803_vm0, %v5939_v3, %v857_v2 }
 0x1e0   : > { %5941 = vst [vmem:[#allocation12_spill] sm:$0xff] %v5134_v50  ;;  %v5143_v17 = vsel %vm1070_vm5, %v1047_v7, %v1063_v55  ;;  %v5943_v25 = vrot.slane %v4906_v61, 1  ;;  %v5153_v58 = vsel %vm1267_vm6, %v1246_v24, %v1262_v49  ;;  %v5945_v19 = vrot.slane %v4906_v61, 2 }
 0x1e1   : > { %5942 = vst [vmem:[#allocation13_spill] sm:$0xff] %v5143_v17  ;;  %v5163_v15 = vmul.f32 %v3681_v53, %v5143_v17  ;;  %v1500_v7 = vadd.f32 %v1452_v27, %v1400_v20  ;;  %v5169_v35 = vmul.f32 %v3719_v28, %v5143_v17  ;;  %v5173_v61 = vadd.f32 %v1761_v31, %v1709_v41 }
 0x1e2   : > { %v5149_v30 = vsel %vm1070_vm5, %v1063_v55, %v5943_v25  ;;  %v5159_v12 = vsel %vm1267_vm6, %v1262_v49, %v5945_v19  ;;  %v971_v49 = vmul.f32 %v3677_v51, %v911_v8  ;;  %v1067_v3 = vrot.slane %v911_v8, 1 }
 0x1e3   : > { %5944 = vst [vmem:[#allocation42_spill] sm:$0xff] %v5149_v30  ;;  %v1158_v2 = vmul.f32 %v3681_v53, %v5149_v30  ;;  %v1558_v24 = vmul.f32 %v3719_v28, %v5149_v30  ;;  %5946 = vst [vmem:[#allocation43_spill] sm:$0xff] %v5173_v61  ;;  %v1266_v25 = vrot.slane %v911_v8, 2  ;;  %v1412_v19 = vadd.f32 %v1364_v5, %v5027_v26 }
 0x1e4   : > { %v1464_v50 = vmul.f32 %v3696_v11, %v911_v8  ;;  %v5184_v20 = vsel %vm1070_vm5, %v1051_v4, %v1067_v3  ;;  %v5947_v38 = vrot.slane %v5032_v47, 1  ;;  %v5193_v31 = vmul.f32 %v3734_v56, %v911_v8 }
 0x1e5   : > { %v5176_v55 = vadd.f32 %v1158_v2, %v959_v36  ;;  %v5180_v27 = vadd.f32 %v1558_v24, %v1500_v7  ;;  %v5199_v5 = vsel %vm1267_vm6, %v1250_v10, %v1266_v25  ;;  %v5949_v36 = vrot.slane %v5032_v47, 2 }
 0x1e6   : > { %v5190_v41 = vsel %vm1070_vm5, %v1067_v3, %v5947_v38  ;;  %5948 = vst [vmem:[#allocation44_spill] sm:$0xff] %v5193_v31  ;;  %v5207_v2 = vadd.f32 %v1464_v50, %v1412_v19  ;;  %v858_v38 = vmul.f32 0.2, %v5940_v32  ;;  %v1168_v8 = vmul.f32 %v3681_v53, %v5108_v63  ;;  %v5950_v3 = vld [vmem:[#allocation14_spill] sm:$0xff] }
 0x1e7   : > { %v1170_v26 = vmul.f32 %v3681_v53, %v5190_v41  ;;  %v5205_v4 = vsel %vm1267_vm6, %v1266_v25, %v5949_v36  ;;  %v1365_v7 = vmul.f32 %v3685_v54, %v5118_v16  ;;  %v1568_v10 = vmul.f32 %v3719_v28, %v5108_v63 }
 0x1e8   : > { %v1674_v47 = vmul.f32 %v3722_v34, %v5118_v16  ;;  %vm805_vm2 = vcmp.gt.f32.partialorder %v5950_v3, 0.0  ;;  %v859_v50 = vmul.f32 0.2, %v5950_v3  ;;  %v5223_v25 = vsel %vm804_vm1, %v5940_v32, %v858_v38 }
 0x1e9   : > { %v1218_v24 = vadd.f32 %v1170_v26, %v971_v49  ;;  %v1216_v19 = vadd.f32 %v1168_v8, %v5040_v45  ;;  %v1616_v36 = vadd.f32 %v1568_v10, %v5055_v14  ;;  %v1169_v31 = vmul.f32 %v3681_v53, %v5184_v20 }
 0x1ea   : > { %v1465_v49 = vmul.f32 %v3696_v11, %v5223_v25  ;;  %v1516_v26 = vrot.slane %v5223_v25, 1  ;;  %v1622_v16 = vrot.slane %v5223_v25, 2  ;;  %v1774_v63 = vmul.f32 %v3734_v56, %v5223_v25 }
 0x1eb   : > { %v1413_v61 = vadd.f32 %v1365_v7, %v1216_v19  ;;  %v1722_v32 = vadd.f32 %v1674_v47, %v1616_v36  ;;  %v913_v38 = vsel %vm805_vm2, %v5950_v3, %v859_v50  ;;  %v1217_v45 = vadd.f32 %v1169_v31, %v5090_v21  ;;  %v5954_v19 = vld [vmem:[#allocation17_spill] sm:$0xff] }
 0x1ec   : > { %v1366_v14 = vmul.f32 %v3685_v54, %v5199_v5  ;;  %v1466_v8 = vmul.f32 %v3696_v11, %v913_v38  ;;  %v1517_v10 = vrot.slane %v913_v38, 1  ;;  %v1569_v30 = vmul.f32 %v3719_v28, %v5184_v20 }
 0x1ed   : > { %v5242_v17 = vadd.f32 %v1465_v49, %v1413_v61  ;;  %v5244_v42 = vadd.f32 %v1774_v63, %v1722_v32  ;;  %v1623_v25 = vrot.slane %v913_v38, 2  ;;  %v1675_v7 = vmul.f32 %v3722_v34, %v5199_v5 }
 0x1ee   : > { %v1414_v47 = vadd.f32 %v1366_v14, %v1217_v45  ;;  %v1520_v21 = vsel %vm1070_vm5, %v1516_v26, %v1517_v10  ;;  %v1617_v31 = vadd.f32 %v1569_v30, %v5120_v59  ;;  %v1775_v3 = vmul.f32 %v3734_v56, %v913_v38  ;;  %v5955_v14 = vld [vmem:[#allocation15_spill] sm:$0xff] }
 0x1ef   : > { %5951 = vst [vmem:[#allocation14_spill] sm:$0xff] %v5244_v42  ;;  %v1571_v50 = vmul.f32 %v3719_v28, %v1520_v21  ;;  %v5255_v61 = vsel %vm1267_vm6, %v1622_v16, %v1623_v25  ;;  %v5258_v63 = vmul.f32 %v3741_v60, %v1520_v21  ;;  %vm792_vm3 = vcmp.gt.f32.partialorder %v5954_v19, 0.0 }
 0x1f0   : > { %5952 = vst [vmem:[#allocation45_spill] sm:$0xff] %v5255_v61  ;;  %v5261_v36 = vadd.f32 %v1466_v8, %v1414_v47  ;;  %v1723_v49 = vadd.f32 %v1675_v7, %v1617_v31  ;;  %v846_v32 = vmul.f32 0.2, %v5954_v19  ;;  %v1204_v59 = vadd.f32 %v5094_v62, %v4910_v52 }
 0x1f1   : > { %5953 = vst [vmem:[#allocation46_spill] sm:$0xff] %v5258_v63  ;;  %v1353_v30 = vmul.f32 %v3685_v54, %v5085_v43  ;;  %v1604_v38 = vadd.f32 %v5098_v1, %v4920_v23  ;;  %v1662_v45 = vmul.f32 %v3722_v34, %v5085_v43  ;;  %vm806_vm4 = vcmp.gt.f32.partialorder %v5955_v14, 0.0 }
 0x1f2   : > { %v5273_v21 = vadd.f32 %v1775_v3, %v1723_v49  ;;  %v5276_v8 = vsel %vm792_vm3, %v5954_v19, %v846_v32  ;;  %v860_v7 = vmul.f32 0.2, %v5955_v14  ;;  %v1367_v52 = vmul.f32 %v3685_v54, %v5205_v4 }
 0x1f3   : > { %v5283_v62 = vmul.f32 %v3677_v51, %v5276_v8  ;;  %v1401_v47 = vadd.f32 %v1353_v30, %v1204_v59  ;;  %v1453_v31 = vmul.f32 %v3696_v11, %v5276_v8  ;;  %v1710_v3 = vadd.f32 %v1662_v45, %v1604_v38 }
 0x1f4   : > { %5956 = vst [vmem:[#allocation17_spill] sm:$0xff] %v5273_v21  ;;  %v1762_v19 = vmul.f32 %v3734_v56, %v5276_v8  ;;  %v914_v49 = vsel %vm806_vm4, %v5955_v14, %v860_v7  ;;  %v1415_v32 = vadd.f32 %v1367_v52, %v1218_v24  ;;  %v1570_v42 = vmul.f32 %v3719_v28, %v5190_v41 }
 0x1f5   : > { %v1467_v21 = vmul.f32 %v3696_v11, %v914_v49  ;;  %v1518_v63 = vrot.slane %v914_v49, 1  ;;  %v5295_v23 = vadd.f32 %v1453_v31, %v1401_v47  ;;  %v1624_v59 = vrot.slane %v914_v49, 2 }
 0x1f6   : > { %v5297_v1 = vadd.f32 %v1762_v19, %v1710_v3  ;;  %v1676_v30 = vmul.f32 %v3722_v34, %v5205_v4  ;;  %v1618_v14 = vadd.f32 %v1570_v42, %v5207_v2  ;;  %v1354_v19 = vmul.f32 %v3685_v54, %v5153_v58 }
 0x1f7   : > { %v1515_v38 = vadd.f32 %v1467_v21, %v1415_v32  ;;  %v1519_v45 = vsel %vm1070_vm5, %v1517_v10, %v1518_v63  ;;  %v1521_v24 = vsel %vm1070_vm5, %v1518_v63, %v1516_v26  ;;  %v5310_v47 = vsel %vm1267_vm6, %v1623_v25, %v1624_v59  ;;  %v5960_v26 = vld [vmem:[#allocation19_spill] sm:$0xff] }
 0x1f8   : > { %v1572_v7 = vmul.f32 %v3719_v28, %v1519_v45  ;;  %v1573_v52 = vmul.f32 %v3719_v28, %v1521_v24  ;;  %5957 = vst [vmem:[#allocation15_spill] sm:$0xff] %v5310_v47  ;;  %v5314_v31 = vsel %vm1267_vm6, %v1624_v59, %v1622_v16  ;;  %v1724_v21 = vadd.f32 %v1676_v30, %v1618_v14  ;;  %v5962_v30 = vld [vmem:[#allocation18_spill] sm:$0xff] }
 0x1f9   : > { %5958 = vst [vmem:[#allocation47_spill] sm:$0xff] %v5314_v31  ;;  %v1776_v10 = vmul.f32 %v3734_v56, %v914_v49  ;;  %v5318_v3 = vmul.f32 %v3741_v60, %v1519_v45  ;;  %v5321_v42 = vmul.f32 %v3741_v60, %v1521_v24  ;;  %vm793_vm7 = vcmp.gt.f32.partialorder %v5960_v26, 0.0 }
 0x1fa   : > { %v5323_v2 = vadd.f32 %v1573_v52, %v1515_v38  ;;  %v847_v25 = vmul.f32 0.2, %v5960_v26  ;;  %v1205_v63 = vadd.f32 %v5163_v15, %v5068_v6  ;;  %v1605_v49 = vadd.f32 %v5169_v35, %v5087_v22 }
 0x1fb   : > { %5959 = vst [vmem:[#allocation48_spill] sm:$0xff] %v5321_v42  ;;  %v5329_v16 = vadd.f32 %v1776_v10, %v1724_v21  ;;  %v1663_v32 = vmul.f32 %v3722_v34, %v5153_v58  ;;  %vm807_vm8 = vcmp.gt.f32.partialorder %v5962_v30, 0.0  ;;  %v861_v38 = vmul.f32 0.2, %v5962_v30 }
 0x1fc   : > { %v5338_v59 = vsel %vm793_vm7, %v5960_v26, %v847_v25  ;;  %v1619_v6 = vadd.f32 %v1571_v50, %v5242_v17  ;;  %v1402_v35 = vadd.f32 %v1354_v19, %v1205_v63  ;;  %v5963_v17 = vrot.slane %v5276_v8, 1 }
 0x1fd   : > { %5961 = vst [vmem:[#allocation19_spill] sm:$0xff] %v5329_v16  ;;  %v5345_v15 = vmul.f32 %v3677_v51, %v5338_v59  ;;  %v1048_v45 = vrot.slane %v5338_v59, 1  ;;  %v5845_v22 = vrot.slane %v5338_v59, 2  ;;  %v1454_v24 = vmul.f32 %v3696_v11, %v5338_v59  ;;  %v5981_v16 = vld [vmem:[#allocation26_spill] sm:$0xff] }
 0x1fe   : > { %v1711_v14 = vadd.f32 %v1663_v32, %v1605_v49  ;;  %v1763_v52 = vmul.f32 %v3734_v56, %v5338_v59  ;;  %v5354_v21 = vsel %vm807_vm8, %v5962_v30, %v861_v38  ;;  %v5964_v10 = vrot.slane %v5276_v8, 2 }
 0x1ff   : > { %v5360_v50 = vsel %vm1070_vm5, %v5963_v17, %v1048_v45  ;;  %v1677_v25 = vmul.f32 %v3722_v34, %v5255_v61  ;;  %v1777_v63 = vmul.f32 %v3734_v56, %v5354_v21  ;;  %v5378_v49 = vadd.f32 %v1454_v24, %v1402_v35  ;;  %v5395_v35 = vld [vmem:[%s5801_s2 + $0x8] ss:$0 sm:$0xff]  ;;  %v5982_v61 = vld [vmem:[#allocation10_spill] sm:$0xff] }
 0x200   : > { %v5368_v26 = vsel %vm1267_vm6, %v5964_v10, %v5845_v22  ;;  %v5376_v19 = vmul.f32 %v3681_v53, %v5360_v50  ;;  %v5382_v32 = vmul.f32 %v3719_v28, %v5360_v50  ;;  %v5384_v30 = vadd.f32 %v1763_v52, %v1711_v14 }
 0x201   : > { %v1725_v38 = vadd.f32 %v1677_v25, %v1619_v6  ;;  %v1862_v22 = vmul.f32 %v3741_v60, %v4733_v48  ;;  %v1863_v42 = vmul.f32 %v3741_v60, %v4836_v18  ;;  %v1968_v24 = vmul.f32 %v5395_v35, %v4739_v9 }
 0x202   : > { %v1969_v6 = vmul.f32 %v5395_v35, %v4846_v57  ;;  %vm808_vm9 = vcmp.gt.f32.partialorder %v4567_v29, 0.0  ;;  %v862_v52 = vmul.f32 0.2, %v4567_v29  ;;  %v1620_v18 = vadd.f32 %v1572_v7, %v5261_v36 }
 0x203   : > { %v5402_v14 = vadd.f32 %v1777_v63, %v1725_v38  ;;  %v1910_v48 = vadd.f32 %v1862_v22, %v4717_v37  ;;  %v1911_v25 = vadd.f32 %v1863_v42, %v4753_v13  ;;  %v1678_v10 = vmul.f32 %v3722_v34, %v5310_v47 }
 0x204   : > { %vm794_vm10 = vcmp.gt.f32.partialorder %v4569_v46, 0.0  ;;  %v848_v9 = vmul.f32 0.2, %v4569_v46  ;;  %v5413_v17 = vsel %vm808_vm9, %v4567_v29, %v862_v52  ;;  %v1355_v37 = vmul.f32 %v3685_v54, %v5159_v12 }
 0x205   : > { %5965 = vst [vmem:[#allocation18_spill] sm:$0xff] %v5402_v14  ;;  %v2016_v57 = vadd.f32 %v1968_v24, %v1910_v48  ;;  %v1664_v22 = vmul.f32 %v3722_v34, %v5159_v12  ;;  %v2017_v36 = vadd.f32 %v1969_v6, %v1911_v25  ;;  %v1726_v7 = vadd.f32 %v1678_v10, %v1620_v18 }
 0x206   : > { %v1778_v13 = vmul.f32 %v3734_v56, %v5413_v17  ;;  %v5846_v42 = vrot.slane %v5413_v17, 1  ;;  %v5848_v38 = vrot.slane %v5413_v17, 2  ;;  %v5424_v29 = vsel %vm794_vm10, %v4569_v46, %v848_v9 }
 0x207   : > { %vm2064_vm11 = vcmp.gt.f32.partialorder %v2016_v57, 0.0  ;;  %v2112_v63 = vmul.f32 0.2, %v2016_v57  ;;  %vm2065_vm12 = vcmp.gt.f32.partialorder %v2017_v36, 0.0  ;;  %v2113_v24 = vmul.f32 0.2, %v2017_v36 }
 0x208   : > { %v5426_v48 = vadd.f32 %v1778_v13, %v1726_v7  ;;  %v5967_v10 = vrot.slane %v5354_v21, 1  ;;  %v5969_v46 = vrot.slane %v5354_v21, 2  ;;  %v962_v9 = vmul.f32 %v3677_v51, %v5424_v29 }
 0x209   : > { %v2160_v52 = vsel %vm2064_vm11, %v2016_v57, %v2112_v63  ;;  %v2161_v7 = vsel %vm2065_vm12, %v2017_v36, %v2113_v24  ;;  %v5847_v57 = vrot.slane %v5424_v29, 2  ;;  %v5971_v36 = vrot.slane %v5276_v8, 1 }
 0x20a   : > { %5966 = vst [vmem:[#allocation49_spill] sm:$0xff] %v5426_v48  ;;  %v1832_v6 = vsel %vm1070_vm5, %v5967_v10, %v5846_v42  ;;  %v1938_v25 = vsel %vm1267_vm6, %v5969_v46, %v5848_v38  ;;  %v1064_v10 = vrot.slane %v5424_v29, 1  ;;  %v2196_v63 = vpack.c.bf16 %v2161_v7, %v2160_v52 }
 0x20b   : > { %v5435_v18 = vmul.f32 %v3741_v60, %v1832_v6  ;;  %v5446_v13 = vmul.f32 %v5395_v35, %v1938_v25  ;;  %v1403_v6 = vadd.f32 %v1355_v37, %v5176_v55  ;;  %v1455_v42 = vmul.f32 %v3696_v11, %v5424_v29 }
 0x20c   : > { %v1712_v48 = vadd.f32 %v1664_v22, %v5180_v27  ;;  %v5456_v46 = vsel %vm1070_vm5, %v1048_v45, %v1064_v10  ;;  %v5462_v24 = vsel %vm1070_vm5, %v1064_v10, %v5971_v36  ;;  %v5972_v25 = vrot.slane %v5276_v8, 2  ;;  %3361 = vmatprep.mubr.bf16.mxu1 %v2196_v63 }
 0x20d   : > { %5968 = vst [vmem:[#allocation50_spill] sm:$0xff] %v5435_v18  ;;  %5970 = vst [vmem:[#allocation51_spill] sm:$0xff] %v5446_v13  ;;  %v1764_v27 = vmul.f32 %v3734_v56, %v5424_v29  ;;  %v1160_v45 = vmul.f32 %v3681_v53, %v5456_v46  ;;  %v1161_v37 = vmul.f32 %v3681_v53, %v5462_v24  ;;  %vm795_vm13 = vcmp.gt.f32.partialorder %v4602_v40, 0.0  ;;  %v5979_v13 = vld [vmem:[#allocation4_spill] sm:$0xff] }
 0x20e   : > { %v5470_v55 = vsel %vm1267_vm6, %v5847_v57, %v5972_v25  ;;  %v1503_v8 = vadd.f32 %v1455_v42, %v1403_v6  ;;  %v5482_v52 = vmul.f32 %v3719_v28, %v5456_v46  ;;  %v1561_v7 = vmul.f32 %v3719_v28, %v5462_v24 }
 0x20f   : > { %v1358_v22 = vmul.f32 %v3685_v54, %v5470_v55  ;;  %v5488_v10 = vmul.f32 %v3722_v34, %v5470_v55  ;;  %v5490_v63 = vadd.f32 %v1764_v27, %v1712_v48  ;;  %v5493_v36 = vadd.f32 %v1160_v45, %v5345_v15 }
 0x210   : > { %v1209_v25 = vadd.f32 %v1161_v37, %v962_v9  ;;  %v849_v42 = vmul.f32 0.2, %v4602_v40  ;;  %v5497_v6 = vadd.f32 %v1561_v7, %v1503_v8  ;;  %v1207_v57 = vadd.f32 %v5376_v19, %v5283_v62  ;;  %v5973_v7 = vld [vmem:[#allocation7_spill] sm:$0xff] }
 0x211   : > { %v1356_v38 = vmul.f32 %v3685_v54, %v5368_v26  ;;  %v1607_v48 = vadd.f32 %v5382_v32, %v5295_v23  ;;  %v1665_v9 = vmul.f32 %v3722_v34, %v5368_v26  ;;  %v1864_v45 = vmul.f32 %v3741_v60, %v4842_v0 }
 0x212   : > { %v1406_v27 = vadd.f32 %v1358_v22, %v1209_v25  ;;  %v5506_v15 = vsel %vm795_vm13, %v4602_v40, %v849_v42  ;;  %v5974_v0 = vrot.slane %v5973_v7, 1  ;;  %v5975_v25 = vld [vmem:[#allocation3_spill] sm:$0xff]  ;;  %v1971_v47 = vmul.f32 %v5395_v35, %v5085_v43 }
 0x213   : > { %v963_v37 = vmul.f32 %v3677_v51, %v5506_v15  ;;  %v1033_v62 = vrot.slane %v5506_v15, 1  ;;  %v5849_v19 = vrot.slane %v5506_v15, 2  ;;  %v1404_v8 = vadd.f32 %v1356_v38, %v1207_v57 }
 0x214   : > { %v5517_v23 = vadd.f32 %v4800_v33, %v1406_v27  ;;  %v1456_v40 = vmul.f32 %v3696_v11, %v5506_v15  ;;  %v1713_v32 = vadd.f32 %v1665_v9, %v1607_v48  ;;  %v1765_v22 = vmul.f32 %v3734_v56, %v5506_v15 }
 0x215   : > { %v5527_v51 = vsel %vm1070_vm5, %v1033_v62, %v5974_v0  ;;  %v5976_v42 = vrot.slane %v5975_v25, 1  ;;  %v5977_v33 = vrot.slane %v5973_v7, 2  ;;  %v1865_v57 = vmul.f32 %v3741_v60, %v5079_v44 }
 0x216   : > { %v1162_v48 = vmul.f32 %v3681_v53, %v5527_v51  ;;  %v1562_v7 = vmul.f32 %v3719_v28, %v5527_v51  ;;  %v1912_v18 = vadd.f32 %v1864_v45, %v5979_v13  ;;  %vm809_vm14 = vcmp.gt.f32.partialorder %v5982_v61, 0.0  ;;  %v5984_v45 = vld [vmem:[#allocation13_spill] sm:$0xff] }
 0x217   : > { %v5533_v38 = vsel %vm1070_vm5, %v5976_v42, %v1033_v62  ;;  %v5541_v11 = vsel %vm1267_vm6, %v5849_v19, %v5977_v33  ;;  %v1504_v62 = vadd.f32 %v1456_v40, %v1404_v8  ;;  %v5561_v42 = vadd.f32 %v1765_v22, %v1713_v32  ;;  %v5978_v19 = vld [vmem:[#allocation20_spill] sm:$0xff]  ;;  %v5980_v8 = vld [vmem:[#allocation5_spill] sm:$0xff]  ;;  %v5575_v32 = vpop.f32.mrb[28].mxu1 }
 0x218   : > { %v1164_v27 = vmul.f32 %v3681_v53, %v5533_v38  ;;  %v1359_v9 = vmul.f32 %v3685_v54, %v5541_v11  ;;  %v5555_v0 = vmul.f32 %v3719_v28, %v5533_v38  ;;  %v5559_v44 = vmul.f32 %v3722_v34, %v5541_v11  ;;  %5983 = vst [vmem:[#allocation7_spill] sm:$0xff] %v5575_v32 }
 0x219   : > { %v1210_v33 = vadd.f32 %v1162_v48, %v963_v37  ;;  %v1913_v40 = vadd.f32 %v1865_v57, %v5980_v8  ;;  %v5568_v14 = vadd.f32 %v1562_v7, %v1504_v62  ;;  %v1970_v28 = vmul.f32 %v5395_v35, %v5981_v16  ;;  %v5582_v57 = vpop.f32.mrb[29].mxu1 }
 0x21a   : > { %v5564_v53 = vadd.f32 %v1164_v27, %v5978_v19  ;;  %v863_v19 = vmul.f32 0.2, %v5982_v61  ;;  %v1679_v13 = vmul.f32 %v3722_v34, %v5314_v31  ;;  %v1866_v22 = vmul.f32 %v3741_v60, %v5984_v45  ;;  %5985 = vst [vmem:[#allocation3_spill] sm:$0xff] %v5582_v57  ;;  %v5986_v27 = vld [vmem:[#allocation42_spill] sm:$0xff]  ;;  %v5588_v7 = vpop.f32.mrb[30].mxu1  ;;  %v5989_v45 = vld [vmem:[#allocation11_spill] sm:$0xff] }
 0x21b   : > { %v1407_v37 = vadd.f32 %v1359_v9, %v1210_v33  ;;  %v2018_v48 = vadd.f32 %v1970_v28, %v1912_v18  ;;  %v2019_v16 = vadd.f32 %v1971_v47, %v1913_v40  ;;  %v1867_v43 = vmul.f32 %v3741_v60, %v5986_v27  ;;  %5987 = vst [vmem:[#allocation20_spill] sm:$0xff] %v5588_v7  ;;  %v5988_v9 = vld [vmem:[#allocation27_spill] sm:$0xff]  ;;  %v5596_v57 = vpop.f32.mrb[31].mxu1 }
 0x21c   : > { %v1972_v62 = vmul.f32 %v5395_v35, %v5153_v58  ;;  %v917_v8 = vsel %vm809_vm14, %v5982_v61, %v863_v19  ;;  %v1727_v32 = vadd.f32 %v1679_v13, %v5323_v2  ;;  %v1914_v31 = vadd.f32 %v1866_v22, %v5989_v45  ;;  %5990 = vst [vmem:[#allocation4_spill] sm:$0xff] %v5596_v57  ;;  %v5991_v27 = vld [vmem:[#allocation43_spill] sm:$0xff] }
 0x21d   : > { %v5591_v33 = vadd.f32 %v5988_v9, %v1407_v37  ;;  %vm2066_vm15 = vcmp.gt.f32.partialorder %v2018_v48, 0.0  ;;  %vm2067_vm0 = vcmp.gt.f32.partialorder %v2019_v16, 0.0  ;;  %v2114_v47 = vmul.f32 0.2, %v2018_v48 }
 0x21e   : > { %v2115_v18 = vmul.f32 0.2, %v2019_v16  ;;  %v1779_v40 = vmul.f32 %v3734_v56, %v917_v8  ;;  %v1830_v58 = vrot.slane %v917_v8, 1  ;;  %v1936_v28 = vrot.slane %v917_v8, 2 }
 0x21f   : > { %v1915_v7 = vadd.f32 %v1867_v43, %v5991_v27  ;;  %v2162_v37 = vsel %vm2066_vm15, %v2018_v48, %v2114_v47  ;;  %v1973_v61 = vmul.f32 %v5395_v35, %v5159_v12  ;;  %v2020_v2 = vadd.f32 %v1972_v62, %v1914_v31 }
 0x220   : > { %v2163_v9 = vsel %vm2067_vm0, %v2019_v16, %v2115_v18  ;;  %v1827_v13 = vadd.f32 %v1779_v40, %v1727_v32  ;;  %v5992_v22 = vrot.slane %v5413_v17, 1  ;;  %v5993_v57 = vrot.slane %v5354_v21, 1 }
 0x221   : > { %v2197_v19 = vpack.c.bf16 %v2163_v9, %v2162_v37  ;;  %v5994_v12 = vrot.slane %v5413_v17, 2  ;;  %v5995_v32 = vrot.slane %v5354_v21, 2  ;;  %v2021_v8 = vadd.f32 %v1973_v61, %v1915_v7 }
 0x222   : > { %v1831_v45 = vsel %vm1070_vm5, %v5992_v22, %v1830_v58  ;;  %v1833_v56 = vsel %vm1070_vm5, %v1830_v58, %v5993_v57  ;;  %vm2068_vm5 = vcmp.gt.f32.partialorder %v2020_v2, 0.0  ;;  %v2116_v17 = vmul.f32 0.2, %v2020_v2 }
 0x223   : > { %v5611_v43 = vmul.f32 %v3741_v60, %v1831_v45  ;;  %v1885_v48 = vmul.f32 %v3741_v60, %v1833_v56  ;;  %v1937_v31 = vsel %vm1267_vm6, %v5994_v12, %v1936_v28  ;;  %v1939_v16 = vsel %vm1267_vm6, %v1936_v28, %v5995_v32  ;;  %3362 = vmatmul.mubr.bf16.gmra.mrb[52].mxu1 %v2197_v19 }
 0x224   : > { %v5623_v62 = vmul.f32 %v5395_v35, %v1937_v31  ;;  %v5626_v57 = vmul.f32 %v5395_v35, %v1939_v16  ;;  %v5996_v18 = vrot.slane %v5424_v29, 2  ;;  %v5997_v40 = vrot.slane %v5338_v59, 2 }
 0x225   : > { %v5628_v47 = vadd.f32 %v1885_v48, %v1827_v13  ;;  %v1868_v58 = vmul.f32 %v3741_v60, %v5360_v50  ;;  %vm2069_vm1 = vcmp.gt.f32.partialorder %v2021_v8, 0.0  ;;  %v2117_v28 = vmul.f32 0.2, %v2021_v8 }
 0x226   : > { %v1280_v21 = vsel %vm1267_vm6, %v5997_v40, %v5996_v18  ;;  %v2164_v37 = vsel %vm2068_vm5, %v2020_v2, %v2116_v17  ;;  %v1869_v9 = vmul.f32 %v3741_v60, %v5456_v46  ;;  %v1974_v59 = vmul.f32 %v5395_v35, %v5368_v26 }
 0x227   : > { %v1357_v27 = vmul.f32 %v3685_v54, %v1280_v21  ;;  %v1666_v7 = vmul.f32 %v3722_v34, %v1280_v21  ;;  %v1916_v29 = vadd.f32 %v1868_v58, %v5297_v1  ;;  %v2165_v61 = vsel %vm2069_vm1, %v2021_v8, %v2117_v28  ;;  %v6002_v28 = vld [vmem:[#allocation21_spill] sm:$0xff] }
 0x228   : > { %v1975_v50 = vmul.f32 %v5395_v35, %v1280_v21  ;;  %v1870_v13 = vmul.f32 %v3741_v60, %v5462_v24  ;;  %v2198_v22 = vpack.c.bf16 %v2165_v61, %v2164_v37  ;;  %v1917_v45 = vadd.f32 %v1869_v9, %v5384_v30 }
 0x229   : > { %v1405_v19 = vadd.f32 %v1357_v27, %v5493_v36  ;;  %v2022_v2 = vadd.f32 %v1974_v59, %v1916_v29  ;;  %v1871_v46 = vmul.f32 %v3741_v60, %v5527_v51  ;;  %v1976_v26 = vmul.f32 %v5395_v35, %v5470_v55 }
 0x22a   : > { %v1918_v1 = vadd.f32 %v1870_v13, %v5490_v63  ;;  %v1977_v36 = vmul.f32 %v5395_v35, %v5541_v11  ;;  %v5998_v56 = vrot.slane %v5506_v15, 2  ;;  %v5999_v48 = vrot.slane %v5975_v25, 2  ;;  %3365 = vmatprep.mubr.bf16.mxu1 %v2198_v22  ;;  %v6005_v13 = vld [vmem:[#allocation30_spill] sm:$0xff] }
 0x22b   : > { %v2023_v30 = vadd.f32 %v1975_v50, %v1917_v45  ;;  %vm2070_vm2 = vcmp.gt.f32.partialorder %v2022_v2, 0.0  ;;  %v2118_v12 = vmul.f32 0.2, %v2022_v2  ;;  %v1919_v51 = vadd.f32 %v1871_v46, %v5561_v42  ;;  %v6006_v45 = vld [vmem:[#allocation34_spill] sm:$0xff]  ;;  %v6007_v46 = vld [vmem:[#allocation24_spill] sm:$0xff] }
 0x22c   : > { %v1313_v24 = vsel %vm1267_vm6, %v5999_v48, %v5998_v56  ;;  %v2024_v63 = vadd.f32 %v1976_v26, %v1918_v1  ;;  %v1608_v55 = vadd.f32 %v5482_v52, %v5378_v49  ;;  %v6000_v49 = vld [vmem:[#allocation2_spill] sm:$0xff]  ;;  %v1716_v50 = vadd.f32 %v5559_v44, %v5568_v14  ;;  %v6008_v26 = vld [vmem:[#allocation31_spill] sm:$0xff]  ;;  %v6009_v56 = vld [vmem:[#allocation36_spill] sm:$0xff] }
 0x22d   : > { %v1361_v31 = vmul.f32 %v3685_v54, %v1313_v24  ;;  %v1670_v11 = vmul.f32 %v3722_v34, %v1313_v24  ;;  %vm2071_vm3 = vcmp.gt.f32.partialorder %v2023_v30, 0.0  ;;  %v2119_v15 = vmul.f32 0.2, %v2023_v30  ;;  %v6001_v34 = vld [vmem:[#allocation22_spill] sm:$0xff] }
 0x22e   : > { %v2166_v25 = vsel %vm2070_vm2, %v2022_v2, %v2118_v12  ;;  %v2025_v32 = vadd.f32 %v1977_v36, %v1919_v51  ;;  %vm2072_vm4 = vcmp.gt.f32.partialorder %v2024_v63, 0.0  ;;  %v2120_v39 = vmul.f32 0.2, %v2024_v63  ;;  %v6011_v44 = vld [vmem:[#allocation6_spill] sm:$0xff] }
 0x22f   : > { %v1409_v16 = vadd.f32 %v1361_v31, %v5564_v53  ;;  %v1714_v8 = vadd.f32 %v1666_v7, %v1608_v55  ;;  %v2167_v17 = vsel %vm2071_vm3, %v2023_v30, %v2119_v15  ;;  %v1715_v54 = vadd.f32 %v5488_v10, %v5497_v6  ;;  %v6003_v7 = vld [vmem:[#allocation23_spill] sm:$0xff]  ;;  %v6004_v6 = vld [vmem:[#allocation9_spill] sm:$0xff] }
 0x230   : > { %vm2073_vm6 = vcmp.gt.f32.partialorder %v2025_v32, 0.0  ;;  %v2121_v42 = vmul.f32 0.2, %v2025_v32  ;;  %v2199_v18 = vpack.c.bf16 %v2167_v17, %v2166_v25  ;;  %v2168_v40 = vsel %vm2072_vm4, %v2024_v63, %v2120_v39  ;;  %v6012_v63 = vld [vmem:[#allocation25_spill] sm:$0xff]  ;;  %v6013_v55 = vld [vmem:[#allocation35_spill] sm:$0xff] }
 0x231   : > { %v1814_v52 = vadd.f32 %v6000_v49, %v1714_v8  ;;  %v1872_v21 = vmul.f32 %v3741_v60, %v6001_v34  ;;  %v1815_v27 = vadd.f32 %v6002_v28, %v1715_v54  ;;  %v1873_v53 = vmul.f32 %v3741_v60, %v5533_v38  ;;  %v5700_v8 = vpop.f32.mrb[32].mxu1  ;;  %v6017_v34 = vld [vmem:[#allocation33_spill] sm:$0xff] }
 0x232   : > { %v2169_v58 = vsel %vm2073_vm6, %v2025_v32, %v2121_v42  ;;  %v1978_v37 = vmul.f32 %v5395_v35, %v6003_v7  ;;  %3366 = vmatmul.mubr.bf16.gmra.mrb[56].mxu1 %v2199_v18  ;;  %v1979_v10 = vmul.f32 %v5395_v35, %v1313_v24  ;;  %v1505_v59 = vadd.f32 %v6004_v6, %v1405_v19  ;;  %v6010_v24 = vld [vmem:[#allocation28_spill] sm:$0xff]  ;;  %v6014_v42 = vld [vmem:[#allocation29_spill] sm:$0xff] }
 0x233   : > { %v2200_v9 = vpack.c.bf16 %v2169_v58, %v2168_v40  ;;  %v1920_v29 = vadd.f32 %v1872_v21, %v1814_v52  ;;  %v1921_v61 = vadd.f32 %v1873_v53, %v1815_v27  ;;  %v1874_v22 = vmul.f32 %v3741_v60, %v6005_v13  ;;  %v6016_v18 = vld [vmem:[#allocation41_spill] sm:$0xff]  ;;  %v5706_v40 = vpop.f32.mrb[33].mxu1  ;;  %v6019_v7 = vld [vmem:[#allocation40_spill] sm:$0xff] }
 0x234   : > { %v1875_v38 = vmul.f32 %v3741_v60, %v6006_v45  ;;  %v1611_v1 = vadd.f32 %v6007_v46, %v1505_v59  ;;  %v1980_v36 = vmul.f32 %v5395_v35, %v6008_v26  ;;  %v1981_v19 = vmul.f32 %v5395_v35, %v6009_v56  ;;  %v6018_v58 = vld [vmem:[#allocation37_spill] sm:$0xff] }
 0x235   : > { %3369 = vmatprep.mubr.bf16.mxu1 %v2200_v9  ;;  %v2026_v2 = vadd.f32 %v1978_v37, %v1920_v29  ;;  %v2027_v48 = vadd.f32 %v1979_v10, %v1921_v61  ;;  %v1816_v30 = vadd.f32 %v6010_v24, %v1716_v50  ;;  %v1612_v14 = vadd.f32 %v5555_v0, %v5517_v23  ;;  %v6015_v23 = vld [vmem:[#allocation32_spill] sm:$0xff] }
 0x236   : > { %v1613_v12 = vadd.f32 %v6011_v44, %v5591_v33  ;;  %v1717_v31 = vadd.f32 %v6012_v63, %v1611_v1  ;;  %v1876_v15 = vmul.f32 %v3741_v60, %v6013_v55  ;;  %v1877_v33 = vmul.f32 %v3741_v60, %v6016_v18  ;;  %v6020_v9 = vld [vmem:[#allocation16_spill] sm:$0xff]  ;;  %v6022_v1 = vld [vmem:[#allocation38_spill] sm:$0xff] }
 0x237   : > { %vm2074_vm7 = vcmp.gt.f32.partialorder %v2026_v2, 0.0  ;;  %v2122_v51 = vmul.f32 0.2, %v2026_v2  ;;  %vm2075_vm8 = vcmp.gt.f32.partialorder %v2027_v48, 0.0  ;;  %v2123_v25 = vmul.f32 0.2, %v2027_v48 }
 0x238   : > { %v1922_v32 = vadd.f32 %v1874_v22, %v1816_v30  ;;  %v1718_v39 = vadd.f32 %v1670_v11, %v1612_v14  ;;  %v1817_v54 = vadd.f32 %v6014_v42, %v1717_v31  ;;  %v1719_v0 = vadd.f32 %v6015_v23, %v1613_v12  ;;  %v5711_v11 = vpop.f32.mrb[34].mxu1  ;;  %v6021_v61 = vld [vmem:[#allocation8_spill] sm:$0xff]  ;;  %v6024_v30 = vld [vmem:[#allocation39_spill] sm:$0xff]  ;;  %v6026_v31 = vld [vmem:[#allocation14_spill] sm:$0xff] }
 0x239   : > { %v2170_v17 = vsel %vm2074_vm7, %v2026_v2, %v2122_v51  ;;  %v2171_v49 = vsel %vm2075_vm8, %v2027_v48, %v2123_v25  ;;  %v1982_v28 = vmul.f32 %v5395_v35, %v6018_v58  ;;  %v1983_v29 = vmul.f32 %v5395_v35, %v6020_v9  ;;  %v5716_v10 = vpop.f32.mrb[35].mxu1  ;;  %v6023_v48 = vld [vmem:[#allocation12_spill] sm:$0xff]  ;;  %v6027_v55 = vld [vmem:[#allocation46_spill] sm:$0xff]  ;;  %v6036_v9 = vld [vmem:[#allocation49_spill] sm:$0xff] }
 0x23a   : > { %v2028_v52 = vadd.f32 %v1980_v36, %v1922_v32  ;;  %v1818_v21 = vadd.f32 %v6017_v34, %v1718_v39  ;;  %v2201_v27 = vpack.c.bf16 %v2171_v49, %v2170_v17  ;;  %v1923_v53 = vadd.f32 %v1875_v38, %v1817_v54  ;;  %v6028_v39 = vld [vmem:[#allocation17_spill] sm:$0xff]  ;;  %v6031_v49 = vld [vmem:[#allocation19_spill] sm:$0xff]  ;;  %v6034_v58 = vld [vmem:[#allocation50_spill] sm:$0xff] }
 0x23b   : > { %v1819_v37 = vadd.f32 %v6019_v7, %v1719_v0  ;;  %v1509_v50 = vadd.f32 %v6021_v61, %v1409_v16  ;;  %v1878_v45 = vmul.f32 %v3741_v60, %v5184_v20  ;;  %v1879_v38 = vmul.f32 %v3741_v60, %v5190_v41  ;;  %v6029_v54 = vld [vmem:[#allocation45_spill] sm:$0xff]  ;;  %v6030_v0 = vld [vmem:[#allocation15_spill] sm:$0xff] }
 0x23c   : > { %vm2076_vm9 = vcmp.gt.f32.partialorder %v2028_v52, 0.0  ;;  %v2124_v6 = vmul.f32 0.2, %v2028_v52  ;;  %v1924_v59 = vadd.f32 %v1876_v15, %v1818_v21  ;;  %3370 = vmatmul.mubr.bf16.gmra.mrb[60].mxu1 %v2201_v27  ;;  %v2029_v13 = vadd.f32 %v1981_v19, %v1923_v53  ;;  %v6033_v21 = vld [vmem:[#allocation18_spill] sm:$0xff]  ;;  %v6035_v27 = vld [vmem:[#allocation47_spill] sm:$0xff] }
 0x23d   : > { %v1925_v22 = vadd.f32 %v1877_v33, %v1819_v37  ;;  %v1615_v26 = vadd.f32 %v6022_v1, %v1509_v50  ;;  %v1984_v36 = vmul.f32 %v5395_v35, %v5199_v5  ;;  %v1926_v19 = vadd.f32 %v1878_v45, %v6023_v48  ;;  %v6025_v5 = vld [vmem:[#allocation44_spill] sm:$0xff] }
 0x23e   : > { %v2172_v2 = vsel %vm2076_vm9, %v2028_v52, %v2124_v6  ;;  %v2030_v46 = vadd.f32 %v1982_v28, %v1924_v59  ;;  %vm2077_vm10 = vcmp.gt.f32.partialorder %v2029_v13, 0.0  ;;  %v2125_v56 = vmul.f32 0.2, %v2029_v13  ;;  %v6032_v52 = vld [vmem:[#allocation48_spill] sm:$0xff]  ;;  %v6037_v59 = vld [vmem:[#allocation51_spill] sm:$0xff] }
 0x23f   : > { %v2031_v16 = vadd.f32 %v1983_v29, %v1925_v22  ;;  %v1721_v20 = vadd.f32 %v6024_v30, %v1615_v26  ;;  %v1985_v60 = vmul.f32 %v5395_v35, %v5205_v4  ;;  %v2032_v44 = vadd.f32 %v1984_v36, %v1926_v19 }
 0x240   : > { %vm2078_vm11 = vcmp.gt.f32.partialorder %v2030_v46, 0.0  ;;  %v2126_v24 = vmul.f32 0.2, %v2030_v46  ;;  %v2173_v41 = vsel %vm2077_vm10, %v2029_v13, %v2125_v56  ;;  %v1928_v15 = vadd.f32 %v6027_v55, %v6026_v31  ;;  %v6039_v13 = vld [vmem:[#allocation20_spill] sm:$0xff] }
 0x241   : > { %vm2079_vm12 = vcmp.gt.f32.partialorder %v2031_v16, 0.0  ;;  %v2127_v14 = vmul.f32 0.2, %v2031_v16  ;;  %v2202_v12 = vpack.c.bf16 %v2173_v41, %v2172_v2  ;;  %v1821_v63 = vadd.f32 %v6025_v5, %v1721_v20  ;;  %v3347_v36 = vpop.f32.mrb[36].mxu1 }
 0x242   : > { %v2174_v51 = vsel %vm2078_vm11, %v2030_v46, %v2126_v24  ;;  %vm2080_vm13 = vcmp.gt.f32.partialorder %v2032_v44, 0.0  ;;  %v2128_v32 = vmul.f32 0.2, %v2032_v44  ;;  %v1929_v17 = vadd.f32 %v5318_v3, %v6028_v39 }
 0x243   : > { %v2175_v25 = vsel %vm2079_vm12, %v2031_v16, %v2127_v14  ;;  %3373 = vmatprep.mubr.bf16.mxu1 %v2202_v12  ;;  %v1927_v42 = vadd.f32 %v1879_v38, %v1821_v63  ;;  %v1986_v23 = vmul.f32 %v5395_v35, %v6029_v54  ;;  %v1987_v18 = vmul.f32 %v5395_v35, %v6030_v0  ;;  %v2338_v16 = vpop.f32.mrb[37].mxu1  ;;  %v6041_v14 = vld [vmem:[#allocation4_spill] sm:$0xff] }
 0x244   : > { %v2203_v4 = vpack.c.bf16 %v2175_v25, %v2174_v51  ;;  %v2176_v33 = vsel %vm2080_vm13, %v2032_v44, %v2128_v32  ;;  %v1930_v34 = vadd.f32 %v6032_v52, %v6031_v49  ;;  %v1931_v28 = vadd.f32 %v6034_v58, %v6033_v21  ;;  %v3348_v30 = vpop.f32.mrb[38].mxu1 }
 0x245   : > { %v1988_v53 = vmul.f32 %v5395_v35, %v6035_v27  ;;  %v2033_v3 = vadd.f32 %v1985_v60, %v1927_v42  ;;  %v2034_v7 = vadd.f32 %v1986_v23, %v1928_v15  ;;  %v2035_v37 = vadd.f32 %v1987_v18, %v1929_v17  ;;  %v6038_v35 = vld [vmem:[#allocation7_spill] sm:$0xff]  ;;  %v2341_v12 = vpop.f32.mrb[39].mxu1 }
 0x246   : > { %3374 = vmatmul.mubr.bf16.gmra.mrb[64].mxu1 %v2203_v4  ;;  %v1932_v29 = vadd.f32 %v5611_v43, %v6036_v9  ;;  %v2037_v61 = vadd.f32 %v6037_v59, %v1931_v28  ;;  %v2039_v50 = vadd.f32 %v5626_v57, %v5628_v47  ;;  %v3016_v22 = vpack.c.bf16 %v6039_v13, %v6038_v35 }
 0x247   : > { %v2036_v6 = vadd.f32 %v1988_v53, %v1930_v34  ;;  %vm2081_vm14 = vcmp.gt.f32.partialorder %v2033_v3, 0.0  ;;  %v2129_v45 = vmul.f32 0.2, %v2033_v3  ;;  %vm2082_vm15 = vcmp.gt.f32.partialorder %v2034_v7, 0.0 }
 0x248   : > { %vm2083_vm0 = vcmp.gt.f32.partialorder %v2035_v37, 0.0  ;;  %v2130_v43 = vmul.f32 0.2, %v2034_v7  ;;  %v2131_v38 = vmul.f32 0.2, %v2035_v37  ;;  %vm2085_vm1 = vcmp.gt.f32.partialorder %v2037_v61, 0.0 }
 0x249   : > { %vm2084_vm5 = vcmp.gt.f32.partialorder %v2036_v6, 0.0  ;;  %3128 = vst [vmem:[%s5751_s29 + $0x8] sm:$0xff] %v3016_v22   ;;  %v2177_v2 = vsel %vm2081_vm14, %v2033_v3, %v2129_v45  ;;  %v2132_v46 = vmul.f32 0.2, %v2036_v6  ;;  %v2133_v1 = vmul.f32 0.2, %v2037_v61 }
 0x24a   : > { %v2038_v26 = vadd.f32 %v5623_v62, %v1932_v29  ;;  %v2204_v56 = vpack.c.bf16 %v2177_v2, %v2176_v33  ;;  %v2178_v57 = vsel %vm2082_vm15, %v2034_v7, %v2130_v43  ;;  %v2179_v47 = vsel %vm2083_vm0, %v2035_v37, %v2131_v38  ;;  %v6040_v62 = vld [vmem:[#allocation3_spill] sm:$0xff] }
 0x24b   : > { %vm2087_vm2 = vcmp.gt.f32.partialorder %v2039_v50, 0.0  ;;  %v2205_v48 = vpack.c.bf16 %v2179_v47, %v2178_v57  ;;  %v2180_v19 = vsel %vm2084_vm5, %v2036_v6, %v2132_v46  ;;  %v2181_v24 = vsel %vm2085_vm1, %v2037_v61, %v2133_v1 }
 0x24c   : > { %vm2086_vm3 = vcmp.gt.f32.partialorder %v2038_v26, 0.0  ;;  %3377 = vmatprep.mubr.bf16.mxu1 %v2204_v56  ;;  %v2206_v20 = vpack.c.bf16 %v2181_v24, %v2180_v19  ;;  %v2134_v60 = vmul.f32 0.2, %v2038_v26  ;;  %v2135_v41 = vmul.f32 0.2, %v2039_v50 }
 0x24d   : > { %v3011_v44 = vpack.c.bf16 %v6041_v14, %v6040_v62  ;;  %v3026_v51 = vpack.c.bf16 %v5711_v11, %v5700_v8  ;;  %v3021_v5 = vpack.c.bf16 %v5716_v10, %v5706_v40  ;;  %v3036_v63 = vpack.c.bf16 %v3348_v30, %v3347_v36 }
 0x24e   : > { %3378 = vmatmul.mubr.bf16.gmra.mrb[68].mxu1 %v2205_v48  ;;  %v3031_v31 = vpack.c.bf16 %v2341_v12, %v2338_v16  ;;  %v2182_v55 = vsel %vm2086_vm3, %v2038_v26, %v2134_v60  ;;  %v2183_v15 = vsel %vm2087_vm2, %v2039_v50, %v2135_v41 }
 0x24f   : > { %3381 = vmatprep.mubr.bf16.mxu1 %v2206_v20  ;;  %3012 = vst [vmem:[%s5751_s29] sm:$0xff] %v3011_v44   ;;  %v2207_v25 = vpack.c.bf16 %v2183_v15, %v2182_v55  ;;  %3130 = vst [vmem:[%s5751_s29 + $0x18] sm:$0xff] %v3026_v51  }
 0x250   : > { %3129 = vst [vmem:[%s5751_s29 + $0x10] sm:$0xff] %v3021_v5   ;;  %3132 = vst [vmem:[%s5751_s29 + $0x28] sm:$0xff] %v3036_v63  }
 0x251   : > { %3131 = vst [vmem:[%s5751_s29 + $0x20] sm:$0xff] %v3031_v31  }
 0x256   : > { %3382 = vmatmul.mubr.bf16.gmra.mrb[72].mxu1 %v2207_v25 }
 0x269   : > { %v3351_v8 = vpop.f32.mrb[40].mxu1 }
 0x26a   : > { %v2354_v11 = vpop.f32.mrb[41].mxu1 }
 0x26b   : > { %v3352_v40 = vpop.f32.mrb[42].mxu1 }
 0x26c   : > { %v3046_v10 = vpack.c.bf16 %v3352_v40, %v3351_v8  ;;  %v2357_v32 = vpop.f32.mrb[43].mxu1 }
 0x26d   : > { %v3041_v39 = vpack.c.bf16 %v2357_v32, %v2354_v11 }
 0x26e   : > { %3134 = vst [vmem:[%s5751_s29 + $0x38] sm:$0xff] %v3046_v10  }
 0x26f   : > { %3133 = vst [vmem:[%s5751_s29 + $0x30] sm:$0xff] %v3041_v39  }
 0x285   : > { %v3355_v17 = vpop.f32.mrb[44].mxu1 }
 0x286   : > { %v2370_v4 = vpop.f32.mrb[45].mxu1 }
 0x287   : > { %v3356_v42 = vpop.f32.mrb[46].mxu1 }
 0x288   : > { %v3056_v54 = vpack.c.bf16 %v3356_v42, %v3355_v17  ;;  %v2373_v23 = vpop.f32.mrb[47].mxu1 }
 0x289   : > { %v3051_v0 = vpack.c.bf16 %v2373_v23, %v2370_v4 }
 0x28a   : > { %3136 = vst [vmem:[%s5751_s29 + $0x48] sm:$0xff] %v3056_v54  }
 0x28b   : > { %3135 = vst [vmem:[%s5751_s29 + $0x40] sm:$0xff] %v3051_v0  }
 0x2a6   : > { %v3359_v18 = vpop.f32.mrb[48].mxu1 }
 0x2a7   : > { %v2386_v33 = vpop.f32.mrb[49].mxu1 }
 0x2a8   : > { %v3360_v49 = vpop.f32.mrb[50].mxu1 }
 0x2a9   : > { %v3066_v52 = vpack.c.bf16 %v3360_v49, %v3359_v18  ;;  %v2389_v34 = vpop.f32.mrb[51].mxu1 }
 0x2aa   : > { %v3061_v21 = vpack.c.bf16 %v2389_v34, %v2386_v33 }
 0x2ab   : > { %3138 = vst [vmem:[%s5751_s29 + $0x58] sm:$0xff] %v3066_v52  }
 0x2ac   : > { %3137 = vst [vmem:[%s5751_s29 + $0x50] sm:$0xff] %v3061_v21  }
 0x2f6   : > { %v3363_v58 = vpop.f32.mrb[52].mxu1 }
 0x2f7   : > { %v2402_v28 = vpop.f32.mrb[53].mxu1 }
 0x2f8   : > { %v3364_v27 = vpop.f32.mrb[54].mxu1 }
 0x2f9   : > { %v3076_v53 = vpack.c.bf16 %v3364_v27, %v3363_v58  ;;  %v2405_v3 = vpop.f32.mrb[55].mxu1 }
 0x2fa   : > { %v3071_v7 = vpack.c.bf16 %v2405_v3, %v2402_v28 }
 0x2fb   : > { %3140 = vst [vmem:[%s5751_s29 + $0x68] sm:$0xff] %v3076_v53  }
 0x2fc   : > { %3139 = vst [vmem:[%s5751_s29 + $0x60] sm:$0xff] %v3071_v7  }
 0x305   : > { %v3367_v37 = vpop.f32.mrb[56].mxu1 }
 0x306   : > { %v2418_v9 = vpop.f32.mrb[57].mxu1 }
 0x307   : > { %v3368_v29 = vpop.f32.mrb[58].mxu1 }
 0x308   : > { %v3086_v6 = vpack.c.bf16 %v3368_v29, %v3367_v37  ;;  %v2421_v59 = vpop.f32.mrb[59].mxu1 }
 0x309   : > { %v3081_v61 = vpack.c.bf16 %v2421_v59, %v2418_v9 }
 0x30a   : > { %3142 = vst [vmem:[%s5751_s29 + $0x78] sm:$0xff] %v3086_v6  }
 0x30b   : > { %3141 = vst [vmem:[%s5751_s29 + $0x70] sm:$0xff] %v3081_v61  }
 0x30f   : > { %v3371_v50 = vpop.f32.mrb[60].mxu1 }
 0x310   : > { %v2434_v35 = vpop.f32.mrb[61].mxu1 }
 0x311   : > { %v3372_v13 = vpop.f32.mrb[62].mxu1 }
 0x312   : > { %v3096_v22 = vpack.c.bf16 %v3372_v13, %v3371_v50  ;;  %v2437_v45 = vpop.f32.mrb[63].mxu1 }
 0x313   : > { %v3091_v43 = vpack.c.bf16 %v2437_v45, %v2434_v35 }
 0x314   : > { %3144 = vst [vmem:[%s5751_s29 + $0x88] sm:$0xff] %v3096_v22  }
 0x315   : > { %3143 = vst [vmem:[%s5751_s29 + $0x80] sm:$0xff] %v3091_v43  }
 0x319   : > { %v3375_v38 = vpop.f32.mrb[64].mxu1 }
 0x31a   : > { %v2450_v2 = vpop.f32.mrb[65].mxu1 }
 0x31b   : > { %v3376_v46 = vpop.f32.mrb[66].mxu1 }
 0x31c   : > { %v3106_v1 = vpack.c.bf16 %v3376_v46, %v3375_v38  ;;  %v2453_v26 = vpop.f32.mrb[67].mxu1 }
 0x31d   : > { %v3101_v36 = vpack.c.bf16 %v2453_v26, %v2450_v2 }
 0x31e   : > { %3146 = vst [vmem:[%s5751_s29 + $0x98] sm:$0xff] %v3106_v1  }
 0x31f   : > { %3145 = vst [vmem:[%s5751_s29 + $0x90] sm:$0xff] %v3101_v36  }
 0x321   : > { %v3379_v56 = vpop.f32.mrb[68].mxu1 }
 0x322   : > { %v2466_v57 = vpop.f32.mrb[69].mxu1 }
 0x323   : > { %v3380_v47 = vpop.f32.mrb[70].mxu1 }
 0x324   : > { %v3116_v16 = vpack.c.bf16 %v3380_v47, %v3379_v56  ;;  %v2469_v48 = vpop.f32.mrb[71].mxu1 }
 0x325   : > { %v3111_v19 = vpack.c.bf16 %v2469_v48, %v2466_v57 }
 0x326   : > { %3148 = vst [vmem:[%s5751_s29 + $0xa8] sm:$0xff] %v3116_v16  }
 0x327   : > { %3147 = vst [vmem:[%s5751_s29 + $0xa0] sm:$0xff] %v3111_v19  }
 0x329   : > { %v3383_v24 = vpop.f32.mrb[72].mxu1 }
 0x32a   : > { %v2482_v30 = vpop.f32.mrb[73].mxu1 }
 0x32b   : > { %v3384_v20 = vpop.f32.mrb[74].mxu1 }
 0x32c   : > { %v3126_v60 = vpack.c.bf16 %v3384_v20, %v3383_v24  ;;  %v2485_v41 = vpop.f32.mrb[75].mxu1 }
 0x32d   : > { %v3121_v62 = vpack.c.bf16 %v2485_v41, %v2482_v30 }
 0x32e   : > { %3150 = vst [vmem:[%s5751_s29 + $0xb8] sm:$0xff] %v3126_v60  }
 0x32f   : > { %3149 = vst [vmem:[%s5751_s29 + $0xb0] sm:$0xff] %v3121_v62  }
 0x330 PF: > { %s14_s17 = sadd.s32 1, %s3474_s17   ;;  %s6042_s15 = smov %s3470_s16 }
 0x331   : > { %p11_p5 = scmp.ge.s32.totalorder %s14_s17, 4   ;;  %s6043_s16 = smov %s6045_s18 }
 0x333   :  { %13 = sbr.rel (!%p11_p5) target bundleno = 2 (0x2), region = 66 }

</bundles_post_ra>
